<compile_context>
chip_gen: v6e
topology: v6e:2x2x1
jax: 0.10.0
libtpu: 0.0.40
codegen_flags: <defaults>
</compile_context>

<pallas_src>
import numpy as np

import jax
import jax.numpy as jnp
from jax.experimental import pallas as pl
from jax.experimental.pallas import tpu as pltpu


def _vmem_limit_bytes():
    """Generation-aware VMEM limit (75% of physical, conservative fallback)."""
    cap = 64 * 1024 * 1024                      # v7x per-core physical VMEM
    try:
        info = pltpu.get_tpu_info()
        cap = int(getattr(info, "vmem_capacity_bytes", cap))
    except Exception:
        pass
    return int(cap) * 3 // 4


def _pick_batch_tile(b, h):
    """Images per grid step: enough to fill the column-pass matmul's M dim
    (~512 rows), while preferring >=2 grid steps (v7x has 2 TensorCores)
    whenever each step still keeps a healthy M."""
    divisors = [d for d in range(1, b + 1) if b % d == 0]
    bt = divisors[-1]
    for d in divisors:
        if 5 * h * d >= 512:
            bt = d
            break
    if b // bt < 2:
        for d in reversed(divisors):
            if d < bt and b // d >= 2 and 5 * h * d >= 256:
                bt = d
                break
    return bt


def _make_kernel(*, c, n_sigma, h, w, bt, C1, C2, alpha, data_range,
                 plan, s_l1, mm_dtype):
    inv_c = 1.0 / c
    l1_scale = (1.0 - alpha) / data_range

    def kernel(x_ref, y_ref, A_ref, B_ref, out_ref):
        # x_ref, y_ref : (bt, c, h, w) f32
        # A_ref        : (n_sigma, h, h)   banded row-Gaussian (padding folded)
        # B_ref        : (n_sigma, w, w)   banded col-Gaussian (padding folded)
        # out_ref      : (1, 1, 1) f32     per-grid-step partial sum of loss_mix

        def ssim_fields(t, ic):            # 5 raw (h, w) fields, f32
            xi = x_ref[t, ic]
            yi = y_ref[t, ic]
            return (xi, yi, xi * xi, yi * yi, xi * yi)

        pics = [None] * bt                 # running prod of cs over 15 channels
        lm = [None] * bt                   # l[-1] * l[-2] * l[-3]
        gl1 = [None] * bt                  # mean over channels of gauss |x-y|

        for s in range(n_sigma):
            entries = plan[s]              # ((ic, cs_count, l_count), ...)

            # ---- M-stacked raw-field slab for this sigma (sublane concat) ---
            slabs = []
            meta = []
            for t in range(bt):
                for (ic, cs_cnt, l_cnt) in entries:
                    slabs.extend(ssim_fields(t, ic))
                    meta.append((t, ic, cs_cnt, l_cnt))
            if s == s_l1:                  # |x-y| only needed at sigma_max
                for t in range(bt):
                    for ic in range(c):
                        slabs.append(jnp.abs(x_ref[t, ic] - y_ref[t, ic]))
            F = jnp.concatenate(slabs, axis=0).astype(mm_dtype)   # (R_s, w)

            # ---- column (W) Gaussian pass: one MXU matmul for all slabs -----
            V = jnp.dot(F, B_ref[s],
                        preferred_element_type=jnp.float32).astype(mm_dtype)
            A_s = A_ref[s]

            def row(k):                    # row (H) pass on slab k -> (h,w) f32
                return jnp.dot(A_s, V[k * h:(k + 1) * h, :],
                               preferred_element_type=jnp.float32)

            # ---- SSIM terms for every (image, channel) this sigma feeds -----
            for k, (t, ic, cs_cnt, l_cnt) in enumerate(meta):
                base = 5 * k
                mux = row(base + 0)
                muy = row(base + 1)
                exx = row(base + 2)
                eyy = row(base + 3)
                exy = row(base + 4)
                mux2 = mux * mux
                muy2 = muy * muy
                muxy = mux * muy
                # exact division: cs / l feed a 15-term product scaled by
                # compensation=200, so approx reciprocals are avoided here.
                cs = (2.0 * (exy - muxy) + C2) / (exx - mux2 + eyy - muy2 + C2)
                term = cs
                for _ in range(cs_cnt - 1):        # cs repeated per filter
                    term = term * cs
                pics[t] = term if pics[t] is None else pics[t] * term
                if l_cnt:                          # only channels feeding lM
                    l = (2.0 * muxy + C1) / (mux2 + muy2 + C1)
                    lterm = l
                    for _ in range(l_cnt - 1):
                        lterm = lterm * l
                    lm[t] = lterm if lm[t] is None else lm[t] * lterm

            # ---- gaussian L1 (sigma_max smoothing of |x-y|, mean over c) ----
            if s == s_l1:
                base = 5 * len(meta)
                for t in range(bt):
                    acc = None
                    for ic in range(c):
                        g = row(base + t * c + ic)
                        acc = g if acc is None else acc + g
                    gl1[t] = acc * inv_c

        # ---- mix + per-grid-step scalar partial sum -------------------------
        total_map = None
        for t in range(bt):
            loss_ms_ssim = 1.0 - lm[t] * pics[t]
            loss_mix = alpha * loss_ms_ssim + l1_scale * gl1[t]
            total_map = loss_mix if total_map is None else total_map + loss_mix
        out_ref[0] = jnp.sum(jnp.sum(total_map, axis=1, keepdims=True),
                             axis=0, keepdims=True)

    return kernel


def ms_ssim_l1_loss(x, y, *, gaussian_sigmas=(0.5, 1.0, 2.0, 4.0, 8.0),
                    data_range=1.0, K=(0.01, 0.03), alpha=0.025,
                    compensation=200.0, matmul_dtype=jnp.bfloat16):
    b, c, h, w = x.shape
    assert c == 3, "MS_SSIM_L1_LOSS assumes 3-channel images (groups=c, 3 L1 filters)"
    n_sigma = len(gaussian_sigmas)
    n_out = c * n_sigma
    out_per_group = n_out // c
    C1 = (K[0] * data_range) ** 2
    C2 = (K[1] * data_range) ** 2
    pad = int(2 * gaussian_sigmas[-1])
    fs = int(4 * gaussian_sigmas[-1] + 1)

    # 1D Gaussians (the torch 2D masks are their outer products, already
    # normalized since the 1D kernels sum to 1)
    coords = np.arange(fs, dtype=np.float32) - fs // 2
    g1d = np.stack([np.exp(-coords ** 2 / (2.0 * s ** 2))
                    for s in gaussian_sigmas])
    g1d = (g1d / g1d.sum(axis=1, keepdims=True)).astype(np.float32)

    # banded separable operators with the zero padding folded in:
    #   A_fold[s] @ X @ B_fold[s] == F.conv2d(X, gauss2d(sigma_s), padding=pad)
    Hp, Wp = h + 2 * pad, w + 2 * pad
    A_full = np.zeros((n_sigma, h, Hp), np.float32)
    B_full = np.zeros((n_sigma, Wp, w), np.float32)
    for s in range(n_sigma):
        for r in range(h):
            A_full[s, r, r:r + fs] = g1d[s]
        for q in range(w):
            B_full[s, q:q + fs, q] = g1d[s]
    A_fold = np.ascontiguousarray(A_full[:, :, pad:pad + h])   # (n_sigma, h, h)
    B_fold = np.ascontiguousarray(B_full[:, pad:pad + w, :])   # (n_sigma, w, w)

    # grouped-conv mapping: output channel j uses input channel j//out_per_group
    # and the Gaussian with sigma index j//3 (faithful to the torch module).
    pair_counts, l_counts = {}, {}
    for j in range(n_out):
        key = (j // out_per_group, j // 3)
        pair_counts[key] = pair_counts.get(key, 0) + 1
    for j in (n_out - 3, n_out - 2, n_out - 1):                 # channels of lM
        key = (j // out_per_group, j // 3)
        l_counts[key] = l_counts.get(key, 0) + 1
    plan = tuple(
        tuple((ic, pair_counts[(ic, s)], l_counts.get((ic, s), 0))
              for ic in range(c) if (ic, s) in pair_counts)
        for s in range(n_sigma))
    s_l1 = n_sigma - 1            # L1 branch uses the last 3 filters: sigma_max

    bt = _pick_batch_tile(b, h)
    grid_steps = b // bt

    kernel = _make_kernel(c=c, n_sigma=n_sigma, h=h, w=w, bt=bt,
                          C1=float(C1), C2=float(C2), alpha=float(alpha),
                          data_range=float(data_range), plan=plan, s_l1=s_l1,
                          mm_dtype=matmul_dtype)

    per_step = pl.pallas_call(
        kernel,
        out_shape=jax.ShapeDtypeStruct((grid_steps, 1, 1), jnp.float32),
        grid_spec=pltpu.PrefetchScalarGridSpec(
            num_scalar_prefetch=0,
            grid=(grid_steps,),
            in_specs=[
                pl.BlockSpec((bt, c, h, w), lambda i: (i, 0, 0, 0)),
                pl.BlockSpec((bt, c, h, w), lambda i: (i, 0, 0, 0)),
                pl.BlockSpec((n_sigma, h, h), lambda i: (0, 0, 0)),
                pl.BlockSpec((n_sigma, w, w), lambda i: (0, 0, 0)),
            ],
            out_specs=pl.BlockSpec((1, 1, 1), lambda i: (i, 0, 0)),
        ),
        compiler_params=pltpu.CompilerParams(
            dimension_semantics=("parallel",),
            vmem_limit_bytes=_vmem_limit_bytes(),
        ),
    )(x.astype(jnp.float32), y.astype(jnp.float32),
      jnp.asarray(A_fold, dtype=matmul_dtype),
      jnp.asarray(B_fold, dtype=matmul_dtype))

    # final reduction of the torch module: (compensation * loss_mix).mean()
    return compensation * jnp.sum(per_step) / float(b * h * w)


if __name__ == "__main__":
    key = jax.random.PRNGKey(0)
    kx, ky = jax.random.split(key)
    # small NCHW inputs consistent with the module (c=3 images in [0, 1])
    x = jax.random.uniform(kx, (2, 3, 16, 16), dtype=jnp.float32)
    y = jax.random.uniform(ky, (2, 3, 16, 16), dtype=jnp.float32)

    loss = ms_ssim_l1_loss(x, y)
    loss = jax.block_until_ready(loss)

    assert loss.shape == () and bool(jnp.isfinite(loss))
    print("KERNEL_OK")
</pallas_src>

<mosaic_0001>
module attributes {stable_mosaic.version = 11 : i64} {
  func.func @kernel(%arg0: i32, %arg1: memref<2x3x16x16xf32, #tpu.memory_space<vmem>>, %arg2: memref<2x3x16x16xf32, #tpu.memory_space<vmem>>, %arg3: memref<5x16x16xbf16, #tpu.memory_space<vmem>>, %arg4: memref<5x16x16xbf16, #tpu.memory_space<vmem>>, %arg5: memref<1x1x1xf32, #tpu.memory_space<vmem>>) attributes {dimension_semantics = [#tpu.dimension_semantics<parallel>], iteration_bounds = array<i64: 1>, scalar_prefetch = 0 : i64, scratch_operands = 0 : i64, tpu.core_type = #tpu.core_type<tc>, window_params = [{transform_indices = @transform_0, window_bounds = array<i64: 2, 3, 16, 16>}, {transform_indices = @transform_1, window_bounds = array<i64: 2, 3, 16, 16>}, {pipeline_mode = #tpu.pipeline_mode<synchronous>, transform_indices = @transform_2, window_bounds = array<i64: 5, 16, 16>}, {pipeline_mode = #tpu.pipeline_mode<synchronous>, transform_indices = @transform_3, window_bounds = array<i64: 5, 16, 16>}, {transform_indices = @transform_4, window_bounds = array<i64: 1, 1, 1>}]} {
    %c0 = arith.constant 0 : index
    %c0_0 = arith.constant 0 : index
    %c0_1 = arith.constant 0 : index
    %c0_2 = arith.constant 0 : index
    %0 = vector.load %arg1[%c0, %c0_0, %c0_1, %c0_2] : memref<2x3x16x16xf32, #tpu.memory_space<vmem>>, vector<1x1x16x16xf32>
    %1 = vector.shape_cast %0 : vector<1x1x16x16xf32> to vector<16x16xf32>
    %c0_3 = arith.constant 0 : index
    %c0_4 = arith.constant 0 : index
    %c0_5 = arith.constant 0 : index
    %c0_6 = arith.constant 0 : index
    %2 = vector.load %arg2[%c0_3, %c0_4, %c0_5, %c0_6] : memref<2x3x16x16xf32, #tpu.memory_space<vmem>>, vector<1x1x16x16xf32>
    %3 = vector.shape_cast %2 : vector<1x1x16x16xf32> to vector<16x16xf32>
    %4 = arith.mulf %1, %1 : vector<16x16xf32>
    %5 = arith.mulf %3, %3 : vector<16x16xf32>
    %6 = arith.mulf %1, %3 : vector<16x16xf32>
    %c1 = arith.constant 1 : index
    %c0_7 = arith.constant 0 : index
    %c0_8 = arith.constant 0 : index
    %c0_9 = arith.constant 0 : index
    %7 = vector.load %arg1[%c1, %c0_7, %c0_8, %c0_9] : memref<2x3x16x16xf32, #tpu.memory_space<vmem>>, vector<1x1x16x16xf32>
    %8 = vector.shape_cast %7 : vector<1x1x16x16xf32> to vector<16x16xf32>
    %c1_10 = arith.constant 1 : index
    %c0_11 = arith.constant 0 : index
    %c0_12 = arith.constant 0 : index
    %c0_13 = arith.constant 0 : index
    %9 = vector.load %arg2[%c1_10, %c0_11, %c0_12, %c0_13] : memref<2x3x16x16xf32, #tpu.memory_space<vmem>>, vector<1x1x16x16xf32>
    %10 = vector.shape_cast %9 : vector<1x1x16x16xf32> to vector<16x16xf32>
    %11 = arith.mulf %8, %8 : vector<16x16xf32>
    %12 = arith.mulf %10, %10 : vector<16x16xf32>
    %13 = arith.mulf %8, %10 : vector<16x16xf32>
    %14 = tpu.concatenate %1, %3, %4, %5, %6, %8, %10, %11, %12, %13 in 0 : vector<16x16xf32>, vector<16x16xf32>, vector<16x16xf32>, vector<16x16xf32>, vector<16x16xf32>, vector<16x16xf32>, vector<16x16xf32>, vector<16x16xf32>, vector<16x16xf32>, vector<16x16xf32> -> vector<160x16xf32>
    %15 = arith.truncf %14 : vector<160x16xf32> to vector<160x16xbf16>
    %c0_14 = arith.constant 0 : index
    %c0_15 = arith.constant 0 : index
    %c0_16 = arith.constant 0 : index
    %16 = vector.load %arg4[%c0_14, %c0_15, %c0_16] : memref<5x16x16xbf16, #tpu.memory_space<vmem>>, vector<1x16x16xbf16>
    %17 = vector.shape_cast %16 : vector<1x16x16xbf16> to vector<16x16xbf16>
    %cst = arith.constant dense<0.000000e+00> : vector<160x16xf32>
    %18 = tpu.matmul %15, %17, %cst {dimension_numbers = #tpu.dot_dimension_numbers<[1], [0], [0], [1], [0, 0, 1, 1], [], []>} : vector<160x16xbf16>, vector<16x16xbf16>, vector<160x16xf32> -> vector<160x16xf32>
    %19 = arith.truncf %18 : vector<160x16xf32> to vector<160x16xbf16>
    %c0_17 = arith.constant 0 : index
    %c0_18 = arith.constant 0 : index
    %c0_19 = arith.constant 0 : index
    %20 = vector.load %arg3[%c0_17, %c0_18, %c0_19] : memref<5x16x16xbf16, #tpu.memory_space<vmem>>, vector<1x16x16xbf16>
    %21 = vector.shape_cast %20 : vector<1x16x16xbf16> to vector<16x16xbf16>
    %22 = vector.extract_strided_slice %19 {offsets = [0, 0], sizes = [16, 16], strides = [1, 1]} : vector<160x16xbf16> to vector<16x16xbf16>
    %cst_20 = arith.constant dense<0.000000e+00> : vector<16x16xf32>
    %23 = tpu.matmul %21, %22, %cst_20 {dimension_numbers = #tpu.dot_dimension_numbers<[1], [0], [0], [1], [0, 0, 1, 1], [], []>} : vector<16x16xbf16>, vector<16x16xbf16>, vector<16x16xf32> -> vector<16x16xf32>
    %24 = vector.extract_strided_slice %19 {offsets = [16, 0], sizes = [16, 16], strides = [1, 1]} : vector<160x16xbf16> to vector<16x16xbf16>
    %cst_21 = arith.constant dense<0.000000e+00> : vector<16x16xf32>
    %25 = tpu.matmul %21, %24, %cst_21 {dimension_numbers = #tpu.dot_dimension_numbers<[1], [0], [0], [1], [0, 0, 1, 1], [], []>} : vector<16x16xbf16>, vector<16x16xbf16>, vector<16x16xf32> -> vector<16x16xf32>
    %26 = vector.extract_strided_slice %19 {offsets = [32, 0], sizes = [16, 16], strides = [1, 1]} : vector<160x16xbf16> to vector<16x16xbf16>
    %cst_22 = arith.constant dense<0.000000e+00> : vector<16x16xf32>
    %27 = tpu.matmul %21, %26, %cst_22 {dimension_numbers = #tpu.dot_dimension_numbers<[1], [0], [0], [1], [0, 0, 1, 1], [], []>} : vector<16x16xbf16>, vector<16x16xbf16>, vector<16x16xf32> -> vector<16x16xf32>
    %28 = vector.extract_strided_slice %19 {offsets = [48, 0], sizes = [16, 16], strides = [1, 1]} : vector<160x16xbf16> to vector<16x16xbf16>
    %cst_23 = arith.constant dense<0.000000e+00> : vector<16x16xf32>
    %29 = tpu.matmul %21, %28, %cst_23 {dimension_numbers = #tpu.dot_dimension_numbers<[1], [0], [0], [1], [0, 0, 1, 1], [], []>} : vector<16x16xbf16>, vector<16x16xbf16>, vector<16x16xf32> -> vector<16x16xf32>
    %30 = vector.extract_strided_slice %19 {offsets = [64, 0], sizes = [16, 16], strides = [1, 1]} : vector<160x16xbf16> to vector<16x16xbf16>
    %cst_24 = arith.constant dense<0.000000e+00> : vector<16x16xf32>
    %31 = tpu.matmul %21, %30, %cst_24 {dimension_numbers = #tpu.dot_dimension_numbers<[1], [0], [0], [1], [0, 0, 1, 1], [], []>} : vector<16x16xbf16>, vector<16x16xbf16>, vector<16x16xf32> -> vector<16x16xf32>
    %32 = arith.mulf %23, %23 : vector<16x16xf32>
    %33 = arith.mulf %25, %25 : vector<16x16xf32>
    %34 = arith.mulf %23, %25 : vector<16x16xf32>
    %35 = arith.subf %31, %34 : vector<16x16xf32>
    %cst_25 = arith.constant 2.000000e+00 : f32
    %36 = vector.broadcast %cst_25 : f32 to vector<16x16xf32>
    %37 = arith.mulf %36, %35 : vector<16x16xf32>
    %cst_26 = arith.constant 8.99999984E-4 : f32
    %38 = vector.broadcast %cst_26 : f32 to vector<16x16xf32>
    %39 = arith.addf %37, %38 : vector<16x16xf32>
    %40 = arith.subf %27, %32 : vector<16x16xf32>
    %41 = arith.addf %40, %29 : vector<16x16xf32>
    %42 = arith.subf %41, %33 : vector<16x16xf32>
    %cst_27 = arith.constant 8.99999984E-4 : f32
    %43 = vector.broadcast %cst_27 : f32 to vector<16x16xf32>
    %44 = arith.addf %42, %43 : vector<16x16xf32>
    %45 = arith.divf %39, %44 : vector<16x16xf32>
    %46 = arith.mulf %45, %45 : vector<16x16xf32>
    %47 = arith.mulf %46, %45 : vector<16x16xf32>
    %48 = vector.extract_strided_slice %19 {offsets = [80, 0], sizes = [16, 16], strides = [1, 1]} : vector<160x16xbf16> to vector<16x16xbf16>
    %cst_28 = arith.constant dense<0.000000e+00> : vector<16x16xf32>
    %49 = tpu.matmul %21, %48, %cst_28 {dimension_numbers = #tpu.dot_dimension_numbers<[1], [0], [0], [1], [0, 0, 1, 1], [], []>} : vector<16x16xbf16>, vector<16x16xbf16>, vector<16x16xf32> -> vector<16x16xf32>
    %50 = vector.extract_strided_slice %19 {offsets = [96, 0], sizes = [16, 16], strides = [1, 1]} : vector<160x16xbf16> to vector<16x16xbf16>
    %cst_29 = arith.constant dense<0.000000e+00> : vector<16x16xf32>
    %51 = tpu.matmul %21, %50, %cst_29 {dimension_numbers = #tpu.dot_dimension_numbers<[1], [0], [0], [1], [0, 0, 1, 1], [], []>} : vector<16x16xbf16>, vector<16x16xbf16>, vector<16x16xf32> -> vector<16x16xf32>
    %52 = vector.extract_strided_slice %19 {offsets = [112, 0], sizes = [16, 16], strides = [1, 1]} : vector<160x16xbf16> to vector<16x16xbf16>
    %cst_30 = arith.constant dense<0.000000e+00> : vector<16x16xf32>
    %53 = tpu.matmul %21, %52, %cst_30 {dimension_numbers = #tpu.dot_dimension_numbers<[1], [0], [0], [1], [0, 0, 1, 1], [], []>} : vector<16x16xbf16>, vector<16x16xbf16>, vector<16x16xf32> -> vector<16x16xf32>
    %54 = vector.extract_strided_slice %19 {offsets = [128, 0], sizes = [16, 16], strides = [1, 1]} : vector<160x16xbf16> to vector<16x16xbf16>
    %cst_31 = arith.constant dense<0.000000e+00> : vector<16x16xf32>
    %55 = tpu.matmul %21, %54, %cst_31 {dimension_numbers = #tpu.dot_dimension_numbers<[1], [0], [0], [1], [0, 0, 1, 1], [], []>} : vector<16x16xbf16>, vector<16x16xbf16>, vector<16x16xf32> -> vector<16x16xf32>
    %56 = vector.extract_strided_slice %19 {offsets = [144, 0], sizes = [16, 16], strides = [1, 1]} : vector<160x16xbf16> to vector<16x16xbf16>
    %cst_32 = arith.constant dense<0.000000e+00> : vector<16x16xf32>
    %57 = tpu.matmul %21, %56, %cst_32 {dimension_numbers = #tpu.dot_dimension_numbers<[1], [0], [0], [1], [0, 0, 1, 1], [], []>} : vector<16x16xbf16>, vector<16x16xbf16>, vector<16x16xf32> -> vector<16x16xf32>
    %58 = arith.mulf %49, %49 : vector<16x16xf32>
    %59 = arith.mulf %51, %51 : vector<16x16xf32>
    %60 = arith.mulf %49, %51 : vector<16x16xf32>
    %61 = arith.subf %57, %60 : vector<16x16xf32>
    %cst_33 = arith.constant 2.000000e+00 : f32
    %62 = vector.broadcast %cst_33 : f32 to vector<16x16xf32>
    %63 = arith.mulf %62, %61 : vector<16x16xf32>
    %cst_34 = arith.constant 8.99999984E-4 : f32
    %64 = vector.broadcast %cst_34 : f32 to vector<16x16xf32>
    %65 = arith.addf %63, %64 : vector<16x16xf32>
    %66 = arith.subf %53, %58 : vector<16x16xf32>
    %67 = arith.addf %66, %55 : vector<16x16xf32>
    %68 = arith.subf %67, %59 : vector<16x16xf32>
    %cst_35 = arith.constant 8.99999984E-4 : f32
    %69 = vector.broadcast %cst_35 : f32 to vector<16x16xf32>
    %70 = arith.addf %68, %69 : vector<16x16xf32>
    %71 = arith.divf %65, %70 : vector<16x16xf32>
    %72 = arith.mulf %71, %71 : vector<16x16xf32>
    %73 = arith.mulf %72, %71 : vector<16x16xf32>
    %c0_36 = arith.constant 0 : index
    %c0_37 = arith.constant 0 : index
    %c0_38 = arith.constant 0 : index
    %c0_39 = arith.constant 0 : index
    %74 = vector.load %arg1[%c0_36, %c0_37, %c0_38, %c0_39] : memref<2x3x16x16xf32, #tpu.memory_space<vmem>>, vector<1x1x16x16xf32>
    %75 = vector.shape_cast %74 : vector<1x1x16x16xf32> to vector<16x16xf32>
    %c0_40 = arith.constant 0 : index
    %c0_41 = arith.constant 0 : index
    %c0_42 = arith.constant 0 : index
    %c0_43 = arith.constant 0 : index
    %76 = vector.load %arg2[%c0_40, %c0_41, %c0_42, %c0_43] : memref<2x3x16x16xf32, #tpu.memory_space<vmem>>, vector<1x1x16x16xf32>
    %77 = vector.shape_cast %76 : vector<1x1x16x16xf32> to vector<16x16xf32>
    %78 = arith.mulf %75, %75 : vector<16x16xf32>
    %79 = arith.mulf %77, %77 : vector<16x16xf32>
    %80 = arith.mulf %75, %77 : vector<16x16xf32>
    %c0_44 = arith.constant 0 : index
    %c1_45 = arith.constant 1 : index
    %c0_46 = arith.constant 0 : index
    %c0_47 = arith.constant 0 : index
    %81 = vector.load %arg1[%c0_44, %c1_45, %c0_46, %c0_47] : memref<2x3x16x16xf32, #tpu.memory_space<vmem>>, vector<1x1x16x16xf32>
    %82 = vector.shape_cast %81 : vector<1x1x16x16xf32> to vector<16x16xf32>
    %c0_48 = arith.constant 0 : index
    %c1_49 = arith.constant 1 : index
    %c0_50 = arith.constant 0 : index
    %c0_51 = arith.constant 0 : index
    %83 = vector.load %arg2[%c0_48, %c1_49, %c0_50, %c0_51] : memref<2x3x16x16xf32, #tpu.memory_space<vmem>>, vector<1x1x16x16xf32>
    %84 = vector.shape_cast %83 : vector<1x1x16x16xf32> to vector<16x16xf32>
    %85 = arith.mulf %82, %82 : vector<16x16xf32>
    %86 = arith.mulf %84, %84 : vector<16x16xf32>
    %87 = arith.mulf %82, %84 : vector<16x16xf32>
    %c1_52 = arith.constant 1 : index
    %c0_53 = arith.constant 0 : index
    %c0_54 = arith.constant 0 : index
    %c0_55 = arith.constant 0 : index
    %88 = vector.load %arg1[%c1_52, %c0_53, %c0_54, %c0_55] : memref<2x3x16x16xf32, #tpu.memory_space<vmem>>, vector<1x1x16x16xf32>
    %89 = vector.shape_cast %88 : vector<1x1x16x16xf32> to vector<16x16xf32>
    %c1_56 = arith.constant 1 : index
    %c0_57 = arith.constant 0 : index
    %c0_58 = arith.constant 0 : index
    %c0_59 = arith.constant 0 : index
    %90 = vector.load %arg2[%c1_56, %c0_57, %c0_58, %c0_59] : memref<2x3x16x16xf32, #tpu.memory_space<vmem>>, vector<1x1x16x16xf32>
    %91 = vector.shape_cast %90 : vector<1x1x16x16xf32> to vector<16x16xf32>
    %92 = arith.mulf %89, %89 : vector<16x16xf32>
    %93 = arith.mulf %91, %91 : vector<16x16xf32>
    %94 = arith.mulf %89, %91 : vector<16x16xf32>
    %c1_60 = arith.constant 1 : index
    %c1_61 = arith.constant 1 : index
    %c0_62 = arith.constant 0 : index
    %c0_63 = arith.constant 0 : index
    %95 = vector.load %arg1[%c1_60, %c1_61, %c0_62, %c0_63] : memref<2x3x16x16xf32, #tpu.memory_space<vmem>>, vector<1x1x16x16xf32>
    %96 = vector.shape_cast %95 : vector<1x1x16x16xf32> to vector<16x16xf32>
    %c1_64 = arith.constant 1 : index
    %c1_65 = arith.constant 1 : index
    %c0_66 = arith.constant 0 : index
    %c0_67 = arith.constant 0 : index
    %97 = vector.load %arg2[%c1_64, %c1_65, %c0_66, %c0_67] : memref<2x3x16x16xf32, #tpu.memory_space<vmem>>, vector<1x1x16x16xf32>
    %98 = vector.shape_cast %97 : vector<1x1x16x16xf32> to vector<16x16xf32>
    %99 = arith.mulf %96, %96 : vector<16x16xf32>
    %100 = arith.mulf %98, %98 : vector<16x16xf32>
    %101 = arith.mulf %96, %98 : vector<16x16xf32>
    %102 = tpu.concatenate %75, %77, %78, %79, %80, %82, %84, %85, %86, %87, %89, %91, %92, %93, %94, %96 in 0 : vector<16x16xf32>, vector<16x16xf32>, vector<16x16xf32>, vector<16x16xf32>, vector<16x16xf32>, vector<16x16xf32>, vector<16x16xf32>, vector<16x16xf32>, vector<16x16xf32>, vector<16x16xf32>, vector<16x16xf32>, vector<16x16xf32>, vector<16x16xf32>, vector<16x16xf32>, vector<16x16xf32>, vector<16x16xf32> -> vector<256x16xf32>
    %103 = tpu.concatenate %98, %99, %100, %101 in 0 : vector<16x16xf32>, vector<16x16xf32>, vector<16x16xf32>, vector<16x16xf32> -> vector<64x16xf32>
    %104 = tpu.concatenate %102, %103 in 0 : vector<256x16xf32>, vector<64x16xf32> -> vector<320x16xf32>
    %105 = arith.truncf %104 : vector<320x16xf32> to vector<320x16xbf16>
    %c1_68 = arith.constant 1 : index
    %c0_69 = arith.constant 0 : index
    %c0_70 = arith.constant 0 : index
    %106 = vector.load %arg4[%c1_68, %c0_69, %c0_70] : memref<5x16x16xbf16, #tpu.memory_space<vmem>>, vector<1x16x16xbf16>
    %107 = vector.shape_cast %106 : vector<1x16x16xbf16> to vector<16x16xbf16>
    %cst_71 = arith.constant dense<0.000000e+00> : vector<320x16xf32>
    %108 = tpu.matmul %105, %107, %cst_71 {dimension_numbers = #tpu.dot_dimension_numbers<[1], [0], [0], [1], [0, 0, 1, 1], [], []>} : vector<320x16xbf16>, vector<16x16xbf16>, vector<320x16xf32> -> vector<320x16xf32>
    %109 = arith.truncf %108 : vector<320x16xf32> to vector<320x16xbf16>
    %c1_72 = arith.constant 1 : index
    %c0_73 = arith.constant 0 : index
    %c0_74 = arith.constant 0 : index
    %110 = vector.load %arg3[%c1_72, %c0_73, %c0_74] : memref<5x16x16xbf16, #tpu.memory_space<vmem>>, vector<1x16x16xbf16>
    %111 = vector.shape_cast %110 : vector<1x16x16xbf16> to vector<16x16xbf16>
    %112 = vector.extract_strided_slice %109 {offsets = [0, 0], sizes = [16, 16], strides = [1, 1]} : vector<320x16xbf16> to vector<16x16xbf16>
    %cst_75 = arith.constant dense<0.000000e+00> : vector<16x16xf32>
    %113 = tpu.matmul %111, %112, %cst_75 {dimension_numbers = #tpu.dot_dimension_numbers<[1], [0], [0], [1], [0, 0, 1, 1], [], []>} : vector<16x16xbf16>, vector<16x16xbf16>, vector<16x16xf32> -> vector<16x16xf32>
    %114 = vector.extract_strided_slice %109 {offsets = [16, 0], sizes = [16, 16], strides = [1, 1]} : vector<320x16xbf16> to vector<16x16xbf16>
    %cst_76 = arith.constant dense<0.000000e+00> : vector<16x16xf32>
    %115 = tpu.matmul %111, %114, %cst_76 {dimension_numbers = #tpu.dot_dimension_numbers<[1], [0], [0], [1], [0, 0, 1, 1], [], []>} : vector<16x16xbf16>, vector<16x16xbf16>, vector<16x16xf32> -> vector<16x16xf32>
    %116 = vector.extract_strided_slice %109 {offsets = [32, 0], sizes = [16, 16], strides = [1, 1]} : vector<320x16xbf16> to vector<16x16xbf16>
    %cst_77 = arith.constant dense<0.000000e+00> : vector<16x16xf32>
    %117 = tpu.matmul %111, %116, %cst_77 {dimension_numbers = #tpu.dot_dimension_numbers<[1], [0], [0], [1], [0, 0, 1, 1], [], []>} : vector<16x16xbf16>, vector<16x16xbf16>, vector<16x16xf32> -> vector<16x16xf32>
    %118 = vector.extract_strided_slice %109 {offsets = [48, 0], sizes = [16, 16], strides = [1, 1]} : vector<320x16xbf16> to vector<16x16xbf16>
    %cst_78 = arith.constant dense<0.000000e+00> : vector<16x16xf32>
    %119 = tpu.matmul %111, %118, %cst_78 {dimension_numbers = #tpu.dot_dimension_numbers<[1], [0], [0], [1], [0, 0, 1, 1], [], []>} : vector<16x16xbf16>, vector<16x16xbf16>, vector<16x16xf32> -> vector<16x16xf32>
    %120 = vector.extract_strided_slice %109 {offsets = [64, 0], sizes = [16, 16], strides = [1, 1]} : vector<320x16xbf16> to vector<16x16xbf16>
    %cst_79 = arith.constant dense<0.000000e+00> : vector<16x16xf32>
    %121 = tpu.matmul %111, %120, %cst_79 {dimension_numbers = #tpu.dot_dimension_numbers<[1], [0], [0], [1], [0, 0, 1, 1], [], []>} : vector<16x16xbf16>, vector<16x16xbf16>, vector<16x16xf32> -> vector<16x16xf32>
    %122 = arith.mulf %113, %113 : vector<16x16xf32>
    %123 = arith.mulf %115, %115 : vector<16x16xf32>
    %124 = arith.mulf %113, %115 : vector<16x16xf32>
    %125 = arith.subf %121, %124 : vector<16x16xf32>
    %cst_80 = arith.constant 2.000000e+00 : f32
    %126 = vector.broadcast %cst_80 : f32 to vector<16x16xf32>
    %127 = arith.mulf %126, %125 : vector<16x16xf32>
    %cst_81 = arith.constant 8.99999984E-4 : f32
    %128 = vector.broadcast %cst_81 : f32 to vector<16x16xf32>
    %129 = arith.addf %127, %128 : vector<16x16xf32>
    %130 = arith.subf %117, %122 : vector<16x16xf32>
    %131 = arith.addf %130, %119 : vector<16x16xf32>
    %132 = arith.subf %131, %123 : vector<16x16xf32>
    %cst_82 = arith.constant 8.99999984E-4 : f32
    %133 = vector.broadcast %cst_82 : f32 to vector<16x16xf32>
    %134 = arith.addf %132, %133 : vector<16x16xf32>
    %135 = arith.divf %129, %134 : vector<16x16xf32>
    %136 = arith.mulf %135, %135 : vector<16x16xf32>
    %137 = arith.mulf %47, %136 : vector<16x16xf32>
    %138 = vector.extract_strided_slice %109 {offsets = [80, 0], sizes = [16, 16], strides = [1, 1]} : vector<320x16xbf16> to vector<16x16xbf16>
    %cst_83 = arith.constant dense<0.000000e+00> : vector<16x16xf32>
    %139 = tpu.matmul %111, %138, %cst_83 {dimension_numbers = #tpu.dot_dimension_numbers<[1], [0], [0], [1], [0, 0, 1, 1], [], []>} : vector<16x16xbf16>, vector<16x16xbf16>, vector<16x16xf32> -> vector<16x16xf32>
    %140 = vector.extract_strided_slice %109 {offsets = [96, 0], sizes = [16, 16], strides = [1, 1]} : vector<320x16xbf16> to vector<16x16xbf16>
    %cst_84 = arith.constant dense<0.000000e+00> : vector<16x16xf32>
    %141 = tpu.matmul %111, %140, %cst_84 {dimension_numbers = #tpu.dot_dimension_numbers<[1], [0], [0], [1], [0, 0, 1, 1], [], []>} : vector<16x16xbf16>, vector<16x16xbf16>, vector<16x16xf32> -> vector<16x16xf32>
    %142 = vector.extract_strided_slice %109 {offsets = [112, 0], sizes = [16, 16], strides = [1, 1]} : vector<320x16xbf16> to vector<16x16xbf16>
    %cst_85 = arith.constant dense<0.000000e+00> : vector<16x16xf32>
    %143 = tpu.matmul %111, %142, %cst_85 {dimension_numbers = #tpu.dot_dimension_numbers<[1], [0], [0], [1], [0, 0, 1, 1], [], []>} : vector<16x16xbf16>, vector<16x16xbf16>, vector<16x16xf32> -> vector<16x16xf32>
    %144 = vector.extract_strided_slice %109 {offsets = [128, 0], sizes = [16, 16], strides = [1, 1]} : vector<320x16xbf16> to vector<16x16xbf16>
    %cst_86 = arith.constant dense<0.000000e+00> : vector<16x16xf32>
    %145 = tpu.matmul %111, %144, %cst_86 {dimension_numbers = #tpu.dot_dimension_numbers<[1], [0], [0], [1], [0, 0, 1, 1], [], []>} : vector<16x16xbf16>, vector<16x16xbf16>, vector<16x16xf32> -> vector<16x16xf32>
    %146 = vector.extract_strided_slice %109 {offsets = [144, 0], sizes = [16, 16], strides = [1, 1]} : vector<320x16xbf16> to vector<16x16xbf16>
    %cst_87 = arith.constant dense<0.000000e+00> : vector<16x16xf32>
    %147 = tpu.matmul %111, %146, %cst_87 {dimension_numbers = #tpu.dot_dimension_numbers<[1], [0], [0], [1], [0, 0, 1, 1], [], []>} : vector<16x16xbf16>, vector<16x16xbf16>, vector<16x16xf32> -> vector<16x16xf32>
    %148 = arith.mulf %139, %139 : vector<16x16xf32>
    %149 = arith.mulf %141, %141 : vector<16x16xf32>
    %150 = arith.mulf %139, %141 : vector<16x16xf32>
    %151 = arith.subf %147, %150 : vector<16x16xf32>
    %cst_88 = arith.constant 2.000000e+00 : f32
    %152 = vector.broadcast %cst_88 : f32 to vector<16x16xf32>
    %153 = arith.mulf %152, %151 : vector<16x16xf32>
    %cst_89 = arith.constant 8.99999984E-4 : f32
    %154 = vector.broadcast %cst_89 : f32 to vector<16x16xf32>
    %155 = arith.addf %153, %154 : vector<16x16xf32>
    %156 = arith.subf %143, %148 : vector<16x16xf32>
    %157 = arith.addf %156, %145 : vector<16x16xf32>
    %158 = arith.subf %157, %149 : vector<16x16xf32>
    %cst_90 = arith.constant 8.99999984E-4 : f32
    %159 = vector.broadcast %cst_90 : f32 to vector<16x16xf32>
    %160 = arith.addf %158, %159 : vector<16x16xf32>
    %161 = arith.divf %155, %160 : vector<16x16xf32>
    %162 = arith.mulf %137, %161 : vector<16x16xf32>
    %163 = vector.extract_strided_slice %109 {offsets = [160, 0], sizes = [16, 16], strides = [1, 1]} : vector<320x16xbf16> to vector<16x16xbf16>
    %cst_91 = arith.constant dense<0.000000e+00> : vector<16x16xf32>
    %164 = tpu.matmul %111, %163, %cst_91 {dimension_numbers = #tpu.dot_dimension_numbers<[1], [0], [0], [1], [0, 0, 1, 1], [], []>} : vector<16x16xbf16>, vector<16x16xbf16>, vector<16x16xf32> -> vector<16x16xf32>
    %165 = vector.extract_strided_slice %109 {offsets = [176, 0], sizes = [16, 16], strides = [1, 1]} : vector<320x16xbf16> to vector<16x16xbf16>
    %cst_92 = arith.constant dense<0.000000e+00> : vector<16x16xf32>
    %166 = tpu.matmul %111, %165, %cst_92 {dimension_numbers = #tpu.dot_dimension_numbers<[1], [0], [0], [1], [0, 0, 1, 1], [], []>} : vector<16x16xbf16>, vector<16x16xbf16>, vector<16x16xf32> -> vector<16x16xf32>
    %167 = vector.extract_strided_slice %109 {offsets = [192, 0], sizes = [16, 16], strides = [1, 1]} : vector<320x16xbf16> to vector<16x16xbf16>
    %cst_93 = arith.constant dense<0.000000e+00> : vector<16x16xf32>
    %168 = tpu.matmul %111, %167, %cst_93 {dimension_numbers = #tpu.dot_dimension_numbers<[1], [0], [0], [1], [0, 0, 1, 1], [], []>} : vector<16x16xbf16>, vector<16x16xbf16>, vector<16x16xf32> -> vector<16x16xf32>
    %169 = vector.extract_strided_slice %109 {offsets = [208, 0], sizes = [16, 16], strides = [1, 1]} : vector<320x16xbf16> to vector<16x16xbf16>
    %cst_94 = arith.constant dense<0.000000e+00> : vector<16x16xf32>
    %170 = tpu.matmul %111, %169, %cst_94 {dimension_numbers = #tpu.dot_dimension_numbers<[1], [0], [0], [1], [0, 0, 1, 1], [], []>} : vector<16x16xbf16>, vector<16x16xbf16>, vector<16x16xf32> -> vector<16x16xf32>
    %171 = vector.extract_strided_slice %109 {offsets = [224, 0], sizes = [16, 16], strides = [1, 1]} : vector<320x16xbf16> to vector<16x16xbf16>
    %cst_95 = arith.constant dense<0.000000e+00> : vector<16x16xf32>
    %172 = tpu.matmul %111, %171, %cst_95 {dimension_numbers = #tpu.dot_dimension_numbers<[1], [0], [0], [1], [0, 0, 1, 1], [], []>} : vector<16x16xbf16>, vector<16x16xbf16>, vector<16x16xf32> -> vector<16x16xf32>
    %173 = arith.mulf %164, %164 : vector<16x16xf32>
    %174 = arith.mulf %166, %166 : vector<16x16xf32>
    %175 = arith.mulf %164, %166 : vector<16x16xf32>
    %176 = arith.subf %172, %175 : vector<16x16xf32>
    %cst_96 = arith.constant 2.000000e+00 : f32
    %177 = vector.broadcast %cst_96 : f32 to vector<16x16xf32>
    %178 = arith.mulf %177, %176 : vector<16x16xf32>
    %cst_97 = arith.constant 8.99999984E-4 : f32
    %179 = vector.broadcast %cst_97 : f32 to vector<16x16xf32>
    %180 = arith.addf %178, %179 : vector<16x16xf32>
    %181 = arith.subf %168, %173 : vector<16x16xf32>
    %182 = arith.addf %181, %170 : vector<16x16xf32>
    %183 = arith.subf %182, %174 : vector<16x16xf32>
    %cst_98 = arith.constant 8.99999984E-4 : f32
    %184 = vector.broadcast %cst_98 : f32 to vector<16x16xf32>
    %185 = arith.addf %183, %184 : vector<16x16xf32>
    %186 = arith.divf %180, %185 : vector<16x16xf32>
    %187 = arith.mulf %186, %186 : vector<16x16xf32>
    %188 = arith.mulf %73, %187 : vector<16x16xf32>
    %189 = vector.extract_strided_slice %109 {offsets = [240, 0], sizes = [16, 16], strides = [1, 1]} : vector<320x16xbf16> to vector<16x16xbf16>
    %cst_99 = arith.constant dense<0.000000e+00> : vector<16x16xf32>
    %190 = tpu.matmul %111, %189, %cst_99 {dimension_numbers = #tpu.dot_dimension_numbers<[1], [0], [0], [1], [0, 0, 1, 1], [], []>} : vector<16x16xbf16>, vector<16x16xbf16>, vector<16x16xf32> -> vector<16x16xf32>
    %191 = vector.extract_strided_slice %109 {offsets = [256, 0], sizes = [16, 16], strides = [1, 1]} : vector<320x16xbf16> to vector<16x16xbf16>
    %cst_100 = arith.constant dense<0.000000e+00> : vector<16x16xf32>
    %192 = tpu.matmul %111, %191, %cst_100 {dimension_numbers = #tpu.dot_dimension_numbers<[1], [0], [0], [1], [0, 0, 1, 1], [], []>} : vector<16x16xbf16>, vector<16x16xbf16>, vector<16x16xf32> -> vector<16x16xf32>
    %193 = vector.extract_strided_slice %109 {offsets = [272, 0], sizes = [16, 16], strides = [1, 1]} : vector<320x16xbf16> to vector<16x16xbf16>
    %cst_101 = arith.constant dense<0.000000e+00> : vector<16x16xf32>
    %194 = tpu.matmul %111, %193, %cst_101 {dimension_numbers = #tpu.dot_dimension_numbers<[1], [0], [0], [1], [0, 0, 1, 1], [], []>} : vector<16x16xbf16>, vector<16x16xbf16>, vector<16x16xf32> -> vector<16x16xf32>
    %195 = vector.extract_strided_slice %109 {offsets = [288, 0], sizes = [16, 16], strides = [1, 1]} : vector<320x16xbf16> to vector<16x16xbf16>
    %cst_102 = arith.constant dense<0.000000e+00> : vector<16x16xf32>
    %196 = tpu.matmul %111, %195, %cst_102 {dimension_numbers = #tpu.dot_dimension_numbers<[1], [0], [0], [1], [0, 0, 1, 1], [], []>} : vector<16x16xbf16>, vector<16x16xbf16>, vector<16x16xf32> -> vector<16x16xf32>
    %197 = vector.extract_strided_slice %109 {offsets = [304, 0], sizes = [16, 16], strides = [1, 1]} : vector<320x16xbf16> to vector<16x16xbf16>
    %cst_103 = arith.constant dense<0.000000e+00> : vector<16x16xf32>
    %198 = tpu.matmul %111, %197, %cst_103 {dimension_numbers = #tpu.dot_dimension_numbers<[1], [0], [0], [1], [0, 0, 1, 1], [], []>} : vector<16x16xbf16>, vector<16x16xbf16>, vector<16x16xf32> -> vector<16x16xf32>
    %199 = arith.mulf %190, %190 : vector<16x16xf32>
    %200 = arith.mulf %192, %192 : vector<16x16xf32>
    %201 = arith.mulf %190, %192 : vector<16x16xf32>
    %202 = arith.subf %198, %201 : vector<16x16xf32>
    %cst_104 = arith.constant 2.000000e+00 : f32
    %203 = vector.broadcast %cst_104 : f32 to vector<16x16xf32>
    %204 = arith.mulf %203, %202 : vector<16x16xf32>
    %cst_105 = arith.constant 8.99999984E-4 : f32
    %205 = vector.broadcast %cst_105 : f32 to vector<16x16xf32>
    %206 = arith.addf %204, %205 : vector<16x16xf32>
    %207 = arith.subf %194, %199 : vector<16x16xf32>
    %208 = arith.addf %207, %196 : vector<16x16xf32>
    %209 = arith.subf %208, %200 : vector<16x16xf32>
    %cst_106 = arith.constant 8.99999984E-4 : f32
    %210 = vector.broadcast %cst_106 : f32 to vector<16x16xf32>
    %211 = arith.addf %209, %210 : vector<16x16xf32>
    %212 = arith.divf %206, %211 : vector<16x16xf32>
    %213 = arith.mulf %188, %212 : vector<16x16xf32>
    %c0_107 = arith.constant 0 : index
    %c1_108 = arith.constant 1 : index
    %c0_109 = arith.constant 0 : index
    %c0_110 = arith.constant 0 : index
    %214 = vector.load %arg1[%c0_107, %c1_108, %c0_109, %c0_110] : memref<2x3x16x16xf32, #tpu.memory_space<vmem>>, vector<1x1x16x16xf32>
    %215 = vector.shape_cast %214 : vector<1x1x16x16xf32> to vector<16x16xf32>
    %c0_111 = arith.constant 0 : index
    %c1_112 = arith.constant 1 : index
    %c0_113 = arith.constant 0 : index
    %c0_114 = arith.constant 0 : index
    %216 = vector.load %arg2[%c0_111, %c1_112, %c0_113, %c0_114] : memref<2x3x16x16xf32, #tpu.memory_space<vmem>>, vector<1x1x16x16xf32>
    %217 = vector.shape_cast %216 : vector<1x1x16x16xf32> to vector<16x16xf32>
    %218 = arith.mulf %215, %215 : vector<16x16xf32>
    %219 = arith.mulf %217, %217 : vector<16x16xf32>
    %220 = arith.mulf %215, %217 : vector<16x16xf32>
    %c1_115 = arith.constant 1 : index
    %c1_116 = arith.constant 1 : index
    %c0_117 = arith.constant 0 : index
    %c0_118 = arith.constant 0 : index
    %221 = vector.load %arg1[%c1_115, %c1_116, %c0_117, %c0_118] : memref<2x3x16x16xf32, #tpu.memory_space<vmem>>, vector<1x1x16x16xf32>
    %222 = vector.shape_cast %221 : vector<1x1x16x16xf32> to vector<16x16xf32>
    %c1_119 = arith.constant 1 : index
    %c1_120 = arith.constant 1 : index
    %c0_121 = arith.constant 0 : index
    %c0_122 = arith.constant 0 : index
    %223 = vector.load %arg2[%c1_119, %c1_120, %c0_121, %c0_122] : memref<2x3x16x16xf32, #tpu.memory_space<vmem>>, vector<1x1x16x16xf32>
    %224 = vector.shape_cast %223 : vector<1x1x16x16xf32> to vector<16x16xf32>
    %225 = arith.mulf %222, %222 : vector<16x16xf32>
    %226 = arith.mulf %224, %224 : vector<16x16xf32>
    %227 = arith.mulf %222, %224 : vector<16x16xf32>
    %228 = tpu.concatenate %215, %217, %218, %219, %220, %222, %224, %225, %226, %227 in 0 : vector<16x16xf32>, vector<16x16xf32>, vector<16x16xf32>, vector<16x16xf32>, vector<16x16xf32>, vector<16x16xf32>, vector<16x16xf32>, vector<16x16xf32>, vector<16x16xf32>, vector<16x16xf32> -> vector<160x16xf32>
    %229 = arith.truncf %228 : vector<160x16xf32> to vector<160x16xbf16>
    %c2 = arith.constant 2 : index
    %c0_123 = arith.constant 0 : index
    %c0_124 = arith.constant 0 : index
    %230 = vector.load %arg4[%c2, %c0_123, %c0_124] : memref<5x16x16xbf16, #tpu.memory_space<vmem>>, vector<1x16x16xbf16>
    %231 = vector.shape_cast %230 : vector<1x16x16xbf16> to vector<16x16xbf16>
    %cst_125 = arith.constant dense<0.000000e+00> : vector<160x16xf32>
    %232 = tpu.matmul %229, %231, %cst_125 {dimension_numbers = #tpu.dot_dimension_numbers<[1], [0], [0], [1], [0, 0, 1, 1], [], []>} : vector<160x16xbf16>, vector<16x16xbf16>, vector<160x16xf32> -> vector<160x16xf32>
    %233 = arith.truncf %232 : vector<160x16xf32> to vector<160x16xbf16>
    %c2_126 = arith.constant 2 : index
    %c0_127 = arith.constant 0 : index
    %c0_128 = arith.constant 0 : index
    %234 = vector.load %arg3[%c2_126, %c0_127, %c0_128] : memref<5x16x16xbf16, #tpu.memory_space<vmem>>, vector<1x16x16xbf16>
    %235 = vector.shape_cast %234 : vector<1x16x16xbf16> to vector<16x16xbf16>
    %236 = vector.extract_strided_slice %233 {offsets = [0, 0], sizes = [16, 16], strides = [1, 1]} : vector<160x16xbf16> to vector<16x16xbf16>
    %cst_129 = arith.constant dense<0.000000e+00> : vector<16x16xf32>
    %237 = tpu.matmul %235, %236, %cst_129 {dimension_numbers = #tpu.dot_dimension_numbers<[1], [0], [0], [1], [0, 0, 1, 1], [], []>} : vector<16x16xbf16>, vector<16x16xbf16>, vector<16x16xf32> -> vector<16x16xf32>
    %238 = vector.extract_strided_slice %233 {offsets = [16, 0], sizes = [16, 16], strides = [1, 1]} : vector<160x16xbf16> to vector<16x16xbf16>
    %cst_130 = arith.constant dense<0.000000e+00> : vector<16x16xf32>
    %239 = tpu.matmul %235, %238, %cst_130 {dimension_numbers = #tpu.dot_dimension_numbers<[1], [0], [0], [1], [0, 0, 1, 1], [], []>} : vector<16x16xbf16>, vector<16x16xbf16>, vector<16x16xf32> -> vector<16x16xf32>
    %240 = vector.extract_strided_slice %233 {offsets = [32, 0], sizes = [16, 16], strides = [1, 1]} : vector<160x16xbf16> to vector<16x16xbf16>
    %cst_131 = arith.constant dense<0.000000e+00> : vector<16x16xf32>
    %241 = tpu.matmul %235, %240, %cst_131 {dimension_numbers = #tpu.dot_dimension_numbers<[1], [0], [0], [1], [0, 0, 1, 1], [], []>} : vector<16x16xbf16>, vector<16x16xbf16>, vector<16x16xf32> -> vector<16x16xf32>
    %242 = vector.extract_strided_slice %233 {offsets = [48, 0], sizes = [16, 16], strides = [1, 1]} : vector<160x16xbf16> to vector<16x16xbf16>
    %cst_132 = arith.constant dense<0.000000e+00> : vector<16x16xf32>
    %243 = tpu.matmul %235, %242, %cst_132 {dimension_numbers = #tpu.dot_dimension_numbers<[1], [0], [0], [1], [0, 0, 1, 1], [], []>} : vector<16x16xbf16>, vector<16x16xbf16>, vector<16x16xf32> -> vector<16x16xf32>
    %244 = vector.extract_strided_slice %233 {offsets = [64, 0], sizes = [16, 16], strides = [1, 1]} : vector<160x16xbf16> to vector<16x16xbf16>
    %cst_133 = arith.constant dense<0.000000e+00> : vector<16x16xf32>
    %245 = tpu.matmul %235, %244, %cst_133 {dimension_numbers = #tpu.dot_dimension_numbers<[1], [0], [0], [1], [0, 0, 1, 1], [], []>} : vector<16x16xbf16>, vector<16x16xbf16>, vector<16x16xf32> -> vector<16x16xf32>
    %246 = arith.mulf %237, %237 : vector<16x16xf32>
    %247 = arith.mulf %239, %239 : vector<16x16xf32>
    %248 = arith.mulf %237, %239 : vector<16x16xf32>
    %249 = arith.subf %245, %248 : vector<16x16xf32>
    %cst_134 = arith.constant 2.000000e+00 : f32
    %250 = vector.broadcast %cst_134 : f32 to vector<16x16xf32>
    %251 = arith.mulf %250, %249 : vector<16x16xf32>
    %cst_135 = arith.constant 8.99999984E-4 : f32
    %252 = vector.broadcast %cst_135 : f32 to vector<16x16xf32>
    %253 = arith.addf %251, %252 : vector<16x16xf32>
    %254 = arith.subf %241, %246 : vector<16x16xf32>
    %255 = arith.addf %254, %243 : vector<16x16xf32>
    %256 = arith.subf %255, %247 : vector<16x16xf32>
    %cst_136 = arith.constant 8.99999984E-4 : f32
    %257 = vector.broadcast %cst_136 : f32 to vector<16x16xf32>
    %258 = arith.addf %256, %257 : vector<16x16xf32>
    %259 = arith.divf %253, %258 : vector<16x16xf32>
    %260 = arith.mulf %259, %259 : vector<16x16xf32>
    %261 = arith.mulf %260, %259 : vector<16x16xf32>
    %262 = arith.mulf %162, %261 : vector<16x16xf32>
    %263 = vector.extract_strided_slice %233 {offsets = [80, 0], sizes = [16, 16], strides = [1, 1]} : vector<160x16xbf16> to vector<16x16xbf16>
    %cst_137 = arith.constant dense<0.000000e+00> : vector<16x16xf32>
    %264 = tpu.matmul %235, %263, %cst_137 {dimension_numbers = #tpu.dot_dimension_numbers<[1], [0], [0], [1], [0, 0, 1, 1], [], []>} : vector<16x16xbf16>, vector<16x16xbf16>, vector<16x16xf32> -> vector<16x16xf32>
    %265 = vector.extract_strided_slice %233 {offsets = [96, 0], sizes = [16, 16], strides = [1, 1]} : vector<160x16xbf16> to vector<16x16xbf16>
    %cst_138 = arith.constant dense<0.000000e+00> : vector<16x16xf32>
    %266 = tpu.matmul %235, %265, %cst_138 {dimension_numbers = #tpu.dot_dimension_numbers<[1], [0], [0], [1], [0, 0, 1, 1], [], []>} : vector<16x16xbf16>, vector<16x16xbf16>, vector<16x16xf32> -> vector<16x16xf32>
    %267 = vector.extract_strided_slice %233 {offsets = [112, 0], sizes = [16, 16], strides = [1, 1]} : vector<160x16xbf16> to vector<16x16xbf16>
    %cst_139 = arith.constant dense<0.000000e+00> : vector<16x16xf32>
    %268 = tpu.matmul %235, %267, %cst_139 {dimension_numbers = #tpu.dot_dimension_numbers<[1], [0], [0], [1], [0, 0, 1, 1], [], []>} : vector<16x16xbf16>, vector<16x16xbf16>, vector<16x16xf32> -> vector<16x16xf32>
    %269 = vector.extract_strided_slice %233 {offsets = [128, 0], sizes = [16, 16], strides = [1, 1]} : vector<160x16xbf16> to vector<16x16xbf16>
    %cst_140 = arith.constant dense<0.000000e+00> : vector<16x16xf32>
    %270 = tpu.matmul %235, %269, %cst_140 {dimension_numbers = #tpu.dot_dimension_numbers<[1], [0], [0], [1], [0, 0, 1, 1], [], []>} : vector<16x16xbf16>, vector<16x16xbf16>, vector<16x16xf32> -> vector<16x16xf32>
    %271 = vector.extract_strided_slice %233 {offsets = [144, 0], sizes = [16, 16], strides = [1, 1]} : vector<160x16xbf16> to vector<16x16xbf16>
    %cst_141 = arith.constant dense<0.000000e+00> : vector<16x16xf32>
    %272 = tpu.matmul %235, %271, %cst_141 {dimension_numbers = #tpu.dot_dimension_numbers<[1], [0], [0], [1], [0, 0, 1, 1], [], []>} : vector<16x16xbf16>, vector<16x16xbf16>, vector<16x16xf32> -> vector<16x16xf32>
    %273 = arith.mulf %264, %264 : vector<16x16xf32>
    %274 = arith.mulf %266, %266 : vector<16x16xf32>
    %275 = arith.mulf %264, %266 : vector<16x16xf32>
    %276 = arith.subf %272, %275 : vector<16x16xf32>
    %cst_142 = arith.constant 2.000000e+00 : f32
    %277 = vector.broadcast %cst_142 : f32 to vector<16x16xf32>
    %278 = arith.mulf %277, %276 : vector<16x16xf32>
    %cst_143 = arith.constant 8.99999984E-4 : f32
    %279 = vector.broadcast %cst_143 : f32 to vector<16x16xf32>
    %280 = arith.addf %278, %279 : vector<16x16xf32>
    %281 = arith.subf %268, %273 : vector<16x16xf32>
    %282 = arith.addf %281, %270 : vector<16x16xf32>
    %283 = arith.subf %282, %274 : vector<16x16xf32>
    %cst_144 = arith.constant 8.99999984E-4 : f32
    %284 = vector.broadcast %cst_144 : f32 to vector<16x16xf32>
    %285 = arith.addf %283, %284 : vector<16x16xf32>
    %286 = arith.divf %280, %285 : vector<16x16xf32>
    %287 = arith.mulf %286, %286 : vector<16x16xf32>
    %288 = arith.mulf %287, %286 : vector<16x16xf32>
    %289 = arith.mulf %213, %288 : vector<16x16xf32>
    %c0_145 = arith.constant 0 : index
    %c1_146 = arith.constant 1 : index
    %c0_147 = arith.constant 0 : index
    %c0_148 = arith.constant 0 : index
    %290 = vector.load %arg1[%c0_145, %c1_146, %c0_147, %c0_148] : memref<2x3x16x16xf32, #tpu.memory_space<vmem>>, vector<1x1x16x16xf32>
    %291 = vector.shape_cast %290 : vector<1x1x16x16xf32> to vector<16x16xf32>
    %c0_149 = arith.constant 0 : index
    %c1_150 = arith.constant 1 : index
    %c0_151 = arith.constant 0 : index
    %c0_152 = arith.constant 0 : index
    %292 = vector.load %arg2[%c0_149, %c1_150, %c0_151, %c0_152] : memref<2x3x16x16xf32, #tpu.memory_space<vmem>>, vector<1x1x16x16xf32>
    %293 = vector.shape_cast %292 : vector<1x1x16x16xf32> to vector<16x16xf32>
    %294 = arith.mulf %291, %291 : vector<16x16xf32>
    %295 = arith.mulf %293, %293 : vector<16x16xf32>
    %296 = arith.mulf %291, %293 : vector<16x16xf32>
    %c0_153 = arith.constant 0 : index
    %c2_154 = arith.constant 2 : index
    %c0_155 = arith.constant 0 : index
    %c0_156 = arith.constant 0 : index
    %297 = vector.load %arg1[%c0_153, %c2_154, %c0_155, %c0_156] : memref<2x3x16x16xf32, #tpu.memory_space<vmem>>, vector<1x1x16x16xf32>
    %298 = vector.shape_cast %297 : vector<1x1x16x16xf32> to vector<16x16xf32>
    %c0_157 = arith.constant 0 : index
    %c2_158 = arith.constant 2 : index
    %c0_159 = arith.constant 0 : index
    %c0_160 = arith.constant 0 : index
    %299 = vector.load %arg2[%c0_157, %c2_158, %c0_159, %c0_160] : memref<2x3x16x16xf32, #tpu.memory_space<vmem>>, vector<1x1x16x16xf32>
    %300 = vector.shape_cast %299 : vector<1x1x16x16xf32> to vector<16x16xf32>
    %301 = arith.mulf %298, %298 : vector<16x16xf32>
    %302 = arith.mulf %300, %300 : vector<16x16xf32>
    %303 = arith.mulf %298, %300 : vector<16x16xf32>
    %c1_161 = arith.constant 1 : index
    %c1_162 = arith.constant 1 : index
    %c0_163 = arith.constant 0 : index
    %c0_164 = arith.constant 0 : index
    %304 = vector.load %arg1[%c1_161, %c1_162, %c0_163, %c0_164] : memref<2x3x16x16xf32, #tpu.memory_space<vmem>>, vector<1x1x16x16xf32>
    %305 = vector.shape_cast %304 : vector<1x1x16x16xf32> to vector<16x16xf32>
    %c1_165 = arith.constant 1 : index
    %c1_166 = arith.constant 1 : index
    %c0_167 = arith.constant 0 : index
    %c0_168 = arith.constant 0 : index
    %306 = vector.load %arg2[%c1_165, %c1_166, %c0_167, %c0_168] : memref<2x3x16x16xf32, #tpu.memory_space<vmem>>, vector<1x1x16x16xf32>
    %307 = vector.shape_cast %306 : vector<1x1x16x16xf32> to vector<16x16xf32>
    %308 = arith.mulf %305, %305 : vector<16x16xf32>
    %309 = arith.mulf %307, %307 : vector<16x16xf32>
    %310 = arith.mulf %305, %307 : vector<16x16xf32>
    %c1_169 = arith.constant 1 : index
    %c2_170 = arith.constant 2 : index
    %c0_171 = arith.constant 0 : index
    %c0_172 = arith.constant 0 : index
    %311 = vector.load %arg1[%c1_169, %c2_170, %c0_171, %c0_172] : memref<2x3x16x16xf32, #tpu.memory_space<vmem>>, vector<1x1x16x16xf32>
    %312 = vector.shape_cast %311 : vector<1x1x16x16xf32> to vector<16x16xf32>
    %c1_173 = arith.constant 1 : index
    %c2_174 = arith.constant 2 : index
    %c0_175 = arith.constant 0 : index
    %c0_176 = arith.constant 0 : index
    %313 = vector.load %arg2[%c1_173, %c2_174, %c0_175, %c0_176] : memref<2x3x16x16xf32, #tpu.memory_space<vmem>>, vector<1x1x16x16xf32>
    %314 = vector.shape_cast %313 : vector<1x1x16x16xf32> to vector<16x16xf32>
    %315 = arith.mulf %312, %312 : vector<16x16xf32>
    %316 = arith.mulf %314, %314 : vector<16x16xf32>
    %317 = arith.mulf %312, %314 : vector<16x16xf32>
    %318 = tpu.concatenate %291, %293, %294, %295, %296, %298, %300, %301, %302, %303, %305, %307, %308, %309, %310, %312 in 0 : vector<16x16xf32>, vector<16x16xf32>, vector<16x16xf32>, vector<16x16xf32>, vector<16x16xf32>, vector<16x16xf32>, vector<16x16xf32>, vector<16x16xf32>, vector<16x16xf32>, vector<16x16xf32>, vector<16x16xf32>, vector<16x16xf32>, vector<16x16xf32>, vector<16x16xf32>, vector<16x16xf32>, vector<16x16xf32> -> vector<256x16xf32>
    %319 = tpu.concatenate %314, %315, %316, %317 in 0 : vector<16x16xf32>, vector<16x16xf32>, vector<16x16xf32>, vector<16x16xf32> -> vector<64x16xf32>
    %320 = tpu.concatenate %318, %319 in 0 : vector<256x16xf32>, vector<64x16xf32> -> vector<320x16xf32>
    %321 = arith.truncf %320 : vector<320x16xf32> to vector<320x16xbf16>
    %c3 = arith.constant 3 : index
    %c0_177 = arith.constant 0 : index
    %c0_178 = arith.constant 0 : index
    %322 = vector.load %arg4[%c3, %c0_177, %c0_178] : memref<5x16x16xbf16, #tpu.memory_space<vmem>>, vector<1x16x16xbf16>
    %323 = vector.shape_cast %322 : vector<1x16x16xbf16> to vector<16x16xbf16>
    %cst_179 = arith.constant dense<0.000000e+00> : vector<320x16xf32>
    %324 = tpu.matmul %321, %323, %cst_179 {dimension_numbers = #tpu.dot_dimension_numbers<[1], [0], [0], [1], [0, 0, 1, 1], [], []>} : vector<320x16xbf16>, vector<16x16xbf16>, vector<320x16xf32> -> vector<320x16xf32>
    %325 = arith.truncf %324 : vector<320x16xf32> to vector<320x16xbf16>
    %c3_180 = arith.constant 3 : index
    %c0_181 = arith.constant 0 : index
    %c0_182 = arith.constant 0 : index
    %326 = vector.load %arg3[%c3_180, %c0_181, %c0_182] : memref<5x16x16xbf16, #tpu.memory_space<vmem>>, vector<1x16x16xbf16>
    %327 = vector.shape_cast %326 : vector<1x16x16xbf16> to vector<16x16xbf16>
    %328 = vector.extract_strided_slice %325 {offsets = [0, 0], sizes = [16, 16], strides = [1, 1]} : vector<320x16xbf16> to vector<16x16xbf16>
    %cst_183 = arith.constant dense<0.000000e+00> : vector<16x16xf32>
    %329 = tpu.matmul %327, %328, %cst_183 {dimension_numbers = #tpu.dot_dimension_numbers<[1], [0], [0], [1], [0, 0, 1, 1], [], []>} : vector<16x16xbf16>, vector<16x16xbf16>, vector<16x16xf32> -> vector<16x16xf32>
    %330 = vector.extract_strided_slice %325 {offsets = [16, 0], sizes = [16, 16], strides = [1, 1]} : vector<320x16xbf16> to vector<16x16xbf16>
    %cst_184 = arith.constant dense<0.000000e+00> : vector<16x16xf32>
    %331 = tpu.matmul %327, %330, %cst_184 {dimension_numbers = #tpu.dot_dimension_numbers<[1], [0], [0], [1], [0, 0, 1, 1], [], []>} : vector<16x16xbf16>, vector<16x16xbf16>, vector<16x16xf32> -> vector<16x16xf32>
    %332 = vector.extract_strided_slice %325 {offsets = [32, 0], sizes = [16, 16], strides = [1, 1]} : vector<320x16xbf16> to vector<16x16xbf16>
    %cst_185 = arith.constant dense<0.000000e+00> : vector<16x16xf32>
    %333 = tpu.matmul %327, %332, %cst_185 {dimension_numbers = #tpu.dot_dimension_numbers<[1], [0], [0], [1], [0, 0, 1, 1], [], []>} : vector<16x16xbf16>, vector<16x16xbf16>, vector<16x16xf32> -> vector<16x16xf32>
    %334 = vector.extract_strided_slice %325 {offsets = [48, 0], sizes = [16, 16], strides = [1, 1]} : vector<320x16xbf16> to vector<16x16xbf16>
    %cst_186 = arith.constant dense<0.000000e+00> : vector<16x16xf32>
    %335 = tpu.matmul %327, %334, %cst_186 {dimension_numbers = #tpu.dot_dimension_numbers<[1], [0], [0], [1], [0, 0, 1, 1], [], []>} : vector<16x16xbf16>, vector<16x16xbf16>, vector<16x16xf32> -> vector<16x16xf32>
    %336 = vector.extract_strided_slice %325 {offsets = [64, 0], sizes = [16, 16], strides = [1, 1]} : vector<320x16xbf16> to vector<16x16xbf16>
    %cst_187 = arith.constant dense<0.000000e+00> : vector<16x16xf32>
    %337 = tpu.matmul %327, %336, %cst_187 {dimension_numbers = #tpu.dot_dimension_numbers<[1], [0], [0], [1], [0, 0, 1, 1], [], []>} : vector<16x16xbf16>, vector<16x16xbf16>, vector<16x16xf32> -> vector<16x16xf32>
    %338 = arith.mulf %329, %329 : vector<16x16xf32>
    %339 = arith.mulf %331, %331 : vector<16x16xf32>
    %340 = arith.mulf %329, %331 : vector<16x16xf32>
    %341 = arith.subf %337, %340 : vector<16x16xf32>
    %cst_188 = arith.constant 2.000000e+00 : f32
    %342 = vector.broadcast %cst_188 : f32 to vector<16x16xf32>
    %343 = arith.mulf %342, %341 : vector<16x16xf32>
    %cst_189 = arith.constant 8.99999984E-4 : f32
    %344 = vector.broadcast %cst_189 : f32 to vector<16x16xf32>
    %345 = arith.addf %343, %344 : vector<16x16xf32>
    %346 = arith.subf %333, %338 : vector<16x16xf32>
    %347 = arith.addf %346, %335 : vector<16x16xf32>
    %348 = arith.subf %347, %339 : vector<16x16xf32>
    %cst_190 = arith.constant 8.99999984E-4 : f32
    %349 = vector.broadcast %cst_190 : f32 to vector<16x16xf32>
    %350 = arith.addf %348, %349 : vector<16x16xf32>
    %351 = arith.divf %345, %350 : vector<16x16xf32>
    %352 = arith.mulf %262, %351 : vector<16x16xf32>
    %353 = vector.extract_strided_slice %325 {offsets = [80, 0], sizes = [16, 16], strides = [1, 1]} : vector<320x16xbf16> to vector<16x16xbf16>
    %cst_191 = arith.constant dense<0.000000e+00> : vector<16x16xf32>
    %354 = tpu.matmul %327, %353, %cst_191 {dimension_numbers = #tpu.dot_dimension_numbers<[1], [0], [0], [1], [0, 0, 1, 1], [], []>} : vector<16x16xbf16>, vector<16x16xbf16>, vector<16x16xf32> -> vector<16x16xf32>
    %355 = vector.extract_strided_slice %325 {offsets = [96, 0], sizes = [16, 16], strides = [1, 1]} : vector<320x16xbf16> to vector<16x16xbf16>
    %cst_192 = arith.constant dense<0.000000e+00> : vector<16x16xf32>
    %356 = tpu.matmul %327, %355, %cst_192 {dimension_numbers = #tpu.dot_dimension_numbers<[1], [0], [0], [1], [0, 0, 1, 1], [], []>} : vector<16x16xbf16>, vector<16x16xbf16>, vector<16x16xf32> -> vector<16x16xf32>
    %357 = vector.extract_strided_slice %325 {offsets = [112, 0], sizes = [16, 16], strides = [1, 1]} : vector<320x16xbf16> to vector<16x16xbf16>
    %cst_193 = arith.constant dense<0.000000e+00> : vector<16x16xf32>
    %358 = tpu.matmul %327, %357, %cst_193 {dimension_numbers = #tpu.dot_dimension_numbers<[1], [0], [0], [1], [0, 0, 1, 1], [], []>} : vector<16x16xbf16>, vector<16x16xbf16>, vector<16x16xf32> -> vector<16x16xf32>
    %359 = vector.extract_strided_slice %325 {offsets = [128, 0], sizes = [16, 16], strides = [1, 1]} : vector<320x16xbf16> to vector<16x16xbf16>
    %cst_194 = arith.constant dense<0.000000e+00> : vector<16x16xf32>
    %360 = tpu.matmul %327, %359, %cst_194 {dimension_numbers = #tpu.dot_dimension_numbers<[1], [0], [0], [1], [0, 0, 1, 1], [], []>} : vector<16x16xbf16>, vector<16x16xbf16>, vector<16x16xf32> -> vector<16x16xf32>
    %361 = vector.extract_strided_slice %325 {offsets = [144, 0], sizes = [16, 16], strides = [1, 1]} : vector<320x16xbf16> to vector<16x16xbf16>
    %cst_195 = arith.constant dense<0.000000e+00> : vector<16x16xf32>
    %362 = tpu.matmul %327, %361, %cst_195 {dimension_numbers = #tpu.dot_dimension_numbers<[1], [0], [0], [1], [0, 0, 1, 1], [], []>} : vector<16x16xbf16>, vector<16x16xbf16>, vector<16x16xf32> -> vector<16x16xf32>
    %363 = arith.mulf %354, %354 : vector<16x16xf32>
    %364 = arith.mulf %356, %356 : vector<16x16xf32>
    %365 = arith.mulf %354, %356 : vector<16x16xf32>
    %366 = arith.subf %362, %365 : vector<16x16xf32>
    %cst_196 = arith.constant 2.000000e+00 : f32
    %367 = vector.broadcast %cst_196 : f32 to vector<16x16xf32>
    %368 = arith.mulf %367, %366 : vector<16x16xf32>
    %cst_197 = arith.constant 8.99999984E-4 : f32
    %369 = vector.broadcast %cst_197 : f32 to vector<16x16xf32>
    %370 = arith.addf %368, %369 : vector<16x16xf32>
    %371 = arith.subf %358, %363 : vector<16x16xf32>
    %372 = arith.addf %371, %360 : vector<16x16xf32>
    %373 = arith.subf %372, %364 : vector<16x16xf32>
    %cst_198 = arith.constant 8.99999984E-4 : f32
    %374 = vector.broadcast %cst_198 : f32 to vector<16x16xf32>
    %375 = arith.addf %373, %374 : vector<16x16xf32>
    %376 = arith.divf %370, %375 : vector<16x16xf32>
    %377 = arith.mulf %376, %376 : vector<16x16xf32>
    %378 = arith.mulf %352, %377 : vector<16x16xf32>
    %379 = vector.extract_strided_slice %325 {offsets = [160, 0], sizes = [16, 16], strides = [1, 1]} : vector<320x16xbf16> to vector<16x16xbf16>
    %cst_199 = arith.constant dense<0.000000e+00> : vector<16x16xf32>
    %380 = tpu.matmul %327, %379, %cst_199 {dimension_numbers = #tpu.dot_dimension_numbers<[1], [0], [0], [1], [0, 0, 1, 1], [], []>} : vector<16x16xbf16>, vector<16x16xbf16>, vector<16x16xf32> -> vector<16x16xf32>
    %381 = vector.extract_strided_slice %325 {offsets = [176, 0], sizes = [16, 16], strides = [1, 1]} : vector<320x16xbf16> to vector<16x16xbf16>
    %cst_200 = arith.constant dense<0.000000e+00> : vector<16x16xf32>
    %382 = tpu.matmul %327, %381, %cst_200 {dimension_numbers = #tpu.dot_dimension_numbers<[1], [0], [0], [1], [0, 0, 1, 1], [], []>} : vector<16x16xbf16>, vector<16x16xbf16>, vector<16x16xf32> -> vector<16x16xf32>
    %383 = vector.extract_strided_slice %325 {offsets = [192, 0], sizes = [16, 16], strides = [1, 1]} : vector<320x16xbf16> to vector<16x16xbf16>
    %cst_201 = arith.constant dense<0.000000e+00> : vector<16x16xf32>
    %384 = tpu.matmul %327, %383, %cst_201 {dimension_numbers = #tpu.dot_dimension_numbers<[1], [0], [0], [1], [0, 0, 1, 1], [], []>} : vector<16x16xbf16>, vector<16x16xbf16>, vector<16x16xf32> -> vector<16x16xf32>
    %385 = vector.extract_strided_slice %325 {offsets = [208, 0], sizes = [16, 16], strides = [1, 1]} : vector<320x16xbf16> to vector<16x16xbf16>
    %cst_202 = arith.constant dense<0.000000e+00> : vector<16x16xf32>
    %386 = tpu.matmul %327, %385, %cst_202 {dimension_numbers = #tpu.dot_dimension_numbers<[1], [0], [0], [1], [0, 0, 1, 1], [], []>} : vector<16x16xbf16>, vector<16x16xbf16>, vector<16x16xf32> -> vector<16x16xf32>
    %387 = vector.extract_strided_slice %325 {offsets = [224, 0], sizes = [16, 16], strides = [1, 1]} : vector<320x16xbf16> to vector<16x16xbf16>
    %cst_203 = arith.constant dense<0.000000e+00> : vector<16x16xf32>
    %388 = tpu.matmul %327, %387, %cst_203 {dimension_numbers = #tpu.dot_dimension_numbers<[1], [0], [0], [1], [0, 0, 1, 1], [], []>} : vector<16x16xbf16>, vector<16x16xbf16>, vector<16x16xf32> -> vector<16x16xf32>
    %389 = arith.mulf %380, %380 : vector<16x16xf32>
    %390 = arith.mulf %382, %382 : vector<16x16xf32>
    %391 = arith.mulf %380, %382 : vector<16x16xf32>
    %392 = arith.subf %388, %391 : vector<16x16xf32>
    %cst_204 = arith.constant 2.000000e+00 : f32
    %393 = vector.broadcast %cst_204 : f32 to vector<16x16xf32>
    %394 = arith.mulf %393, %392 : vector<16x16xf32>
    %cst_205 = arith.constant 8.99999984E-4 : f32
    %395 = vector.broadcast %cst_205 : f32 to vector<16x16xf32>
    %396 = arith.addf %394, %395 : vector<16x16xf32>
    %397 = arith.subf %384, %389 : vector<16x16xf32>
    %398 = arith.addf %397, %386 : vector<16x16xf32>
    %399 = arith.subf %398, %390 : vector<16x16xf32>
    %cst_206 = arith.constant 8.99999984E-4 : f32
    %400 = vector.broadcast %cst_206 : f32 to vector<16x16xf32>
    %401 = arith.addf %399, %400 : vector<16x16xf32>
    %402 = arith.divf %396, %401 : vector<16x16xf32>
    %403 = arith.mulf %289, %402 : vector<16x16xf32>
    %404 = vector.extract_strided_slice %325 {offsets = [240, 0], sizes = [16, 16], strides = [1, 1]} : vector<320x16xbf16> to vector<16x16xbf16>
    %cst_207 = arith.constant dense<0.000000e+00> : vector<16x16xf32>
    %405 = tpu.matmul %327, %404, %cst_207 {dimension_numbers = #tpu.dot_dimension_numbers<[1], [0], [0], [1], [0, 0, 1, 1], [], []>} : vector<16x16xbf16>, vector<16x16xbf16>, vector<16x16xf32> -> vector<16x16xf32>
    %406 = vector.extract_strided_slice %325 {offsets = [256, 0], sizes = [16, 16], strides = [1, 1]} : vector<320x16xbf16> to vector<16x16xbf16>
    %cst_208 = arith.constant dense<0.000000e+00> : vector<16x16xf32>
    %407 = tpu.matmul %327, %406, %cst_208 {dimension_numbers = #tpu.dot_dimension_numbers<[1], [0], [0], [1], [0, 0, 1, 1], [], []>} : vector<16x16xbf16>, vector<16x16xbf16>, vector<16x16xf32> -> vector<16x16xf32>
    %408 = vector.extract_strided_slice %325 {offsets = [272, 0], sizes = [16, 16], strides = [1, 1]} : vector<320x16xbf16> to vector<16x16xbf16>
    %cst_209 = arith.constant dense<0.000000e+00> : vector<16x16xf32>
    %409 = tpu.matmul %327, %408, %cst_209 {dimension_numbers = #tpu.dot_dimension_numbers<[1], [0], [0], [1], [0, 0, 1, 1], [], []>} : vector<16x16xbf16>, vector<16x16xbf16>, vector<16x16xf32> -> vector<16x16xf32>
    %410 = vector.extract_strided_slice %325 {offsets = [288, 0], sizes = [16, 16], strides = [1, 1]} : vector<320x16xbf16> to vector<16x16xbf16>
    %cst_210 = arith.constant dense<0.000000e+00> : vector<16x16xf32>
    %411 = tpu.matmul %327, %410, %cst_210 {dimension_numbers = #tpu.dot_dimension_numbers<[1], [0], [0], [1], [0, 0, 1, 1], [], []>} : vector<16x16xbf16>, vector<16x16xbf16>, vector<16x16xf32> -> vector<16x16xf32>
    %412 = vector.extract_strided_slice %325 {offsets = [304, 0], sizes = [16, 16], strides = [1, 1]} : vector<320x16xbf16> to vector<16x16xbf16>
    %cst_211 = arith.constant dense<0.000000e+00> : vector<16x16xf32>
    %413 = tpu.matmul %327, %412, %cst_211 {dimension_numbers = #tpu.dot_dimension_numbers<[1], [0], [0], [1], [0, 0, 1, 1], [], []>} : vector<16x16xbf16>, vector<16x16xbf16>, vector<16x16xf32> -> vector<16x16xf32>
    %414 = arith.mulf %405, %405 : vector<16x16xf32>
    %415 = arith.mulf %407, %407 : vector<16x16xf32>
    %416 = arith.mulf %405, %407 : vector<16x16xf32>
    %417 = arith.subf %413, %416 : vector<16x16xf32>
    %cst_212 = arith.constant 2.000000e+00 : f32
    %418 = vector.broadcast %cst_212 : f32 to vector<16x16xf32>
    %419 = arith.mulf %418, %417 : vector<16x16xf32>
    %cst_213 = arith.constant 8.99999984E-4 : f32
    %420 = vector.broadcast %cst_213 : f32 to vector<16x16xf32>
    %421 = arith.addf %419, %420 : vector<16x16xf32>
    %422 = arith.subf %409, %414 : vector<16x16xf32>
    %423 = arith.addf %422, %411 : vector<16x16xf32>
    %424 = arith.subf %423, %415 : vector<16x16xf32>
    %cst_214 = arith.constant 8.99999984E-4 : f32
    %425 = vector.broadcast %cst_214 : f32 to vector<16x16xf32>
    %426 = arith.addf %424, %425 : vector<16x16xf32>
    %427 = arith.divf %421, %426 : vector<16x16xf32>
    %428 = arith.mulf %427, %427 : vector<16x16xf32>
    %429 = arith.mulf %403, %428 : vector<16x16xf32>
    %c0_215 = arith.constant 0 : index
    %c2_216 = arith.constant 2 : index
    %c0_217 = arith.constant 0 : index
    %c0_218 = arith.constant 0 : index
    %430 = vector.load %arg1[%c0_215, %c2_216, %c0_217, %c0_218] : memref<2x3x16x16xf32, #tpu.memory_space<vmem>>, vector<1x1x16x16xf32>
    %431 = vector.shape_cast %430 : vector<1x1x16x16xf32> to vector<16x16xf32>
    %c0_219 = arith.constant 0 : index
    %c2_220 = arith.constant 2 : index
    %c0_221 = arith.constant 0 : index
    %c0_222 = arith.constant 0 : index
    %432 = vector.load %arg2[%c0_219, %c2_220, %c0_221, %c0_222] : memref<2x3x16x16xf32, #tpu.memory_space<vmem>>, vector<1x1x16x16xf32>
    %433 = vector.shape_cast %432 : vector<1x1x16x16xf32> to vector<16x16xf32>
    %434 = arith.mulf %431, %431 : vector<16x16xf32>
    %435 = arith.mulf %433, %433 : vector<16x16xf32>
    %436 = arith.mulf %431, %433 : vector<16x16xf32>
    %c1_223 = arith.constant 1 : index
    %c2_224 = arith.constant 2 : index
    %c0_225 = arith.constant 0 : index
    %c0_226 = arith.constant 0 : index
    %437 = vector.load %arg1[%c1_223, %c2_224, %c0_225, %c0_226] : memref<2x3x16x16xf32, #tpu.memory_space<vmem>>, vector<1x1x16x16xf32>
    %438 = vector.shape_cast %437 : vector<1x1x16x16xf32> to vector<16x16xf32>
    %c1_227 = arith.constant 1 : index
    %c2_228 = arith.constant 2 : index
    %c0_229 = arith.constant 0 : index
    %c0_230 = arith.constant 0 : index
    %439 = vector.load %arg2[%c1_227, %c2_228, %c0_229, %c0_230] : memref<2x3x16x16xf32, #tpu.memory_space<vmem>>, vector<1x1x16x16xf32>
    %440 = vector.shape_cast %439 : vector<1x1x16x16xf32> to vector<16x16xf32>
    %441 = arith.mulf %438, %438 : vector<16x16xf32>
    %442 = arith.mulf %440, %440 : vector<16x16xf32>
    %443 = arith.mulf %438, %440 : vector<16x16xf32>
    %c0_231 = arith.constant 0 : index
    %c0_232 = arith.constant 0 : index
    %c0_233 = arith.constant 0 : index
    %c0_234 = arith.constant 0 : index
    %444 = vector.load %arg1[%c0_231, %c0_232, %c0_233, %c0_234] : memref<2x3x16x16xf32, #tpu.memory_space<vmem>>, vector<1x1x16x16xf32>
    %445 = vector.shape_cast %444 : vector<1x1x16x16xf32> to vector<16x16xf32>
    %c0_235 = arith.constant 0 : index
    %c0_236 = arith.constant 0 : index
    %c0_237 = arith.constant 0 : index
    %c0_238 = arith.constant 0 : index
    %446 = vector.load %arg2[%c0_235, %c0_236, %c0_237, %c0_238] : memref<2x3x16x16xf32, #tpu.memory_space<vmem>>, vector<1x1x16x16xf32>
    %447 = vector.shape_cast %446 : vector<1x1x16x16xf32> to vector<16x16xf32>
    %448 = arith.subf %445, %447 : vector<16x16xf32>
    %449 = math.absf %448 : vector<16x16xf32>
    %c0_239 = arith.constant 0 : index
    %c1_240 = arith.constant 1 : index
    %c0_241 = arith.constant 0 : index
    %c0_242 = arith.constant 0 : index
    %450 = vector.load %arg1[%c0_239, %c1_240, %c0_241, %c0_242] : memref<2x3x16x16xf32, #tpu.memory_space<vmem>>, vector<1x1x16x16xf32>
    %451 = vector.shape_cast %450 : vector<1x1x16x16xf32> to vector<16x16xf32>
    %c0_243 = arith.constant 0 : index
    %c1_244 = arith.constant 1 : index
    %c0_245 = arith.constant 0 : index
    %c0_246 = arith.constant 0 : index
    %452 = vector.load %arg2[%c0_243, %c1_244, %c0_245, %c0_246] : memref<2x3x16x16xf32, #tpu.memory_space<vmem>>, vector<1x1x16x16xf32>
    %453 = vector.shape_cast %452 : vector<1x1x16x16xf32> to vector<16x16xf32>
    %454 = arith.subf %451, %453 : vector<16x16xf32>
    %455 = math.absf %454 : vector<16x16xf32>
    %c0_247 = arith.constant 0 : index
    %c2_248 = arith.constant 2 : index
    %c0_249 = arith.constant 0 : index
    %c0_250 = arith.constant 0 : index
    %456 = vector.load %arg1[%c0_247, %c2_248, %c0_249, %c0_250] : memref<2x3x16x16xf32, #tpu.memory_space<vmem>>, vector<1x1x16x16xf32>
    %457 = vector.shape_cast %456 : vector<1x1x16x16xf32> to vector<16x16xf32>
    %c0_251 = arith.constant 0 : index
    %c2_252 = arith.constant 2 : index
    %c0_253 = arith.constant 0 : index
    %c0_254 = arith.constant 0 : index
    %458 = vector.load %arg2[%c0_251, %c2_252, %c0_253, %c0_254] : memref<2x3x16x16xf32, #tpu.memory_space<vmem>>, vector<1x1x16x16xf32>
    %459 = vector.shape_cast %458 : vector<1x1x16x16xf32> to vector<16x16xf32>
    %460 = arith.subf %457, %459 : vector<16x16xf32>
    %461 = math.absf %460 : vector<16x16xf32>
    %c1_255 = arith.constant 1 : index
    %c0_256 = arith.constant 0 : index
    %c0_257 = arith.constant 0 : index
    %c0_258 = arith.constant 0 : index
    %462 = vector.load %arg1[%c1_255, %c0_256, %c0_257, %c0_258] : memref<2x3x16x16xf32, #tpu.memory_space<vmem>>, vector<1x1x16x16xf32>
    %463 = vector.shape_cast %462 : vector<1x1x16x16xf32> to vector<16x16xf32>
    %c1_259 = arith.constant 1 : index
    %c0_260 = arith.constant 0 : index
    %c0_261 = arith.constant 0 : index
    %c0_262 = arith.constant 0 : index
    %464 = vector.load %arg2[%c1_259, %c0_260, %c0_261, %c0_262] : memref<2x3x16x16xf32, #tpu.memory_space<vmem>>, vector<1x1x16x16xf32>
    %465 = vector.shape_cast %464 : vector<1x1x16x16xf32> to vector<16x16xf32>
    %466 = arith.subf %463, %465 : vector<16x16xf32>
    %467 = math.absf %466 : vector<16x16xf32>
    %c1_263 = arith.constant 1 : index
    %c1_264 = arith.constant 1 : index
    %c0_265 = arith.constant 0 : index
    %c0_266 = arith.constant 0 : index
    %468 = vector.load %arg1[%c1_263, %c1_264, %c0_265, %c0_266] : memref<2x3x16x16xf32, #tpu.memory_space<vmem>>, vector<1x1x16x16xf32>
    %469 = vector.shape_cast %468 : vector<1x1x16x16xf32> to vector<16x16xf32>
    %c1_267 = arith.constant 1 : index
    %c1_268 = arith.constant 1 : index
    %c0_269 = arith.constant 0 : index
    %c0_270 = arith.constant 0 : index
    %470 = vector.load %arg2[%c1_267, %c1_268, %c0_269, %c0_270] : memref<2x3x16x16xf32, #tpu.memory_space<vmem>>, vector<1x1x16x16xf32>
    %471 = vector.shape_cast %470 : vector<1x1x16x16xf32> to vector<16x16xf32>
    %472 = arith.subf %469, %471 : vector<16x16xf32>
    %473 = math.absf %472 : vector<16x16xf32>
    %c1_271 = arith.constant 1 : index
    %c2_272 = arith.constant 2 : index
    %c0_273 = arith.constant 0 : index
    %c0_274 = arith.constant 0 : index
    %474 = vector.load %arg1[%c1_271, %c2_272, %c0_273, %c0_274] : memref<2x3x16x16xf32, #tpu.memory_space<vmem>>, vector<1x1x16x16xf32>
    %475 = vector.shape_cast %474 : vector<1x1x16x16xf32> to vector<16x16xf32>
    %c1_275 = arith.constant 1 : index
    %c2_276 = arith.constant 2 : index
    %c0_277 = arith.constant 0 : index
    %c0_278 = arith.constant 0 : index
    %476 = vector.load %arg2[%c1_275, %c2_276, %c0_277, %c0_278] : memref<2x3x16x16xf32, #tpu.memory_space<vmem>>, vector<1x1x16x16xf32>
    %477 = vector.shape_cast %476 : vector<1x1x16x16xf32> to vector<16x16xf32>
    %478 = arith.subf %475, %477 : vector<16x16xf32>
    %479 = math.absf %478 : vector<16x16xf32>
    %480 = tpu.concatenate %431, %433, %434, %435, %436, %438, %440, %441, %442, %443, %449, %455, %461, %467, %473, %479 in 0 : vector<16x16xf32>, vector<16x16xf32>, vector<16x16xf32>, vector<16x16xf32>, vector<16x16xf32>, vector<16x16xf32>, vector<16x16xf32>, vector<16x16xf32>, vector<16x16xf32>, vector<16x16xf32>, vector<16x16xf32>, vector<16x16xf32>, vector<16x16xf32>, vector<16x16xf32>, vector<16x16xf32>, vector<16x16xf32> -> vector<256x16xf32>
    %481 = arith.truncf %480 : vector<256x16xf32> to vector<256x16xbf16>
    %c4 = arith.constant 4 : index
    %c0_279 = arith.constant 0 : index
    %c0_280 = arith.constant 0 : index
    %482 = vector.load %arg4[%c4, %c0_279, %c0_280] : memref<5x16x16xbf16, #tpu.memory_space<vmem>>, vector<1x16x16xbf16>
    %483 = vector.shape_cast %482 : vector<1x16x16xbf16> to vector<16x16xbf16>
    %cst_281 = arith.constant dense<0.000000e+00> : vector<256x16xf32>
    %484 = tpu.matmul %481, %483, %cst_281 {dimension_numbers = #tpu.dot_dimension_numbers<[1], [0], [0], [1], [0, 0, 1, 1], [], []>} : vector<256x16xbf16>, vector<16x16xbf16>, vector<256x16xf32> -> vector<256x16xf32>
    %485 = arith.truncf %484 : vector<256x16xf32> to vector<256x16xbf16>
    %c4_282 = arith.constant 4 : index
    %c0_283 = arith.constant 0 : index
    %c0_284 = arith.constant 0 : index
    %486 = vector.load %arg3[%c4_282, %c0_283, %c0_284] : memref<5x16x16xbf16, #tpu.memory_space<vmem>>, vector<1x16x16xbf16>
    %487 = vector.shape_cast %486 : vector<1x16x16xbf16> to vector<16x16xbf16>
    %488 = vector.extract_strided_slice %485 {offsets = [0, 0], sizes = [16, 16], strides = [1, 1]} : vector<256x16xbf16> to vector<16x16xbf16>
    %cst_285 = arith.constant dense<0.000000e+00> : vector<16x16xf32>
    %489 = tpu.matmul %487, %488, %cst_285 {dimension_numbers = #tpu.dot_dimension_numbers<[1], [0], [0], [1], [0, 0, 1, 1], [], []>} : vector<16x16xbf16>, vector<16x16xbf16>, vector<16x16xf32> -> vector<16x16xf32>
    %490 = vector.extract_strided_slice %485 {offsets = [16, 0], sizes = [16, 16], strides = [1, 1]} : vector<256x16xbf16> to vector<16x16xbf16>
    %cst_286 = arith.constant dense<0.000000e+00> : vector<16x16xf32>
    %491 = tpu.matmul %487, %490, %cst_286 {dimension_numbers = #tpu.dot_dimension_numbers<[1], [0], [0], [1], [0, 0, 1, 1], [], []>} : vector<16x16xbf16>, vector<16x16xbf16>, vector<16x16xf32> -> vector<16x16xf32>
    %492 = vector.extract_strided_slice %485 {offsets = [32, 0], sizes = [16, 16], strides = [1, 1]} : vector<256x16xbf16> to vector<16x16xbf16>
    %cst_287 = arith.constant dense<0.000000e+00> : vector<16x16xf32>
    %493 = tpu.matmul %487, %492, %cst_287 {dimension_numbers = #tpu.dot_dimension_numbers<[1], [0], [0], [1], [0, 0, 1, 1], [], []>} : vector<16x16xbf16>, vector<16x16xbf16>, vector<16x16xf32> -> vector<16x16xf32>
    %494 = vector.extract_strided_slice %485 {offsets = [48, 0], sizes = [16, 16], strides = [1, 1]} : vector<256x16xbf16> to vector<16x16xbf16>
    %cst_288 = arith.constant dense<0.000000e+00> : vector<16x16xf32>
    %495 = tpu.matmul %487, %494, %cst_288 {dimension_numbers = #tpu.dot_dimension_numbers<[1], [0], [0], [1], [0, 0, 1, 1], [], []>} : vector<16x16xbf16>, vector<16x16xbf16>, vector<16x16xf32> -> vector<16x16xf32>
    %496 = vector.extract_strided_slice %485 {offsets = [64, 0], sizes = [16, 16], strides = [1, 1]} : vector<256x16xbf16> to vector<16x16xbf16>
    %cst_289 = arith.constant dense<0.000000e+00> : vector<16x16xf32>
    %497 = tpu.matmul %487, %496, %cst_289 {dimension_numbers = #tpu.dot_dimension_numbers<[1], [0], [0], [1], [0, 0, 1, 1], [], []>} : vector<16x16xbf16>, vector<16x16xbf16>, vector<16x16xf32> -> vector<16x16xf32>
    %498 = arith.mulf %489, %489 : vector<16x16xf32>
    %499 = arith.mulf %491, %491 : vector<16x16xf32>
    %500 = arith.mulf %489, %491 : vector<16x16xf32>
    %501 = arith.subf %497, %500 : vector<16x16xf32>
    %cst_290 = arith.constant 2.000000e+00 : f32
    %502 = vector.broadcast %cst_290 : f32 to vector<16x16xf32>
    %503 = arith.mulf %502, %501 : vector<16x16xf32>
    %cst_291 = arith.constant 8.99999984E-4 : f32
    %504 = vector.broadcast %cst_291 : f32 to vector<16x16xf32>
    %505 = arith.addf %503, %504 : vector<16x16xf32>
    %506 = arith.subf %493, %498 : vector<16x16xf32>
    %507 = arith.addf %506, %495 : vector<16x16xf32>
    %508 = arith.subf %507, %499 : vector<16x16xf32>
    %cst_292 = arith.constant 8.99999984E-4 : f32
    %509 = vector.broadcast %cst_292 : f32 to vector<16x16xf32>
    %510 = arith.addf %508, %509 : vector<16x16xf32>
    %511 = arith.divf %505, %510 : vector<16x16xf32>
    %512 = arith.mulf %511, %511 : vector<16x16xf32>
    %513 = arith.mulf %512, %511 : vector<16x16xf32>
    %514 = arith.mulf %378, %513 : vector<16x16xf32>
    %cst_293 = arith.constant 2.000000e+00 : f32
    %515 = vector.broadcast %cst_293 : f32 to vector<16x16xf32>
    %516 = arith.mulf %515, %500 : vector<16x16xf32>
    %cst_294 = arith.constant 9.99999974E-5 : f32
    %517 = vector.broadcast %cst_294 : f32 to vector<16x16xf32>
    %518 = arith.addf %516, %517 : vector<16x16xf32>
    %519 = arith.addf %498, %499 : vector<16x16xf32>
    %cst_295 = arith.constant 9.99999974E-5 : f32
    %520 = vector.broadcast %cst_295 : f32 to vector<16x16xf32>
    %521 = arith.addf %519, %520 : vector<16x16xf32>
    %522 = arith.divf %518, %521 : vector<16x16xf32>
    %523 = arith.mulf %522, %522 : vector<16x16xf32>
    %524 = arith.mulf %523, %522 : vector<16x16xf32>
    %525 = vector.extract_strided_slice %485 {offsets = [80, 0], sizes = [16, 16], strides = [1, 1]} : vector<256x16xbf16> to vector<16x16xbf16>
    %cst_296 = arith.constant dense<0.000000e+00> : vector<16x16xf32>
    %526 = tpu.matmul %487, %525, %cst_296 {dimension_numbers = #tpu.dot_dimension_numbers<[1], [0], [0], [1], [0, 0, 1, 1], [], []>} : vector<16x16xbf16>, vector<16x16xbf16>, vector<16x16xf32> -> vector<16x16xf32>
    %527 = vector.extract_strided_slice %485 {offsets = [96, 0], sizes = [16, 16], strides = [1, 1]} : vector<256x16xbf16> to vector<16x16xbf16>
    %cst_297 = arith.constant dense<0.000000e+00> : vector<16x16xf32>
    %528 = tpu.matmul %487, %527, %cst_297 {dimension_numbers = #tpu.dot_dimension_numbers<[1], [0], [0], [1], [0, 0, 1, 1], [], []>} : vector<16x16xbf16>, vector<16x16xbf16>, vector<16x16xf32> -> vector<16x16xf32>
    %529 = vector.extract_strided_slice %485 {offsets = [112, 0], sizes = [16, 16], strides = [1, 1]} : vector<256x16xbf16> to vector<16x16xbf16>
    %cst_298 = arith.constant dense<0.000000e+00> : vector<16x16xf32>
    %530 = tpu.matmul %487, %529, %cst_298 {dimension_numbers = #tpu.dot_dimension_numbers<[1], [0], [0], [1], [0, 0, 1, 1], [], []>} : vector<16x16xbf16>, vector<16x16xbf16>, vector<16x16xf32> -> vector<16x16xf32>
    %531 = vector.extract_strided_slice %485 {offsets = [128, 0], sizes = [16, 16], strides = [1, 1]} : vector<256x16xbf16> to vector<16x16xbf16>
    %cst_299 = arith.constant dense<0.000000e+00> : vector<16x16xf32>
    %532 = tpu.matmul %487, %531, %cst_299 {dimension_numbers = #tpu.dot_dimension_numbers<[1], [0], [0], [1], [0, 0, 1, 1], [], []>} : vector<16x16xbf16>, vector<16x16xbf16>, vector<16x16xf32> -> vector<16x16xf32>
    %533 = vector.extract_strided_slice %485 {offsets = [144, 0], sizes = [16, 16], strides = [1, 1]} : vector<256x16xbf16> to vector<16x16xbf16>
    %cst_300 = arith.constant dense<0.000000e+00> : vector<16x16xf32>
    %534 = tpu.matmul %487, %533, %cst_300 {dimension_numbers = #tpu.dot_dimension_numbers<[1], [0], [0], [1], [0, 0, 1, 1], [], []>} : vector<16x16xbf16>, vector<16x16xbf16>, vector<16x16xf32> -> vector<16x16xf32>
    %535 = arith.mulf %526, %526 : vector<16x16xf32>
    %536 = arith.mulf %528, %528 : vector<16x16xf32>
    %537 = arith.mulf %526, %528 : vector<16x16xf32>
    %538 = arith.subf %534, %537 : vector<16x16xf32>
    %cst_301 = arith.constant 2.000000e+00 : f32
    %539 = vector.broadcast %cst_301 : f32 to vector<16x16xf32>
    %540 = arith.mulf %539, %538 : vector<16x16xf32>
    %cst_302 = arith.constant 8.99999984E-4 : f32
    %541 = vector.broadcast %cst_302 : f32 to vector<16x16xf32>
    %542 = arith.addf %540, %541 : vector<16x16xf32>
    %543 = arith.subf %530, %535 : vector<16x16xf32>
    %544 = arith.addf %543, %532 : vector<16x16xf32>
    %545 = arith.subf %544, %536 : vector<16x16xf32>
    %cst_303 = arith.constant 8.99999984E-4 : f32
    %546 = vector.broadcast %cst_303 : f32 to vector<16x16xf32>
    %547 = arith.addf %545, %546 : vector<16x16xf32>
    %548 = arith.divf %542, %547 : vector<16x16xf32>
    %549 = arith.mulf %548, %548 : vector<16x16xf32>
    %550 = arith.mulf %549, %548 : vector<16x16xf32>
    %551 = arith.mulf %429, %550 : vector<16x16xf32>
    %cst_304 = arith.constant 2.000000e+00 : f32
    %552 = vector.broadcast %cst_304 : f32 to vector<16x16xf32>
    %553 = arith.mulf %552, %537 : vector<16x16xf32>
    %cst_305 = arith.constant 9.99999974E-5 : f32
    %554 = vector.broadcast %cst_305 : f32 to vector<16x16xf32>
    %555 = arith.addf %553, %554 : vector<16x16xf32>
    %556 = arith.addf %535, %536 : vector<16x16xf32>
    %cst_306 = arith.constant 9.99999974E-5 : f32
    %557 = vector.broadcast %cst_306 : f32 to vector<16x16xf32>
    %558 = arith.addf %556, %557 : vector<16x16xf32>
    %559 = arith.divf %555, %558 : vector<16x16xf32>
    %560 = arith.mulf %559, %559 : vector<16x16xf32>
    %561 = arith.mulf %560, %559 : vector<16x16xf32>
    %562 = vector.extract_strided_slice %485 {offsets = [160, 0], sizes = [16, 16], strides = [1, 1]} : vector<256x16xbf16> to vector<16x16xbf16>
    %cst_307 = arith.constant dense<0.000000e+00> : vector<16x16xf32>
    %563 = tpu.matmul %487, %562, %cst_307 {dimension_numbers = #tpu.dot_dimension_numbers<[1], [0], [0], [1], [0, 0, 1, 1], [], []>} : vector<16x16xbf16>, vector<16x16xbf16>, vector<16x16xf32> -> vector<16x16xf32>
    %564 = vector.extract_strided_slice %485 {offsets = [176, 0], sizes = [16, 16], strides = [1, 1]} : vector<256x16xbf16> to vector<16x16xbf16>
    %cst_308 = arith.constant dense<0.000000e+00> : vector<16x16xf32>
    %565 = tpu.matmul %487, %564, %cst_308 {dimension_numbers = #tpu.dot_dimension_numbers<[1], [0], [0], [1], [0, 0, 1, 1], [], []>} : vector<16x16xbf16>, vector<16x16xbf16>, vector<16x16xf32> -> vector<16x16xf32>
    %566 = arith.addf %563, %565 : vector<16x16xf32>
    %567 = vector.extract_strided_slice %485 {offsets = [192, 0], sizes = [16, 16], strides = [1, 1]} : vector<256x16xbf16> to vector<16x16xbf16>
    %cst_309 = arith.constant dense<0.000000e+00> : vector<16x16xf32>
    %568 = tpu.matmul %487, %567, %cst_309 {dimension_numbers = #tpu.dot_dimension_numbers<[1], [0], [0], [1], [0, 0, 1, 1], [], []>} : vector<16x16xbf16>, vector<16x16xbf16>, vector<16x16xf32> -> vector<16x16xf32>
    %569 = arith.addf %566, %568 : vector<16x16xf32>
    %cst_310 = arith.constant 0.333333343 : f32
    %570 = vector.broadcast %cst_310 : f32 to vector<16x16xf32>
    %571 = arith.mulf %569, %570 : vector<16x16xf32>
    %572 = vector.extract_strided_slice %485 {offsets = [208, 0], sizes = [16, 16], strides = [1, 1]} : vector<256x16xbf16> to vector<16x16xbf16>
    %cst_311 = arith.constant dense<0.000000e+00> : vector<16x16xf32>
    %573 = tpu.matmul %487, %572, %cst_311 {dimension_numbers = #tpu.dot_dimension_numbers<[1], [0], [0], [1], [0, 0, 1, 1], [], []>} : vector<16x16xbf16>, vector<16x16xbf16>, vector<16x16xf32> -> vector<16x16xf32>
    %574 = vector.extract_strided_slice %485 {offsets = [224, 0], sizes = [16, 16], strides = [1, 1]} : vector<256x16xbf16> to vector<16x16xbf16>
    %cst_312 = arith.constant dense<0.000000e+00> : vector<16x16xf32>
    %575 = tpu.matmul %487, %574, %cst_312 {dimension_numbers = #tpu.dot_dimension_numbers<[1], [0], [0], [1], [0, 0, 1, 1], [], []>} : vector<16x16xbf16>, vector<16x16xbf16>, vector<16x16xf32> -> vector<16x16xf32>
    %576 = arith.addf %573, %575 : vector<16x16xf32>
    %577 = vector.extract_strided_slice %485 {offsets = [240, 0], sizes = [16, 16], strides = [1, 1]} : vector<256x16xbf16> to vector<16x16xbf16>
    %cst_313 = arith.constant dense<0.000000e+00> : vector<16x16xf32>
    %578 = tpu.matmul %487, %577, %cst_313 {dimension_numbers = #tpu.dot_dimension_numbers<[1], [0], [0], [1], [0, 0, 1, 1], [], []>} : vector<16x16xbf16>, vector<16x16xbf16>, vector<16x16xf32> -> vector<16x16xf32>
    %579 = arith.addf %576, %578 : vector<16x16xf32>
    %cst_314 = arith.constant 0.333333343 : f32
    %580 = vector.broadcast %cst_314 : f32 to vector<16x16xf32>
    %581 = arith.mulf %579, %580 : vector<16x16xf32>
    %582 = arith.mulf %524, %514 : vector<16x16xf32>
    %cst_315 = arith.constant 1.000000e+00 : f32
    %583 = vector.broadcast %cst_315 : f32 to vector<16x16xf32>
    %584 = arith.subf %583, %582 : vector<16x16xf32>
    %cst_316 = arith.constant 2.500000e-02 : f32
    %585 = vector.broadcast %cst_316 : f32 to vector<16x16xf32>
    %586 = arith.mulf %585, %584 : vector<16x16xf32>
    %cst_317 = arith.constant 9.750000e-01 : f32
    %587 = vector.broadcast %cst_317 : f32 to vector<16x16xf32>
    %588 = arith.mulf %587, %571 : vector<16x16xf32>
    %589 = arith.addf %586, %588 : vector<16x16xf32>
    %590 = arith.mulf %561, %551 : vector<16x16xf32>
    %cst_318 = arith.constant 1.000000e+00 : f32
    %591 = vector.broadcast %cst_318 : f32 to vector<16x16xf32>
    %592 = arith.subf %591, %590 : vector<16x16xf32>
    %cst_319 = arith.constant 2.500000e-02 : f32
    %593 = vector.broadcast %cst_319 : f32 to vector<16x16xf32>
    %594 = arith.mulf %593, %592 : vector<16x16xf32>
    %cst_320 = arith.constant 9.750000e-01 : f32
    %595 = vector.broadcast %cst_320 : f32 to vector<16x16xf32>
    %596 = arith.mulf %595, %581 : vector<16x16xf32>
    %597 = arith.addf %594, %596 : vector<16x16xf32>
    %598 = arith.addf %589, %597 : vector<16x16xf32>
    %cst_321 = arith.constant dense<0.000000e+00> : vector<16xf32>
    %599 = vector.multi_reduction <add>, %598, %cst_321 [1] : vector<16x16xf32> to vector<16xf32>
    %600 = vector.shape_cast %599 : vector<16xf32> to vector<16x1xf32>
    %cst_322 = arith.constant dense<0.000000e+00> : vector<1xf32>
    %601 = vector.multi_reduction <add>, %600, %cst_322 [0] : vector<16x1xf32> to vector<1xf32>
    %602 = vector.shape_cast %601 : vector<1xf32> to vector<1x1xf32>
    %c0_323 = arith.constant 0 : index
    %c0_324 = arith.constant 0 : index
    %c0_325 = arith.constant 0 : index
    %603 = vector.load %arg5[%c0_323, %c0_324, %c0_325] : memref<1x1x1xf32, #tpu.memory_space<vmem>>, vector<1x1x1xf32>
    %604 = vector.shape_cast %603 : vector<1x1x1xf32> to vector<1x1xf32>
    %605 = vector.shape_cast %602 : vector<1x1xf32> to vector<1x1x1xf32>
    tpu.vector_store %arg5[%c0_323, %c0_324, %c0_325], %605 {strides = array<i32>} : memref<1x1x1xf32, #tpu.memory_space<vmem>>, vector<1x1x1xf32>,
    return
  }
  func.func @transform_0(%arg0: i32) -> (i32, i32, i32, i32) {
    %c0_i32 = arith.constant 0 : i32
    %c0_i32_0 = arith.constant 0 : i32
    %c0_i32_1 = arith.constant 0 : i32
    %c0_i32_2 = arith.constant 0 : i32
    return %arg0, %c0_i32, %c0_i32_0, %c0_i32_1 : i32, i32, i32, i32
  }
  func.func @transform_1(%arg0: i32) -> (i32, i32, i32, i32) {
    %c0_i32 = arith.constant 0 : i32
    %c0_i32_0 = arith.constant 0 : i32
    %c0_i32_1 = arith.constant 0 : i32
    %c0_i32_2 = arith.constant 0 : i32
    return %arg0, %c0_i32, %c0_i32_0, %c0_i32_1 : i32, i32, i32, i32
  }
  func.func @transform_2(%arg0: i32) -> (i32, i32, i32) {
    %c0_i32 = arith.constant 0 : i32
    %c0_i32_0 = arith.constant 0 : i32
    %c0_i32_1 = arith.constant 0 : i32
    %c0_i32_2 = arith.constant 0 : i32
    return %c0_i32, %c0_i32_0, %c0_i32_1 : i32, i32, i32
  }
  func.func @transform_3(%arg0: i32) -> (i32, i32, i32) {
    %c0_i32 = arith.constant 0 : i32
    %c0_i32_0 = arith.constant 0 : i32
    %c0_i32_1 = arith.constant 0 : i32
    %c0_i32_2 = arith.constant 0 : i32
    return %c0_i32, %c0_i32_0, %c0_i32_1 : i32, i32, i32
  }
  func.func @transform_4(%arg0: i32) -> (i32, i32, i32) {
    %c0_i32 = arith.constant 0 : i32
    %c0_i32_0 = arith.constant 0 : i32
    %c0_i32_1 = arith.constant 0 : i32
    return %arg0, %c0_i32, %c0_i32_0 : i32, i32, i32
  }
}

</mosaic_0001>

<bundles_post_ra>
// kernel: tpu_custom_call.1
= control target key start
LH: loop header
LB: loop body
LE: loop exit
PB: predicated region body
PF: predicated region fallthrough
CT: control target
= control target key end

     0   :  { %9 = vsyncpa [#allocation3], 0  ;;  %s7126_s0 = inlined_call_operand.hbm [shape: f32[2,3,16,16], index: 0, kind: input, shape index: {}]   ;;  %s7127_s1 = inlined_call_operand.hbm [shape: f32[2,3,16,16], index: 1, kind: input, shape index: {}]   ;;  %s7128_s2 = inlined_call_operand.hbm [shape: bf16[5,16,16], index: 2, kind: input, shape index: {}]   ;;  %s7129_s3 = inlined_call_operand.hbm [shape: bf16[5,16,16], index: 3, kind: input, shape index: {}]   ;;  %s7130_s4 = inlined_call_operand.hbm [shape: f32[1,1,1], index: 4, kind: output, shape index: {}]  }
   0x1   :  { %10 = vsyncpa [#allocation6], 0 }
   0x2   :  { %11 = vsyncpa [#allocation9], 0 }
   0x3   :  { %12 = vsyncpa [#allocation4], 0  ;;  %s6080_s15 = smov [#allocation5]   ;;  %s6081_s17 = smov [#allocation2]  }
   0x4   :  { %s30_s16 = sshll.u32 %s6080_s15, 4  ;;  %s18_s18 = sshll.u32 %s6081_s17, 4  ;;  %s31_s16 = int_to_ptr.vmem [resolvable:$true] %s30_s16  ;;  %s19_s18 = int_to_ptr.vmem [resolvable:$true] %s18_s18 }
   0x5   :  { %s5980_s19 = scalar_lea.vmem %s31_s16, 1536  ;;  %p5985_p1 = scmp.lt.s32.totalorder %s31_s16, %s31_s16 }
   0x6   :  { %p5981_p0 = scmp.ne.s32.totalorder %s31_s16, %s5980_s19  ;;  %p5986_p2 = scmp.lt.s32.totalorder %s5980_s19, %s5980_s19 }
   0x8   :  { %p5987_p3 = por %p5986_p2, %p5985_p1 }
   0xa   :  { %p5988_p4 = pnand %p5987_p3, %p5981_p0 }
   0xc   :  { %5991 = shalt.err (!%p5988_p4)
}
   0xd   :  { %s6082_s20 = smov 128   ;;  %s6083_s21 = smov 8  }
   0xe   :  { %36 = dma.hbm_to_vmem [thread:$0]  %s7127_s1, 1536, %s31_s16, [#allocation6], %s6082_s20, %s6082_s20, %s6083_s21  }
   0xf   :  { %s6000_s24 = scalar_lea.vmem %s19_s18, 1536  ;;  %p6005_p6 = scmp.lt.s32.totalorder %s19_s18, %s19_s18 }
  0x10   :  { %p6001_p5 = scmp.ne.s32.totalorder %s19_s18, %s6000_s24  ;;  %p6006_p7 = scmp.lt.s32.totalorder %s6000_s24, %s6000_s24 }
  0x12   :  { %p6007_p8 = por %p6006_p7, %p6005_p6 }
  0x14   :  { %p6008_p9 = pnand %p6007_p8, %p6001_p5 }
  0x16   :  { %6011 = shalt.err (!%p6008_p9)
}
  0x17   :  { %24 = dma.hbm_to_vmem [thread:$0]  %s7126_s0, 1536, %s19_s18, [#allocation3], %s6082_s20, %s6082_s20, %s6083_s21  }
  0x18   :  { %s6084_s27 = smov [#allocation7]  }
  0x19   :  { %s42_s28 = sshll.u32 %s6084_s27, 4  ;;  %s43_s28 = int_to_ptr.vmem [resolvable:$true] %s42_s28 }
  0x1a   :  { %s6020_s29 = scalar_lea.vmem %s43_s28, 640  ;;  %p6025_p11 = scmp.lt.s32.totalorder %s43_s28, %s43_s28 }
  0x1b   :  { %p6021_p10 = scmp.ne.s32.totalorder %s43_s28, %s6020_s29  ;;  %p6026_p12 = scmp.lt.s32.totalorder %s6020_s29, %s6020_s29 }
  0x1d   :  { %p6027_p13 = por %p6026_p12, %p6025_p11 }
  0x1f   :  { %p6028_p0 = pnand %p6027_p13, %p6021_p10 }
  0x21   :  { %6031 = shalt.err (!%p6028_p0)
}
  0x22   :  { %s6085_s1 = smov 64   ;;  %s6086_s30 = smov 4  }
  0x23   :  { %48 = dma.hbm_to_vmem [thread:$0]  %s7128_s2, 640, %s43_s28, [#allocation6], %s6085_s1, %s6085_s1, %s6086_s30  }
  0x24   :  { %s6087_s7 = smov [#allocation8]  }
  0x25   :  { %s54_s8 = sshll.u32 %s6087_s7, 4  ;;  %s55_s8 = int_to_ptr.vmem [resolvable:$true] %s54_s8 }
  0x26   :  { %s6040_s0 = scalar_lea.vmem %s55_s8, 640  ;;  %p6045_p2 = scmp.lt.s32.totalorder %s55_s8, %s55_s8 }
  0x27   :  { %p6041_p1 = scmp.ne.s32.totalorder %s55_s8, %s6040_s0  ;;  %p6046_p3 = scmp.lt.s32.totalorder %s6040_s0, %s6040_s0 }
  0x29   :  { %p6047_p4 = por %p6046_p3, %p6045_p2 }
  0x2b   :  { %p6048_p5 = pnand %p6047_p4, %p6041_p1 }
  0x2d   :  { %6051 = shalt.err (!%p6048_p5)
}
  0x2e   :  { %60 = dma.hbm_to_vmem [thread:$0]  %s7129_s3, 640, %s55_s8, [#allocation9], %s6085_s1, %s6085_s1, %s6086_s30  }
  0x2f   :  { %6072 = dma.done.wait [#allocation3], 1536  }
  0x30   :  { %6073 = vsyncadd [#allocation3], 4294965760 }
  0x31   :  { %6074 = dma.done.wait [#allocation6], 2176  }
  0x32   :  { %6075 = vsyncadd [#allocation6], 4294965120 }
  0x33   :  { %6076 = dma.done.wait [#allocation9], 640  }
  0x34   :  { %6077 = vsyncadd [#allocation9], 4294966656  ;;  %v5886_v0 = vld [vmem:[#allocation8] sm:$0xff]   ;;  %v6128_v1 = vld [vmem:[#allocation2] sm:$0xff]  ;;  %vm114_vm0 = vcmask 130048   ;;  %v6088_v33 = vmov 0.0  }
  0x35   :  { %v6130_v2 = vld [vmem:[#allocation2 + $0x8] sm:$0xff]  ;;  %v6132_v3 = vld [vmem:[#allocation5] sm:$0xff]  ;;  %5257 = vmatprep.subr.bf16.mxu0 %v5886_v0  ;;  %v78_v7 = vmul.f32 %v6128_v1, %v6128_v1  ;;  %v85_v18 = vld [vmem:[#allocation2 + $0x30] sm:$0xff]  ;;  %5279 = vmatprep.subr.bf16.mxu1 %v6088_v33  ;;  %vm6089_vm1 = vmmov 0   ;;  %s6090_s2 = smov [#allocation10]   ;;  %vm4843_vm2 = vcmask 0  }
  0x36   :  { %v6134_v4 = vld [vmem:[#allocation5 + $0x8] sm:$0xff]  ;;  %v6138_v5 = vpack.c.bf16 %v6130_v2, %v6128_v1  ;;  %v3807_v6 = vsub.f32 %v6128_v1, %v6132_v3  ;;  %v79_v8 = vmul.f32 %v6130_v2, %v6130_v2  ;;  %5258 = vmatpush3.bf16.msra.mxu0 %v5886_v0  ;;  %v80_v12 = vmul.f32 %v6132_v3, %v6132_v3  ;;  %v86_v19 = vld [vmem:[#allocation2 + $0x38] sm:$0xff]  ;;  %v88_v20 = vld [vmem:[#allocation5 + $0x30] sm:$0xff]  ;;  %s4851_s3 = sshll.u32 %s6090_s2, 4  ;;  %s4852_s3 = int_to_ptr.vmem [resolvable:$true] %s4851_s3 }
  0x37   :  { %v3808_v9 = vsub.f32 %v6130_v2, %v6134_v4  ;;  %v6150_v10 = vpack.c.bf16 %v6134_v4, %v6132_v3  ;;  %v81_v13 = vmul.f32 %v6134_v4, %v6134_v4  ;;  %v82_v14 = vmul.f32 %v6132_v3, %v6128_v1  ;;  %v89_v21 = vld [vmem:[#allocation5 + $0x38] sm:$0xff]  ;;  %5309 = vmatprep.subr.bf16.mxu0 %v6088_v33  ;;  %v6202_v40 = vld [vmem:[#allocation7] sm:$0xff]   ;;  %s6052_s11 = scalar_lea.vmem %s4852_s3, 16  ;;  %s6056_s12 = scalar_lea.vmem %s4852_s3, 32 }
  0x38   :  { %5259 = vmatprep.mubr.msk.bf16.mxu0 %vm114_vm0, %v6138_v5  ;;  %v6154_v11 = vpack.c.bf16 %v79_v8, %v78_v7  ;;  %v83_v15 = vmul.f32 %v6134_v4, %v6130_v2  ;;  %v6176_v22 = vpack.c.bf16 %v86_v19, %v85_v18  ;;  %v6178_v23 = vpack.c.bf16 %v89_v21, %v88_v20  ;;  %v5888_v7 = vld [vmem:[#allocation8 + $0x8] sm:$0xff]   ;;  %p6053_p6 = scmp.ne.s32.totalorder %s4852_s3, %s6052_s11  ;;  %p6057_p7 = scmp.lt.s32.totalorder %s4852_s3, %s4852_s3 }
  0x39   :  { %5260 = vmatmul.mubr.msk.bf16.vlgmr.msra.gmra.mxu0 %vm114_vm0, %v6150_v10  ;;  %v6168_v16 = vpack.c.bf16 %v81_v13, %v80_v12  ;;  %v90_v24 = vmul.f32 %v85_v18, %v85_v18  ;;  %v91_v25 = vmul.f32 %v86_v19, %v86_v19  ;;  %v92_v26 = vmul.f32 %v88_v20, %v88_v20  ;;  %v745_v8 = vld [vmem:[#allocation2 + $0x10] sm:$0xff]  ;;  %v746_v12 = vld [vmem:[#allocation2 + $0x18] sm:$0xff]  ;;  %p6058_p8 = scmp.lt.s32.totalorder %s6056_s12, %s6052_s11 }
  0x3a   :  { %5263 = vmatprep.mubr.msk.bf16.mxu0 %vm114_vm0, %v6154_v11  ;;  %v6170_v17 = vpack.c.bf16 %v83_v15, %v82_v14  ;;  %v93_v27 = vmul.f32 %v89_v21, %v89_v21  ;;  %v94_v30 = vmul.f32 %v88_v20, %v85_v18  ;;  %v95_v31 = vmul.f32 %v89_v21, %v86_v19  ;;  %v748_v13 = vld [vmem:[#allocation5 + $0x10] sm:$0xff]  ;;  %v749_v14 = vld [vmem:[#allocation5 + $0x18] sm:$0xff] }
  0x3b   :  { %v6184_v28 = vpack.c.bf16 %v91_v25, %v90_v24  ;;  %5281 = vmatprep.mubr.msk.bf16.mxu1 %vm6089_vm1, %v6088_v33  ;;  %v6262_v15 = vpack.c.bf16 %v746_v12, %v745_v8  ;;  %v751_v18 = vmul.f32 %v746_v12, %v746_v12  ;;  %v754_v20 = vmul.f32 %v748_v13, %v745_v8  ;;  %v757_v25 = vld [vmem:[#allocation2 + $0x40] sm:$0xff]  ;;  %p6059_p9 = por %p6058_p8, %p6057_p7 }
  0x3c   :  { %v6186_v29 = vpack.c.bf16 %v93_v27, %v92_v26  ;;  %v6192_v32 = vpack.c.bf16 %v95_v31, %v94_v30  ;;  %v755_v21 = vmul.f32 %v749_v14, %v746_v12  ;;  %v758_v26 = vld [vmem:[#allocation2 + $0x48] sm:$0xff]  ;;  %v760_v27 = vld [vmem:[#allocation5 + $0x40] sm:$0xff] }
  0x3d   :  { %v761_v30 = vld [vmem:[#allocation5 + $0x48] sm:$0xff]  ;;  %v6292_v31 = vpack.c.bf16 %v758_v26, %v757_v25  ;;  %p6060_p10 = pnand %p6059_p9, %p6053_p6 }
  0x3e   :  { %v6278_v24 = vpack.c.bf16 %v755_v21, %v754_v20 }
  0x41   :  { %5264 = vmatmul.mubr.msk.bf16.gmra.mxu0 %vm114_vm0, %v6168_v16 }
  0x42   :  { %5267 = vmatprep.mubr.msk.bf16.mxu0 %vm114_vm0, %v6170_v17 }
  0x49   :  { %5268 = vmatmul.mubr.msk.bf16.gmra.mxu0 %vm114_vm0, %v6176_v22 }
  0x4a   :  { %5271 = vmatprep.mubr.msk.bf16.mxu0 %vm114_vm0, %v6178_v23 }
  0x51   :  { %5272 = vmatmul.mubr.msk.bf16.gmra.mxu0 %vm114_vm0, %v6184_v28 }
  0x52   :  { %5275 = vmatprep.mubr.msk.bf16.mxu0 %vm114_vm0, %v6186_v29 }
  0x59   :  { %5276 = vmatmul.mubr.msk.bf16.gmra.mxu0 %vm114_vm0, %v6192_v32 }
  0x5a   :  { %5311 = vmatprep.mubr.msk.bf16.mxu0 %vm6089_vm1, %v6088_v33 }
  0xf9   :  { %v5261_v34 = vpop.f32.mrf.mxu0 }
  0xfb   :  { %v179_v35 = vpop.f32.mrf.mxu0 }
  0xfd   :  { %v5262_v36 = vpop.f32.mrf.mxu0 }
  0xfe   :  { %v259_v42 = vpack.c.bf16 %v5262_v36, %v5261_v34  ;;  %v6294_v34 = vpack.c.bf16 %v761_v30, %v760_v27  ;;  %v766_v36 = vmul.f32 %v760_v27, %v757_v25 }
  0xff   :  { %v182_v37 = vpop.f32.mrf.mxu0 }
 0x100   :  { %v258_v38 = vpack.c.bf16 %v182_v37, %v179_v35  ;;  %v767_v37 = vmul.f32 %v761_v30, %v758_v26 }
 0x101   :  { %v5265_v39 = vpop.f32.mrf.mxu0 }
 0x102   :  { %5280 = vmatpush3.bf16.msra.mxu1 %v258_v38  ;;  %v6308_v38 = vpack.c.bf16 %v767_v37, %v766_v36 }
 0x103   :  { %v195_v41 = vpop.f32.mrf.mxu0  ;;  %5285 = vmatprep.subr.bf16.mxu1 %v6088_v33 }
 0x105   :  { %5282 = vmatmul.mubr.msk.bf16.vlgmr.msra.gmra.mxu1 %vm114_vm0, %v6202_v40  ;;  %v5266_v43 = vpop.f32.mrf.mxu0 }
 0x106   :  { %5286 = vmatpush3.bf16.msra.mxu1 %v259_v42  ;;  %5287 = vmatprep.mubr.msk.bf16.mxu1 %vm6089_vm1, %v6088_v33  ;;  %v261_v53 = vpack.c.bf16 %v5266_v43, %v5265_v39 }
 0x107   :  { %v198_v44 = vpop.f32.mrf.mxu0  ;;  %5291 = vmatprep.subr.bf16.mxu1 %v6088_v33 }
 0x108   :  { %v260_v46 = vpack.c.bf16 %v198_v44, %v195_v41 }
 0x109   :  { %v5269_v45 = vpop.f32.mrf.mxu0 }
 0x10b   :  { %v211_v47 = vpop.f32.mrf.mxu0 }
 0x10d   :  { %5288 = vmatmul.mubr.msk.bf16.vlgmr.msra.gmra.mxu1 %vm114_vm0, %v6202_v40  ;;  %v5270_v48 = vpop.f32.mrf.mxu0 }
 0x10e   :  { %5292 = vmatpush3.bf16.msra.mxu1 %v260_v46  ;;  %5293 = vmatprep.mubr.msk.bf16.mxu1 %vm6089_vm1, %v6088_v33  ;;  %v263_v49 = vpack.c.bf16 %v5270_v48, %v5269_v45 }
 0x10f   :  { %5297 = vmatprep.subr.bf16.mxu1 %v6088_v33  ;;  %v214_v50 = vpop.f32.mrf.mxu0 }
 0x110   :  { %5310 = vmatpush3.bf16.msra.mxu0 %v263_v49  ;;  %v262_v58 = vpack.c.bf16 %v214_v50, %v211_v47 }
 0x111   :  { %v5273_v51 = vpop.f32.mrf.mxu0  ;;  %5321 = vmatprep.subr.bf16.mxu0 %v6088_v33 }
 0x113   :  { %v227_v52 = vpop.f32.mrf.mxu0  ;;  %5312 = vmatmul.mubr.msk.bf16.vlgmr.msra.gmra.mxu0 %vm114_vm0, %v6202_v40 }
 0x114   :  { %5323 = vmatprep.mubr.msk.bf16.mxu0 %vm6089_vm1, %v6088_v33 }
 0x115   :  { %5294 = vmatmul.mubr.msk.bf16.vlgmr.msra.gmra.mxu1 %vm114_vm0, %v6202_v40  ;;  %v5274_v54 = vpop.f32.mrf.mxu0 }
 0x116   :  { %5298 = vmatpush3.bf16.msra.mxu1 %v261_v53  ;;  %5299 = vmatprep.mubr.msk.bf16.mxu1 %vm6089_vm1, %v6088_v33  ;;  %v265_v55 = vpack.c.bf16 %v5274_v54, %v5273_v51 }
 0x117   :  { %5303 = vmatprep.subr.bf16.mxu1 %v6088_v33  ;;  %v230_v56 = vpop.f32.mrf.mxu0 }
 0x118   :  { %5322 = vmatpush3.bf16.msra.mxu0 %v265_v55  ;;  %v264_v62 = vpack.c.bf16 %v230_v56, %v227_v52 }
 0x119   :  { %v5277_v57 = vpop.f32.mrf.mxu0  ;;  %5333 = vmatprep.subr.bf16.mxu0 %v6088_v33 }
 0x11b   :  { %v243_v59 = vpop.f32.mrf.mxu0  ;;  %5324 = vmatmul.mubr.msk.bf16.vlgmr.msra.gmra.mxu0 %vm114_vm0, %v6202_v40 }
 0x11c   :  { %5335 = vmatprep.mubr.msk.bf16.mxu0 %vm6089_vm1, %v6088_v33 }
 0x11d   :  { %5300 = vmatmul.mubr.msk.bf16.vlgmr.msra.gmra.mxu1 %vm114_vm0, %v6202_v40  ;;  %v5278_v60 = vpop.f32.mrf.mxu0 }
 0x11e   :  { %5304 = vmatpush3.bf16.msra.mxu1 %v262_v58  ;;  %5305 = vmatprep.mubr.msk.bf16.mxu1 %vm6089_vm1, %v6088_v33  ;;  %v267_v61 = vpack.c.bf16 %v5278_v60, %v5277_v57 }
 0x11f   :  { %5315 = vmatprep.subr.bf16.mxu1 %v6088_v33  ;;  %v246_v63 = vpop.f32.mrf.mxu0 }
 0x120   :  { %5334 = vmatpush3.bf16.msra.mxu0 %v267_v61  ;;  %v266_v0 = vpack.c.bf16 %v246_v63, %v243_v59 }
 0x121   :  { %5381 = vmatprep.subr.bf16.mxu0 %v6088_v33 }
 0x123   :  { %5336 = vmatmul.mubr.msk.bf16.vlgmr.msra.gmra.mxu0 %vm114_vm0, %v6202_v40 }
 0x124   :  { %5383 = vmatprep.mubr.msk.bf16.mxu0 %vm6089_vm1, %v6088_v33 }
 0x125   :  { %5306 = vmatmul.mubr.msk.bf16.vlgmr.msra.gmra.mxu1 %vm114_vm0, %v6202_v40 }
 0x126   :  { %5316 = vmatpush3.bf16.msra.mxu1 %v264_v62  ;;  %5317 = vmatprep.mubr.msk.bf16.mxu1 %vm6089_vm1, %v6088_v33 }
 0x127   :  { %5327 = vmatprep.subr.bf16.mxu1 %v6088_v33 }
 0x12d   :  { %5318 = vmatmul.mubr.msk.bf16.vlgmr.msra.gmra.mxu1 %vm114_vm0, %v6202_v40 }
 0x12e   :  { %5328 = vmatpush3.bf16.msra.mxu1 %v266_v0  ;;  %5329 = vmatprep.mubr.msk.bf16.mxu1 %vm6089_vm1, %v6088_v33 }
 0x12f   :  { %5339 = vmatprep.subr.bf16.mxu1 %v5888_v7 }
 0x135   :  { %5330 = vmatmul.mubr.msk.bf16.vlgmr.msra.gmra.mxu1 %vm114_vm0, %v6202_v40 }
 0x136   :  { %5340 = vmatpush3.bf16.msra.mxu1 %v5888_v7  ;;  %5341 = vmatprep.mubr.msk.bf16.mxu1 %vm114_vm0, %v6138_v5  ;;  %v6264_v5 = vpack.c.bf16 %v749_v14, %v748_v13 }
 0x137   :  { %5441 = vmatprep.subr.bf16.mxu1 %v6088_v33 }
 0x13d   :  { %5342 = vmatmul.mubr.msk.bf16.vlgmr.msra.gmra.mxu1 %vm114_vm0, %v6150_v10  ;;  %v750_v10 = vmul.f32 %v745_v8, %v745_v8 }
 0x13e   :  { %5345 = vmatprep.mubr.msk.bf16.mxu1 %vm114_vm0, %v6154_v11  ;;  %v752_v11 = vmul.f32 %v748_v13, %v748_v13 }
 0x13f   :  { %v6270_v19 = vpack.c.bf16 %v751_v18, %v750_v10 }
 0x145   :  { %5346 = vmatmul.mubr.msk.bf16.gmra.mxu1 %vm114_vm0, %v6168_v16  ;;  %v753_v16 = vmul.f32 %v749_v14, %v749_v14 }
 0x146   :  { %5349 = vmatprep.mubr.msk.bf16.mxu1 %vm114_vm0, %v6170_v17 }
 0x147   :  { %v6272_v17 = vpack.c.bf16 %v753_v16, %v752_v11 }
 0x14d   :  { %5350 = vmatmul.mubr.msk.bf16.gmra.mxu1 %vm114_vm0, %v6262_v15 }
 0x14e   :  { %5353 = vmatprep.mubr.msk.bf16.mxu1 %vm114_vm0, %v6264_v5 }
 0x155   :  { %5354 = vmatmul.mubr.msk.bf16.gmra.mxu1 %vm114_vm0, %v6270_v19 }
 0x156   :  { %5357 = vmatprep.mubr.msk.bf16.mxu1 %vm114_vm0, %v6272_v17 }
 0x15d   :  { %5358 = vmatmul.mubr.msk.bf16.gmra.mxu1 %vm114_vm0, %v6278_v24 }
 0x15e   :  { %5361 = vmatprep.mubr.msk.bf16.mxu1 %vm114_vm0, %v6176_v22  ;;  %v762_v22 = vmul.f32 %v757_v25, %v757_v25 }
 0x165   :  { %5362 = vmatmul.mubr.msk.bf16.gmra.mxu1 %vm114_vm0, %v6178_v23  ;;  %v763_v23 = vmul.f32 %v758_v26, %v758_v26 }
 0x166   :  { %5365 = vmatprep.mubr.msk.bf16.mxu1 %vm114_vm0, %v6184_v28  ;;  %v764_v28 = vmul.f32 %v760_v27, %v760_v27 }
 0x167   :  { %v6300_v35 = vpack.c.bf16 %v763_v23, %v762_v22 }
 0x16d   :  { %5366 = vmatmul.mubr.msk.bf16.gmra.mxu1 %vm114_vm0, %v6186_v29  ;;  %v765_v29 = vmul.f32 %v761_v30, %v761_v30 }
 0x16e   :  { %5369 = vmatprep.mubr.msk.bf16.mxu1 %vm114_vm0, %v6192_v32 }
 0x16f   :  { %v6302_v32 = vpack.c.bf16 %v765_v29, %v764_v28 }
 0x175   :  { %5370 = vmatmul.mubr.msk.bf16.gmra.mxu1 %vm114_vm0, %v6292_v31 }
 0x176   :  { %5373 = vmatprep.mubr.msk.bf16.mxu1 %vm114_vm0, %v6294_v34 }
 0x17d   :  { %5374 = vmatmul.mubr.msk.bf16.gmra.mxu1 %vm114_vm0, %v6300_v35 }
 0x17e   :  { %5377 = vmatprep.mubr.msk.bf16.mxu1 %vm114_vm0, %v6302_v32 }
 0x185   :  { %5378 = vmatmul.mubr.msk.bf16.gmra.mxu1 %vm114_vm0, %v6308_v38 }
 0x186   :  { %5443 = vmatprep.mubr.msk.bf16.mxu1 %vm6089_vm1, %v6088_v33 }
 0x1c5   :  { %v312_v39 = vpop.f32.mrf.mxu1 }
 0x1c6   :  { %v483_v50 = vmul.f32 %v312_v39, %v312_v39 }
 0x1c7   :  { %v5283_v40 = vpop.f32.mrf.mxu1 }
 0x1c9   :  { %v315_v41 = vpop.f32.mrf.mxu1 }
 0x1ca   :  { %v484_v56 = vmul.f32 %v315_v41, %v315_v41 }
 0x1cb   :  { %v5284_v42 = vpop.f32.mrf.mxu1 }
 0x1cd   :  { %v353_v43 = vpop.f32.mrf.mxu1 }
 0x1ce   :  { %v487_v44 = vmul.f32 %v353_v43, %v312_v39  ;;  %v485_v12 = vmul.f32 %v353_v43, %v353_v43 }
 0x1cf   :  { %v5289_v45 = vpop.f32.mrf.mxu1 }
 0x1d1   :  { %v356_v46 = vpop.f32.mrf.mxu1 }
 0x1d2   :  { %v488_v47 = vmul.f32 %v356_v46, %v315_v41  ;;  %v486_v21 = vmul.f32 %v356_v46, %v356_v46 }
 0x1d3   :  { %v5290_v48 = vpop.f32.mrf.mxu1  ;;  %v545_v49 = vpop.f32.mrf.mxu0 }
 0x1d4   :  { %v716_v57 = vmul.f32 %v545_v49, %v545_v49 }
 0x1d5   :  { %v394_v51 = vpop.f32.mrf.mxu1  ;;  %v5313_v52 = vpop.f32.mrf.mxu0 }
 0x1d6   :  { %v495_v53 = vsub.f32 %v394_v51, %v483_v50 }
 0x1d7   :  { %v5295_v54 = vpop.f32.mrf.mxu1  ;;  %v548_v55 = vpop.f32.mrf.mxu0 }
 0x1d8   :  { %v717_v63 = vmul.f32 %v548_v55, %v548_v55 }
 0x1d9   :  { %v397_v58 = vpop.f32.mrf.mxu1  ;;  %v5314_v59 = vpop.f32.mrf.mxu0 }
 0x1da   :  { %v496_v60 = vsub.f32 %v397_v58, %v484_v56 }
 0x1db   :  { %v5296_v61 = vpop.f32.mrf.mxu1  ;;  %v627_v62 = vpop.f32.mrf.mxu0 }
 0x1dc   :  { %v728_v0 = vsub.f32 %v627_v62, %v716_v57 }
 0x1dd   :  { %v435_v7 = vpop.f32.mrf.mxu1  ;;  %v5325_v8 = vpop.f32.mrf.mxu0 }
 0x1de   :  { %v497_v13 = vadd.f32 %v495_v53, %v435_v7 }
 0x1df   :  { %v5301_v14 = vpop.f32.mrf.mxu1  ;;  %v630_v10 = vpop.f32.mrf.mxu0 }
 0x1e0   :  { %v499_v18 = vsub.f32 %v497_v13, %v485_v12  ;;  %v729_v11 = vsub.f32 %v630_v10, %v717_v63 }
 0x1e1   :  { %v438_v16 = vpop.f32.mrf.mxu1  ;;  %v5326_v20 = vpop.f32.mrf.mxu0 }
 0x1e2   :  { %v501_v25 = vadd.f32 0.0009, %v499_v18  ;;  %v498_v26 = vadd.f32 %v496_v60, %v438_v16 }
 0x1e3   :  { %v5302_v27 = vpop.f32.mrf.mxu1  ;;  %v709_v30 = vpop.f32.mrf.mxu0 }
 0x1e4   :  { %5896 = vrcp.f32 %v501_v25  ;;  %v500_v22 = vsub.f32 %v498_v26, %v486_v21 }
 0x1e5   :  { %v476_v23 = vpop.f32.mrf.mxu1  ;;  %v5337_v28 = vpop.f32.mrf.mxu0 }
 0x1e6   :  { %v502_v29 = vadd.f32 0.0009, %v500_v22  ;;  %v489_v36 = vsub.f32 %v476_v23, %v487_v44  ;;  %v6318_v23 = vld [vmem:[#allocation7 + $0x8] sm:$0xff]  }
 0x1e7   :  { %v5307_v37 = vpop.f32.mrf.mxu1  ;;  %v712_v39 = vpop.f32.mrf.mxu0 }
 0x1e8   :  { %5898 = vrcp.f32 %v502_v29  ;;  %v491_v45 = vmul.f32 2.0, %v489_v36 }
 0x1e9   :  { %v479_v40 = vpop.f32.mrf.mxu1  ;;  %v5338_v41 = vpop.f32.mrf.mxu0 }
 0x1ea   :  { %v490_v42 = vsub.f32 %v479_v40, %v488_v47  ;;  %v493_v51 = vadd.f32 0.0009, %v491_v45 }
 0x1eb   :  { %v5308_v43 = vpop.f32.mrf.mxu1 }
 0x1ec   :  { %v492_v52 = vmul.f32 2.0, %v490_v42 }
 0x1ed   :  { %v586_v48 = vpop.f32.mrf.mxu1 }
 0x1ee   :  { %v720_v46 = vmul.f32 %v586_v48, %v545_v49  ;;  %v494_v59 = vadd.f32 0.0009, %v492_v52  ;;  %v718_v47 = vmul.f32 %v586_v48, %v586_v48 }
 0x1ef   :  { %v5319_v50 = vpop.f32.mrf.mxu1 }
 0x1f0   :  { %v722_v53 = vsub.f32 %v709_v30, %v720_v46 }
 0x1f1   :  { %v5897_v54 = vpop.eup %5896  ;;  %v589_v56 = vpop.f32.mrf.mxu1 }
 0x1f2   :  { %v6314_v57 = vmul.f32 %v5897_v54, %v493_v51  ;;  %v721_v58 = vmul.f32 %v589_v56, %v548_v55  ;;  %v719_v13 = vmul.f32 %v589_v56, %v589_v56  ;;  %v724_v27 = vmul.f32 2.0, %v722_v53 }
 0x1f3   :  { %v5320_v44 = vpop.f32.mrf.mxu1 }
 0x1f4   :  { %v723_v60 = vsub.f32 %v712_v39, %v721_v58  ;;  %v726_v28 = vadd.f32 0.0009, %v724_v27 }
 0x1f5   :  { %v5899_v61 = vpop.eup %5898  ;;  %v668_v62 = vpop.f32.mrf.mxu1 }
 0x1f6   :  { %v6316_v63 = vmul.f32 %v5899_v61, %v494_v59  ;;  %v730_v7 = vadd.f32 %v728_v0, %v668_v62 }
 0x1f7   :  { %v5331_v8 = vpop.f32.mrf.mxu1 }
 0x1f8   :  { %v732_v49 = vsub.f32 %v730_v7, %v718_v47 }
 0x1f9   :  { %v671_v12 = vpop.f32.mrf.mxu1 }
 0x1fa   :  { %v734_v14 = vadd.f32 0.0009, %v732_v49  ;;  %v731_v10 = vadd.f32 %v729_v11, %v671_v12  ;;  %v725_v11 = vmul.f32 2.0, %v723_v60 }
 0x1fb   :  { %v5332_v18 = vpop.f32.mrf.mxu1 }
 0x1fc   :  { %5900 = vrcp.f32 %v734_v14  ;;  %v733_v16 = vsub.f32 %v731_v10, %v719_v13  ;;  %v727_v41 = vadd.f32 0.0009, %v725_v11 }
 0x1fd   :  { %v5343_v20 = vpop.f32.mrf.mxu1 }
 0x1fe   :  { %v735_v55 = vadd.f32 0.0009, %v733_v16 }
 0x1ff   :  { %v851_v21 = vpop.f32.mrf.mxu1 }
 0x200   :  { %5902 = vrcp.f32 %v735_v55 }
 0x201   :  { %v5344_v25 = vpop.f32.mrf.mxu1 }
 0x202   :  { %v1011_v29 = vpack.c.bf16 %v5344_v25, %v5343_v20 }
 0x203   :  { %v854_v26 = vpop.f32.mrf.mxu1 }
 0x204   :  { %v1010_v30 = vpack.c.bf16 %v854_v26, %v851_v21 }
 0x205   :  { %v5347_v22 = vpop.f32.mrf.mxu1 }
 0x206   :  { %5382 = vmatpush3.bf16.msra.mxu0 %v1010_v30 }
 0x207   :  { %v867_v0 = vpop.f32.mrf.mxu1  ;;  %5387 = vmatprep.subr.bf16.mxu0 %v6088_v33 }
 0x209   :  { %v5901_v36 = vpop.eup %5900  ;;  %v5348_v37 = vpop.f32.mrf.mxu1  ;;  %5384 = vmatmul.mubr.msk.bf16.vlgmr.msra.gmra.mxu0 %vm114_vm0, %v6318_v23 }
 0x20a   :  { %5388 = vmatpush3.bf16.msra.mxu0 %v1011_v29  ;;  %5389 = vmatprep.mubr.msk.bf16.mxu0 %vm6089_vm1, %v6088_v33  ;;  %v6325_v39 = vmul.f32 %v5901_v36, %v726_v28  ;;  %v1013_v54 = vpack.c.bf16 %v5348_v37, %v5347_v22 }
 0x20b   :  { %v870_v40 = vpop.f32.mrf.mxu1  ;;  %5393 = vmatprep.subr.bf16.mxu0 %v6088_v33 }
 0x20c   :  { %v1012_v46 = vpack.c.bf16 %v870_v40, %v867_v0 }
 0x20d   :  { %v5903_v42 = vpop.eup %5902  ;;  %v5351_v43 = vpop.f32.mrf.mxu1 }
 0x20e   :  { %v6328_v45 = vmul.f32 %v5903_v42, %v727_v41 }
 0x20f   :  { %v883_v48 = vpop.f32.mrf.mxu1 }
 0x211   :  { %v5352_v50 = vpop.f32.mrf.mxu1  ;;  %5390 = vmatmul.mubr.msk.bf16.vlgmr.msra.gmra.mxu0 %vm114_vm0, %v6318_v23 }
 0x212   :  { %5394 = vmatpush3.bf16.msra.mxu0 %v1012_v46  ;;  %5395 = vmatprep.mubr.msk.bf16.mxu0 %vm6089_vm1, %v6088_v33  ;;  %v1015_v8 = vpack.c.bf16 %v5352_v50, %v5351_v43  ;;  %v5890_v46 = vld [vmem:[#allocation8 + $0x10] sm:$0xff]  }
 0x213   :  { %v886_v51 = vpop.f32.mrf.mxu1  ;;  %5399 = vmatprep.subr.bf16.mxu0 %v6088_v33 }
 0x214   :  { %v1014_v60 = vpack.c.bf16 %v886_v51, %v883_v48 }
 0x215   :  { %v5355_v52 = vpop.f32.mrf.mxu1 }
 0x217   :  { %v899_v53 = vpop.f32.mrf.mxu1 }
 0x219   :  { %v5356_v56 = vpop.f32.mrf.mxu1  ;;  %5396 = vmatmul.mubr.msk.bf16.vlgmr.msra.gmra.mxu0 %vm114_vm0, %v6318_v23 }
 0x21a   :  { %5400 = vmatpush3.bf16.msra.mxu0 %v1013_v54  ;;  %5401 = vmatprep.mubr.msk.bf16.mxu0 %vm6089_vm1, %v6088_v33  ;;  %v1017_v26 = vpack.c.bf16 %v5356_v56, %v5355_v52 }
 0x21b   :  { %v902_v58 = vpop.f32.mrf.mxu1  ;;  %5405 = vmatprep.subr.bf16.mxu0 %v6088_v33 }
 0x21c   :  { %v1016_v18 = vpack.c.bf16 %v902_v58, %v899_v53 }
 0x21d   :  { %v6340_v44 = vpop.f32.mrf.mxu1 }
 0x21f   :  { %v915_v59 = vpop.f32.mrf.mxu1 }
 0x221   :  { %v6342_v61 = vpop.f32.mrf.mxu1  ;;  %5402 = vmatmul.mubr.msk.bf16.vlgmr.msra.gmra.mxu0 %vm114_vm0, %v6318_v23 }
 0x222   :  { %5406 = vmatpush3.bf16.msra.mxu0 %v1014_v60  ;;  %5407 = vmatprep.mubr.msk.bf16.mxu0 %vm6089_vm1, %v6088_v33  ;;  %v1019_v42 = vpack.c.bf16 %v6342_v61, %v6340_v44 }
 0x223   :  { %v918_v62 = vpop.f32.mrf.mxu1  ;;  %5411 = vmatprep.subr.bf16.mxu0 %v6088_v33 }
 0x224   :  { %v1018_v11 = vpack.c.bf16 %v918_v62, %v915_v59 }
 0x225   :  { %v6349_v47 = vpop.f32.mrf.mxu1 }
 0x227   :  { %v931_v7 = vpop.f32.mrf.mxu1 }
 0x229   :  { %v6351_v49 = vpop.f32.mrf.mxu1  ;;  %5408 = vmatmul.mubr.msk.bf16.vlgmr.msra.gmra.mxu0 %vm114_vm0, %v6318_v23 }
 0x22a   :  { %5412 = vmatpush3.bf16.msra.mxu0 %v1015_v8  ;;  %5413 = vmatprep.mubr.msk.bf16.mxu0 %vm6089_vm1, %v6088_v33  ;;  %v1021_v51 = vpack.c.bf16 %v6351_v49, %v6349_v47 }
 0x22b   :  { %v934_v12 = vpop.f32.mrf.mxu1  ;;  %5417 = vmatprep.subr.bf16.mxu0 %v6088_v33 }
 0x22c   :  { %v1020_v13 = vpack.c.bf16 %v934_v12, %v931_v7 }
 0x22d   :  { %v6358_v14 = vpop.f32.mrf.mxu1 }
 0x22e   :  { %5442 = vmatpush3.bf16.msra.mxu1 %v1020_v13 }
 0x22f   :  { %v947_v10 = vpop.f32.mrf.mxu1  ;;  %5453 = vmatprep.subr.bf16.mxu1 %v6088_v33 }
 0x231   :  { %v6361_v16 = vpop.f32.mrf.mxu1  ;;  %5414 = vmatmul.mubr.msk.bf16.vlgmr.msra.gmra.mxu0 %vm114_vm0, %v6318_v23  ;;  %5444 = vmatmul.mubr.msk.bf16.vlgmr.msra.gmra.mxu1 %vm114_vm0, %v6318_v23 }
 0x232   :  { %5418 = vmatpush3.bf16.msra.mxu0 %v1016_v18  ;;  %5419 = vmatprep.mubr.msk.bf16.mxu0 %vm6089_vm1, %v6088_v33  ;;  %v1023_v52 = vpack.c.bf16 %v6361_v16, %v6358_v14 }
 0x233   :  { %v950_v20 = vpop.f32.mrf.mxu1  ;;  %5423 = vmatprep.subr.bf16.mxu0 %v6088_v33  ;;  %5455 = vmatprep.mubr.msk.bf16.mxu1 %vm6089_vm1, %v6088_v33 }
 0x234   :  { %v1022_v55 = vpack.c.bf16 %v950_v20, %v947_v10 }
 0x235   :  { %v6372_v21 = vpop.f32.mrf.mxu1 }
 0x236   :  { %5454 = vmatpush3.bf16.msra.mxu1 %v1022_v55 }
 0x237   :  { %v963_v25 = vpop.f32.mrf.mxu1  ;;  %5465 = vmatprep.subr.bf16.mxu1 %v6088_v33 }
 0x239   :  { %v5372_v27 = vpop.f32.mrf.mxu1  ;;  %5420 = vmatmul.mubr.msk.bf16.vlgmr.msra.gmra.mxu0 %vm114_vm0, %v6318_v23  ;;  %5456 = vmatmul.mubr.msk.bf16.vlgmr.msra.gmra.mxu1 %vm114_vm0, %v6318_v23 }
 0x23a   :  { %5424 = vmatpush3.bf16.msra.mxu0 %v1017_v26  ;;  %5425 = vmatprep.mubr.msk.bf16.mxu0 %vm6089_vm1, %v6088_v33  ;;  %v1025_v53 = vpack.c.bf16 %v5372_v27, %v6372_v21 }
 0x23b   :  { %v966_v30 = vpop.f32.mrf.mxu1  ;;  %5429 = vmatprep.subr.bf16.mxu0 %v6088_v33  ;;  %5467 = vmatprep.mubr.msk.bf16.mxu1 %vm6089_vm1, %v6088_v33 }
 0x23c   :  { %v1024_v22 = vpack.c.bf16 %v966_v30, %v963_v25 }
 0x23d   :  { %v5375_v0 = vpop.f32.mrf.mxu1 }
 0x23e   :  { %5466 = vmatpush3.bf16.msra.mxu1 %v1024_v22 }
 0x23f   :  { %v979_v28 = vpop.f32.mrf.mxu1  ;;  %5477 = vmatprep.subr.bf16.mxu1 %v6088_v33 }
 0x241   :  { %v5376_v29 = vpop.f32.mrf.mxu1  ;;  %5426 = vmatmul.mubr.msk.bf16.vlgmr.msra.gmra.mxu0 %vm114_vm0, %v6318_v23  ;;  %5468 = vmatmul.mubr.msk.bf16.vlgmr.msra.gmra.mxu1 %vm114_vm0, %v6318_v23 }
 0x242   :  { %5430 = vmatpush3.bf16.msra.mxu0 %v1018_v11  ;;  %5431 = vmatprep.mubr.msk.bf16.mxu0 %vm6089_vm1, %v6088_v33  ;;  %v1027_v54 = vpack.c.bf16 %v5376_v29, %v5375_v0 }
 0x243   :  { %v982_v36 = vpop.f32.mrf.mxu1  ;;  %5435 = vmatprep.subr.bf16.mxu0 %v6088_v33  ;;  %5479 = vmatprep.mubr.msk.bf16.mxu1 %vm6089_vm1, %v6088_v33 }
 0x244   :  { %v1026_v37 = vpack.c.bf16 %v982_v36, %v979_v28 }
 0x245   :  { %v5379_v40 = vpop.f32.mrf.mxu1 }
 0x246   :  { %5478 = vmatpush3.bf16.msra.mxu1 %v1026_v37 }
 0x247   :  { %v995_v41 = vpop.f32.mrf.mxu1  ;;  %5489 = vmatprep.subr.bf16.mxu1 %v6088_v33 }
 0x249   :  { %v5380_v43 = vpop.f32.mrf.mxu1  ;;  %5432 = vmatmul.mubr.msk.bf16.vlgmr.msra.gmra.mxu0 %vm114_vm0, %v6318_v23  ;;  %5480 = vmatmul.mubr.msk.bf16.vlgmr.msra.gmra.mxu1 %vm114_vm0, %v6318_v23 }
 0x24a   :  { %5436 = vmatpush3.bf16.msra.mxu0 %v1019_v42  ;;  %5437 = vmatprep.mubr.msk.bf16.mxu0 %vm6089_vm1, %v6088_v33  ;;  %v1029_v56 = vpack.c.bf16 %v5380_v43, %v5379_v40 }
 0x24b   :  { %v998_v48 = vpop.f32.mrf.mxu1  ;;  %5447 = vmatprep.subr.bf16.mxu0 %v6088_v33  ;;  %5491 = vmatprep.mubr.msk.bf16.mxu1 %vm6089_vm1, %v6088_v33 }
 0x24c   :  { %v1028_v50 = vpack.c.bf16 %v998_v48, %v995_v41 }
 0x24e   :  { %5490 = vmatpush3.bf16.msra.mxu1 %v1028_v50 }
 0x24f   :  { %5501 = vmatprep.subr.bf16.mxu1 %v5890_v46 }
 0x251   :  { %5438 = vmatmul.mubr.msk.bf16.vlgmr.msra.gmra.mxu0 %vm114_vm0, %v6318_v23  ;;  %5492 = vmatmul.mubr.msk.bf16.vlgmr.msra.gmra.mxu1 %vm114_vm0, %v6318_v23 }
 0x252   :  { %5448 = vmatpush3.bf16.msra.mxu0 %v1021_v51  ;;  %5502 = vmatpush3.bf16.msra.mxu1 %v5890_v46 }
 0x253   :  { %5449 = vmatprep.mubr.msk.bf16.mxu0 %vm6089_vm1, %v6088_v33  ;;  %5459 = vmatprep.subr.bf16.mxu0 %v6088_v33 }
 0x254   :  { %5503 = vmatprep.mubr.msk.bf16.mxu1 %vm114_vm0, %v6262_v15  ;;  %5553 = vmatprep.subr.bf16.mxu1 %v6088_v33 }
 0x259   :  { %5450 = vmatmul.mubr.msk.bf16.vlgmr.msra.gmra.mxu0 %vm114_vm0, %v6318_v23  ;;  %5504 = vmatmul.mubr.msk.bf16.vlgmr.msra.gmra.mxu1 %vm114_vm0, %v6264_v5 }
 0x25a   :  { %5460 = vmatpush3.bf16.msra.mxu0 %v1023_v52  ;;  %5461 = vmatprep.mubr.msk.bf16.mxu0 %vm6089_vm1, %v6088_v33 }
 0x25b   :  { %5471 = vmatprep.subr.bf16.mxu0 %v6088_v33  ;;  %5507 = vmatprep.mubr.msk.bf16.mxu1 %vm114_vm0, %v6270_v19 }
 0x261   :  { %5462 = vmatmul.mubr.msk.bf16.vlgmr.msra.gmra.mxu0 %vm114_vm0, %v6318_v23  ;;  %5508 = vmatmul.mubr.msk.bf16.gmra.mxu1 %vm114_vm0, %v6272_v17 }
 0x262   :  { %5472 = vmatpush3.bf16.msra.mxu0 %v1025_v53  ;;  %5473 = vmatprep.mubr.msk.bf16.mxu0 %vm6089_vm1, %v6088_v33 }
 0x263   :  { %5483 = vmatprep.subr.bf16.mxu0 %v6088_v33  ;;  %5511 = vmatprep.mubr.msk.bf16.mxu1 %vm114_vm0, %v6278_v24 }
 0x269   :  { %5474 = vmatmul.mubr.msk.bf16.vlgmr.msra.gmra.mxu0 %vm114_vm0, %v6318_v23  ;;  %5512 = vmatmul.mubr.msk.bf16.gmra.mxu1 %vm114_vm0, %v6292_v31 }
 0x26a   :  { %5484 = vmatpush3.bf16.msra.mxu0 %v1027_v54  ;;  %5485 = vmatprep.mubr.msk.bf16.mxu0 %vm6089_vm1, %v6088_v33 }
 0x26b   :  { %5495 = vmatprep.subr.bf16.mxu0 %v6088_v33  ;;  %5515 = vmatprep.mubr.msk.bf16.mxu1 %vm114_vm0, %v6294_v34 }
 0x271   :  { %5486 = vmatmul.mubr.msk.bf16.vlgmr.msra.gmra.mxu0 %vm114_vm0, %v6318_v23  ;;  %5516 = vmatmul.mubr.msk.bf16.gmra.mxu1 %vm114_vm0, %v6300_v35 }
 0x272   :  { %5496 = vmatpush3.bf16.msra.mxu0 %v1029_v56  ;;  %5497 = vmatprep.mubr.msk.bf16.mxu0 %vm6089_vm1, %v6088_v33 }
 0x273   :  { %5519 = vmatprep.mubr.msk.bf16.mxu1 %vm114_vm0, %v6302_v32  ;;  %5523 = vmatprep.subr.bf16.mxu0 %v6088_v33 }
 0x279   :  { %5498 = vmatmul.mubr.msk.bf16.vlgmr.msra.gmra.mxu0 %vm114_vm0, %v6318_v23  ;;  %5520 = vmatmul.mubr.msk.bf16.gmra.mxu1 %vm114_vm0, %v6308_v38 }
 0x27a   :  { %5525 = vmatprep.mubr.msk.bf16.mxu0 %vm6089_vm1, %v6088_v33  ;;  %5555 = vmatprep.mubr.msk.bf16.mxu1 %vm6089_vm1, %v6088_v33 }
 0x2c9   :  { %v1075_v58 = vpop.f32.mrf.mxu0 }
 0x2ca   :  { %v1246_v8 = vmul.f32 %v1075_v58, %v1075_v58 }
 0x2cb   :  { %v5385_v44 = vpop.f32.mrf.mxu0 }
 0x2cd   :  { %v1078_v59 = vpop.f32.mrf.mxu0 }
 0x2ce   :  { %v1247_v13 = vmul.f32 %v1078_v59, %v1078_v59 }
 0x2cf   :  { %v5386_v60 = vpop.f32.mrf.mxu0 }
 0x2d1   :  { %v1116_v61 = vpop.f32.mrf.mxu0 }
 0x2d2   :  { %v1250_v62 = vmul.f32 %v1116_v61, %v1075_v58  ;;  %v1248_v55 = vmul.f32 %v1116_v61, %v1116_v61  ;;  %v507_v58 = vmul.f32 %v6314_v57, %v6314_v57 }
 0x2d3   :  { %v5391_v47 = vpop.f32.mrf.mxu0 }
 0x2d5   :  { %v1119_v7 = vpop.f32.mrf.mxu0 }
 0x2d6   :  { %v1251_v49 = vmul.f32 %v1119_v7, %v1078_v59  ;;  %v1249_v27 = vmul.f32 %v1119_v7, %v1119_v7 }
 0x2d7   :  { %v5392_v23 = vpop.f32.mrf.mxu0 }
 0x2d9   :  { %v1157_v12 = vpop.f32.mrf.mxu0 }
 0x2da   :  { %v1258_v14 = vsub.f32 %v1157_v12, %v1246_v8  ;;  %v509_v8 = vmul.f32 %v507_v58, %v6314_v57 }
 0x2db   :  { %v5397_v10 = vpop.f32.mrf.mxu0 }
 0x2dd   :  { %v1160_v18 = vpop.f32.mrf.mxu0 }
 0x2de   :  { %v1259_v16 = vsub.f32 %v1160_v18, %v1247_v13 }
 0x2df   :  { %v5398_v20 = vpop.f32.mrf.mxu0 }
 0x2e1   :  { %v1198_v21 = vpop.f32.mrf.mxu0 }
 0x2e2   :  { %v1260_v25 = vadd.f32 %v1258_v14, %v1198_v21 }
 0x2e3   :  { %v5403_v26 = vpop.f32.mrf.mxu0 }
 0x2e4   :  { %v1262_v30 = vsub.f32 %v1260_v25, %v1248_v55 }
 0x2e5   :  { %v1201_v22 = vpop.f32.mrf.mxu0 }
 0x2e6   :  { %v1264_v0 = vadd.f32 0.0009, %v1262_v30  ;;  %v1261_v28 = vadd.f32 %v1259_v16, %v1201_v22 }
 0x2e7   :  { %v5404_v11 = vpop.f32.mrf.mxu0 }
 0x2e8   :  { %5904 = vrcp.f32 %v1264_v0  ;;  %v1263_v29 = vsub.f32 %v1261_v28, %v1249_v27 }
 0x2e9   :  { %v1239_v36 = vpop.f32.mrf.mxu0 }
 0x2ea   :  { %v1265_v37 = vadd.f32 0.0009, %v1263_v29  ;;  %v1252_v40 = vsub.f32 %v1239_v36, %v1250_v62 }
 0x2eb   :  { %v5409_v41 = vpop.f32.mrf.mxu0 }
 0x2ec   :  { %5906 = vrcp.f32 %v1265_v37  ;;  %v1254_v43 = vmul.f32 2.0, %v1252_v40 }
 0x2ed   :  { %v1242_v42 = vpop.f32.mrf.mxu0 }
 0x2ee   :  { %v1253_v48 = vsub.f32 %v1242_v42, %v1251_v49  ;;  %v1256_v52 = vadd.f32 0.0009, %v1254_v43  ;;  %v508_v49 = vmul.f32 %v6316_v63, %v6316_v63 }
 0x2ef   :  { %v5410_v46 = vpop.f32.mrf.mxu0 }
 0x2f0   :  { %v1255_v53 = vmul.f32 2.0, %v1253_v48  ;;  %v510_v25 = vmul.f32 %v508_v49, %v6316_v63 }
 0x2f1   :  { %v1308_v50 = vpop.f32.mrf.mxu0  ;;  %v6465_v51 = vpop.f32.mrf.mxu1 }
 0x2f2   :  { %v1257_v62 = vadd.f32 0.0009, %v1255_v53  ;;  %v6476_v13 = vmul.f32 %v6465_v51, %v6465_v51  ;;  %v1479_v28 = vmul.f32 %v1308_v50, %v1308_v50 }
 0x2f3   :  { %v5415_v54 = vpop.f32.mrf.mxu0  ;;  %v5445_v56 = vpop.f32.mrf.mxu1 }
 0x2f5   :  { %v5905_v44 = vpop.eup %5904  ;;  %v1311_v59 = vpop.f32.mrf.mxu0 }
 0x2f6   :  { %v6469_v60 = vpop.f32.mrf.mxu1  ;;  %v1267_v61 = vmul.f32 %v5905_v44, %v1256_v52  ;;  %v1480_v63 = vmul.f32 %v1311_v59, %v1311_v59 }
 0x2f7   :  { %v5416_v47 = vpop.f32.mrf.mxu0  ;;  %v6487_v27 = vmul.f32 %v6469_v60, %v6469_v60 }
 0x2f8   :  { %v5446_v7 = vpop.f32.mrf.mxu1  ;;  %v1270_v23 = vmul.f32 %v1267_v61, %v1267_v61 }
 0x2f9   :  { %v5907_v12 = vpop.eup %5906  ;;  %v1349_v14 = vpop.f32.mrf.mxu0 }
 0x2fa   :  { %v6478_v10 = vpop.f32.mrf.mxu1  ;;  %v6480_v18 = vmul.f32 %v1270_v23, %v509_v8  ;;  %v1269_v16 = vmul.f32 %v5907_v12, %v1257_v62  ;;  %v1483_v20 = vmul.f32 %v1349_v14, %v1308_v50  ;;  %v1481_v50 = vmul.f32 %v1349_v14, %v1349_v14 }
 0x2fb   :  { %v1722_v55 = vsub.f32 %v6478_v10, %v6476_v13  ;;  %v5421_v57 = vpop.f32.mrf.mxu0 }
 0x2fc   :  { %v5457_v21 = vpop.f32.mrf.mxu1  ;;  %v1271_v26 = vmul.f32 %v1269_v16, %v1269_v16 }
 0x2fd   :  { %v1352_v30 = vpop.f32.mrf.mxu0 }
 0x2fe   :  { %v6489_v22 = vpop.f32.mrf.mxu1  ;;  %v6491_v0 = vmul.f32 %v1271_v26, %v510_v25  ;;  %v1484_v11 = vmul.f32 %v1352_v30, %v1311_v59  ;;  %v1482_v7 = vmul.f32 %v1352_v30, %v1352_v30 }
 0x2ff   :  { %v1723_v29 = vsub.f32 %v6489_v22, %v6487_v27  ;;  %v5422_v36 = vpop.f32.mrf.mxu0 }
 0x300   :  { %v5458_v37 = vpop.f32.mrf.mxu1 }
 0x301   :  { %v1390_v40 = vpop.f32.mrf.mxu0 }
 0x302   :  { %v6495_v41 = vpop.f32.mrf.mxu1  ;;  %v1491_v42 = vsub.f32 %v1390_v40, %v1479_v28 }
 0x303   :  { %v5427_v43 = vpop.f32.mrf.mxu0 }
 0x304   :  { %v5469_v48 = vpop.f32.mrf.mxu1 }
 0x305   :  { %v1393_v46 = vpop.f32.mrf.mxu0 }
 0x306   :  { %v6497_v52 = vpop.f32.mrf.mxu1  ;;  %v1492_v53 = vsub.f32 %v1393_v46, %v1480_v63 }
 0x307   :  { %v5428_v54 = vpop.f32.mrf.mxu0 }
 0x308   :  { %v5470_v56 = vpop.f32.mrf.mxu1 }
 0x309   :  { %v1431_v58 = vpop.f32.mrf.mxu0 }
 0x30a   :  { %v6499_v44 = vpop.f32.mrf.mxu1  ;;  %v1493_v61 = vadd.f32 %v1491_v42, %v1431_v58 }
 0x30b   :  { %v5433_v62 = vpop.f32.mrf.mxu0 }
 0x30c   :  { %v5481_v47 = vpop.f32.mrf.mxu1  ;;  %v1495_v8 = vsub.f32 %v1493_v61, %v1481_v50 }
 0x30d   :  { %v1434_v49 = vpop.f32.mrf.mxu0 }
 0x30e   :  { %v6501_v59 = vpop.f32.mrf.mxu1  ;;  %v1497_v23 = vadd.f32 0.0009, %v1495_v8  ;;  %v1494_v12 = vadd.f32 %v1492_v53, %v1434_v49 }
 0x30f   :  { %v5434_v16 = vpop.f32.mrf.mxu0 }
 0x310   :  { %v5482_v57 = vpop.f32.mrf.mxu1  ;;  %5908 = vrcp.f32 %v1497_v23  ;;  %v1496_v21 = vsub.f32 %v1494_v12, %v1482_v7 }
 0x311   :  { %v1472_v25 = vpop.f32.mrf.mxu0 }
 0x312   :  { %v6503_v26 = vpop.f32.mrf.mxu1  ;;  %v1498_v14 = vadd.f32 0.0009, %v1496_v21  ;;  %v1485_v28 = vsub.f32 %v1472_v25, %v1483_v20 }
 0x313   :  { %v5439_v36 = vpop.f32.mrf.mxu0 }
 0x314   :  { %v5493_v37 = vpop.f32.mrf.mxu1  ;;  %5910 = vrcp.f32 %v1498_v14  ;;  %v1487_v63 = vmul.f32 2.0, %v1485_v28  ;;  %v6519_v28 = vld [vmem:[#allocation7 + $0x10] sm:$0xff]  }
 0x315   :  { %v1475_v40 = vpop.f32.mrf.mxu0 }
 0x316   :  { %v6505_v30 = vpop.f32.mrf.mxu1  ;;  %v1486_v42 = vsub.f32 %v1475_v40, %v1484_v11  ;;  %v1489_v54 = vadd.f32 0.0009, %v1487_v63 }
 0x317   :  { %v5440_v43 = vpop.f32.mrf.mxu0 }
 0x318   :  { %v5494_v48 = vpop.f32.mrf.mxu1  ;;  %v1488_v56 = vmul.f32 2.0, %v1486_v42 }
 0x319   :  { %v1580_v46 = vpop.f32.mrf.mxu0 }
 0x31a   :  { %v5505_v53 = vpop.f32.mrf.mxu1  ;;  %v1714_v50 = vmul.f32 %v1580_v46, %v6465_v51  ;;  %v1490_v49 = vadd.f32 0.0009, %v1488_v56  ;;  %v1712_v57 = vmul.f32 %v1580_v46, %v1580_v46 }
 0x31b   :  { %v5451_v58 = vpop.f32.mrf.mxu0 }
 0x31c   :  { %v2012_v61 = vpop.f32.mrf.mxu1  ;;  %v1716_v20 = vsub.f32 %v6495_v41, %v1714_v50 }
 0x31d   :  { %v5909_v62 = vpop.eup %5908  ;;  %v1583_v47 = vpop.f32.mrf.mxu0 }
 0x31e   :  { %v5506_v7 = vpop.f32.mrf.mxu1  ;;  %v1500_v8 = vmul.f32 %v5909_v62, %v1489_v54  ;;  %v6510_v23 = vmul.f32 %v1583_v47, %v6469_v60  ;;  %v1713_v63 = vmul.f32 %v1583_v47, %v1583_v47 }
 0x31f   :  { %v5452_v11 = vpop.f32.mrf.mxu0  ;;  %v2092_v42 = vpack.c.bf16 %v5506_v7, %v5505_v53 }
 0x320   :  { %v2015_v12 = vpop.f32.mrf.mxu1  ;;  %v6513_v16 = vmul.f32 %v1500_v8, %v6480_v18  ;;  %v1717_v51 = vsub.f32 %v6497_v52, %v6510_v23  ;;  %v1946_v23 = vmul.f32 %v6501_v59, %v6501_v59 }
 0x321   :  { %v2091_v21 = vpack.c.bf16 %v2015_v12, %v2012_v61  ;;  %v5911_v25 = vpop.eup %5910  ;;  %v1662_v41 = vpop.f32.mrf.mxu0  ;;  %v1718_v12 = vmul.f32 2.0, %v1716_v20 }
 0x322   :  { %v6517_v14 = vpop.f32.mrf.mxu1  ;;  %v1502_v36 = vmul.f32 %v5911_v25, %v1490_v49  ;;  %v1724_v60 = vadd.f32 %v1722_v55, %v1662_v41 }
 0x323   :  { %5524 = vmatpush3.bf16.msra.mxu0 %v2091_v21  ;;  %v5463_v37 = vpop.f32.mrf.mxu0  ;;  %v1720_v20 = vadd.f32 0.0009, %v1718_v12 }
 0x324   :  { %v2028_v18 = vpop.f32.mrf.mxu1  ;;  %5529 = vmatprep.subr.bf16.mxu0 %v6088_v33  ;;  %v6526_v40 = vmul.f32 %v1502_v36, %v6491_v0  ;;  %v1726_v43 = vsub.f32 %v1724_v60, %v1712_v57  ;;  %v740_v60 = vmul.f32 %v6325_v39, %v6325_v39 }
 0x325   :  { %v1665_v48 = vpop.f32.mrf.mxu0 }
 0x326   :  { %5526 = vmatmul.mubr.msk.bf16.vlgmr.msra.gmra.mxu0 %vm114_vm0, %v6519_v28  ;;  %v5510_v46 = vpop.f32.mrf.mxu1  ;;  %v1728_v54 = vadd.f32 0.0009, %v1726_v43  ;;  %v1725_v13 = vadd.f32 %v1723_v29, %v1665_v48  ;;  %v1719_v48 = vmul.f32 2.0, %v1717_v51 }
 0x327   :  { %5530 = vmatpush3.bf16.msra.mxu0 %v2092_v42  ;;  %5531 = vmatprep.mubr.msk.bf16.mxu0 %vm6089_vm1, %v6088_v33  ;;  %v5464_v10 = vpop.f32.mrf.mxu0 }
 0x328   :  { %v2031_v55 = vpop.f32.mrf.mxu1  ;;  %5535 = vmatprep.subr.bf16.mxu0 %v6088_v33  ;;  %5912 = vrcp.f32 %v1728_v54  ;;  %v1727_v0 = vsub.f32 %v1725_v13, %v1713_v63  ;;  %v2094_v63 = vpack.c.bf16 %v5510_v46, %v6517_v14  ;;  %v742_v14 = vmul.f32 %v740_v60, %v6325_v39 }
 0x329   :  { %v1772_v53 = vpop.f32.mrf.mxu0  ;;  %v2093_v61 = vpack.c.bf16 %v2031_v55, %v2028_v18  ;;  %v1945_v18 = vmul.f32 %v6499_v44, %v6499_v44 }
 0x32a   :  { %v5513_v56 = vpop.f32.mrf.mxu1  ;;  %v1729_v50 = vadd.f32 0.0009, %v1727_v0  ;;  %v6537_v58 = vmul.f32 %v6499_v44, %v1772_v53  ;;  %v1943_v47 = vmul.f32 %v1772_v53, %v1772_v53 }
 0x32b   :  { %v5475_v62 = vpop.f32.mrf.mxu0 }
 0x32c   :  { %v6539_v27 = vpop.f32.mrf.mxu1  ;;  %5914 = vrcp.f32 %v1729_v50  ;;  %v1721_v50 = vadd.f32 0.0009, %v1719_v48 }
 0x32d   :  { %v1775_v22 = vpop.f32.mrf.mxu0 }
 0x32e   :  { %5532 = vmatmul.mubr.msk.bf16.vlgmr.msra.gmra.mxu0 %vm114_vm0, %v6519_v28  ;;  %v5514_v29 = vpop.f32.mrf.mxu1  ;;  %v6544_v7 = vmul.f32 %v6501_v59, %v1775_v22  ;;  %v1944_v25 = vmul.f32 %v1775_v22, %v1775_v22  ;;  %v741_v22 = vmul.f32 %v6328_v45, %v6328_v45 }
 0x32f   :  { %5536 = vmatpush3.bf16.msra.mxu0 %v2093_v61  ;;  %5537 = vmatprep.mubr.msk.bf16.mxu0 %vm6089_vm1, %v6088_v33  ;;  %v2096_v8 = vpack.c.bf16 %v5514_v29, %v5513_v56  ;;  %v5476_v49 = vpop.f32.mrf.mxu0 }
 0x330   :  { %5541 = vmatprep.subr.bf16.mxu0 %v6088_v33  ;;  %v2047_v11 = vpop.f32.mrf.mxu1 }
 0x331   :  { %5554 = vmatpush3.bf16.msra.mxu1 %v2096_v8  ;;  %v1854_v57 = vpop.f32.mrf.mxu0  ;;  %v2095_v62 = vpack.c.bf16 %v2047_v11, %v6539_v27  ;;  %v743_v27 = vmul.f32 %v741_v22, %v6328_v45 }
 0x332   :  { %v5517_v21 = vpop.f32.mrf.mxu1  ;;  %5565 = vmatprep.subr.bf16.mxu1 %v6088_v33  ;;  %v1955_v41 = vsub.f32 %v1854_v57, %v1943_v47 }
 0x333   :  { %v5487_v36 = vpop.f32.mrf.mxu0 }
 0x334   :  { %v6552_v37 = vpop.f32.mrf.mxu1  ;;  %5556 = vmatmul.mubr.msk.bf16.vlgmr.msra.gmra.mxu1 %vm114_vm0, %v6519_v28  ;;  %v1957_v42 = vadd.f32 %v1955_v41, %v6503_v26 }
 0x335   :  { %5567 = vmatprep.mubr.msk.bf16.mxu1 %vm6089_vm1, %v6088_v33  ;;  %v5913_v43 = vpop.eup %5912  ;;  %v1857_v54 = vpop.f32.mrf.mxu0 }
 0x336   :  { %5538 = vmatmul.mubr.msk.bf16.vlgmr.msra.gmra.mxu0 %vm114_vm0, %v6519_v28  ;;  %v5518_v13 = vpop.f32.mrf.mxu1  ;;  %v1959_v10 = vsub.f32 %v1957_v42, %v1945_v18  ;;  %v1956_v44 = vsub.f32 %v1857_v54, %v1944_v25  ;;  %v1731_v55 = vmul.f32 %v5913_v43, %v1720_v20 }
 0x337   :  { %5542 = vmatpush3.bf16.msra.mxu0 %v2094_v63  ;;  %5543 = vmatprep.mubr.msk.bf16.mxu0 %vm6089_vm1, %v6088_v33  ;;  %v5488_v26 = vpop.f32.mrf.mxu0  ;;  %v2098_v46 = vpack.c.bf16 %v5518_v13, %v5517_v21  ;;  %v5892_v13 = vld [vmem:[#allocation8 + $0x18] sm:$0xff]  }
 0x338   :  { %5547 = vmatprep.subr.bf16.mxu0 %v6088_v33  ;;  %v2063_v52 = vpop.f32.mrf.mxu1  ;;  %v1961_v51 = vadd.f32 0.0009, %v1959_v10  ;;  %v1958_v0 = vadd.f32 %v1956_v44, %v6505_v30  ;;  %v1734_v53 = vmul.f32 %v1731_v55, %v1731_v55  ;;  %v6622_v55 = vld [vmem:[#allocation2 + $0x20] sm:$0xff] }
 0x339   :  { %v5915_v56 = vpop.eup %5914  ;;  %v1936_v61 = vpop.f32.mrf.mxu0  ;;  %5566 = vmatpush3.bf16.msra.mxu1 %v2098_v46  ;;  %v2097_v60 = vpack.c.bf16 %v2063_v52, %v6552_v37  ;;  %v6626_v26 = vld [vmem:[#allocation5 + $0x20] sm:$0xff] }
 0x33a   :  { %v5521_v39 = vpop.f32.mrf.mxu1  ;;  %5916 = vrcp.f32 %v1961_v51  ;;  %v1960_v29 = vsub.f32 %v1958_v0, %v1946_v23  ;;  %v1736_v47 = vmul.f32 %v1734_v53, %v742_v14  ;;  %v1949_v8 = vsub.f32 %v1936_v61, %v6537_v58  ;;  %5577 = vmatprep.subr.bf16.mxu1 %v6088_v33  ;;  %v6680_v61 = vld [vmem:[#allocation5 + $0x50] sm:$0xff] }
 0x33b   :  { %v5499_v59 = vpop.f32.mrf.mxu0  ;;  %v1733_v30 = vmul.f32 %v5915_v56, %v1721_v50  ;;  %v2590_v14 = vmul.f32 %v6626_v26, %v6626_v26  ;;  %v2592_v51 = vmul.f32 %v6626_v26, %v6622_v55  ;;  %v6676_v56 = vld [vmem:[#allocation2 + $0x50] sm:$0xff]  ;;  %v6678_v50 = vld [vmem:[#allocation2 + $0x58] sm:$0xff] }
 0x33c   :  { %v2076_v49 = vpop.f32.mrf.mxu1  ;;  %v1962_v12 = vadd.f32 0.0009, %v1960_v29  ;;  %5568 = vmatmul.mubr.msk.bf16.vlgmr.msra.gmra.mxu1 %vm114_vm0, %v6519_v28  ;;  %v1951_v36 = vmul.f32 2.0, %v1949_v8 }
 0x33d   :  { %v1735_v11 = vmul.f32 %v1733_v30, %v1733_v30  ;;  %v1939_v57 = vpop.f32.mrf.mxu0  ;;  %5579 = vmatprep.mubr.msk.bf16.mxu1 %vm6089_vm1, %v6088_v33 }
 0x33e   :  { %5544 = vmatmul.mubr.msk.bf16.vlgmr.msra.gmra.mxu0 %vm114_vm0, %v6519_v28  ;;  %v5522_v21 = vpop.f32.mrf.mxu1  ;;  %5918 = vrcp.f32 %v1962_v12  ;;  %v1950_v58 = vsub.f32 %v1939_v57, %v6544_v7  ;;  %v1953_v7 = vadd.f32 0.0009, %v1951_v36 }
 0x33f   :  { %5548 = vmatpush3.bf16.msra.mxu0 %v2095_v62  ;;  %5549 = vmatprep.mubr.msk.bf16.mxu0 %vm6089_vm1, %v6088_v33  ;;  %v2100_v25 = vpack.c.bf16 %v5522_v21, %v5521_v39  ;;  %v1737_v41 = vmul.f32 %v1735_v11, %v743_v27  ;;  %v5500_v45 = vpop.f32.mrf.mxu0  ;;  %v6682_v62 = vld [vmem:[#allocation5 + $0x58] sm:$0xff] }
 0x340   :  { %5559 = vmatprep.subr.bf16.mxu0 %v6088_v33  ;;  %v1952_v18 = vmul.f32 2.0, %v1950_v58  ;;  %v2079_v63 = vpop.f32.mrf.mxu1  ;;  %v2603_v22 = vmul.f32 %v6682_v62, %v6682_v62  ;;  %v2605_v8 = vmul.f32 %v6682_v62, %v6678_v50 }
 0x341   :  { %5578 = vmatpush3.bf16.msra.mxu1 %v2100_v25  ;;  %v2099_v48 = vpack.c.bf16 %v2079_v63, %v2076_v49 }
 0x342   :  { %5625 = vmatprep.subr.bf16.mxu1 %v6088_v33  ;;  %v1954_v43 = vadd.f32 0.0009, %v1952_v18 }
 0x344   :  { %5580 = vmatmul.mubr.msk.bf16.vlgmr.msra.gmra.mxu1 %vm114_vm0, %v6519_v28 }
 0x345   :  { %5627 = vmatprep.mubr.msk.bf16.mxu1 %vm6089_vm1, %v6088_v33 }
 0x346   :  { %5550 = vmatmul.mubr.msk.bf16.vlgmr.msra.gmra.mxu0 %vm114_vm0, %v6519_v28 }
 0x347   :  { %5560 = vmatpush3.bf16.msra.mxu0 %v2097_v60  ;;  %5561 = vmatprep.mubr.msk.bf16.mxu0 %vm6089_vm1, %v6088_v33  ;;  %v5917_v20 = vpop.eup %5916 }
 0x348   :  { %5571 = vmatprep.subr.bf16.mxu0 %v6088_v33  ;;  %v1964_v37 = vmul.f32 %v5917_v20, %v1953_v7 }
 0x34a   :  { %v6601_v42 = vmul.f32 %v1964_v37, %v1736_v47  ;;  %v2604_v47 = vmul.f32 %v6680_v61, %v6676_v56 }
 0x34b   :  { %v5919_v54 = vpop.eup %5918 }
 0x34c   :  { %v1966_v10 = vmul.f32 %v5919_v54, %v1954_v43  ;;  %v6716_v59 = vpack.c.bf16 %v2605_v8, %v2604_v47 }
 0x34e   :  { %5562 = vmatmul.mubr.msk.bf16.vlgmr.msra.gmra.mxu0 %vm114_vm0, %v6519_v28  ;;  %v6605_v44 = vmul.f32 %v1966_v10, %v1737_v41 }
 0x34f   :  { %5572 = vmatpush3.bf16.msra.mxu0 %v2099_v48  ;;  %5573 = vmatprep.mubr.msk.bf16.mxu0 %vm6089_vm1, %v6088_v33 }
 0x350   :  { %5583 = vmatprep.subr.bf16.mxu0 %v5892_v13 }
 0x356   :  { %5574 = vmatmul.mubr.msk.bf16.vlgmr.msra.gmra.mxu0 %vm114_vm0, %v6519_v28  ;;  %v6624_v28 = vld [vmem:[#allocation2 + $0x28] sm:$0xff] }
 0x357   :  { %5584 = vmatpush3.bf16.msra.mxu0 %v5892_v13  ;;  %5585 = vmatprep.mubr.msk.bf16.mxu0 %vm114_vm0, %v6262_v15  ;;  %v6628_v15 = vld [vmem:[#allocation5 + $0x28] sm:$0xff] }
 0x358   :  { %5685 = vmatprep.subr.bf16.mxu0 %v6088_v33  ;;  %v2591_v46 = vmul.f32 %v6628_v15, %v6628_v15  ;;  %v2593_v0 = vmul.f32 %v6628_v15, %v6624_v28 }
 0x35a   :  { %v6652_v23 = vpack.c.bf16 %v2591_v46, %v2590_v14  ;;  %v6662_v53 = vpack.c.bf16 %v2593_v0, %v2592_v51 }
 0x35e   :  { %5586 = vmatmul.mubr.msk.bf16.vlgmr.msra.gmra.mxu0 %vm114_vm0, %v6264_v5  ;;  %v6632_v5 = vpack.c.bf16 %v6624_v28, %v6622_v55 }
 0x35f   :  { %5589 = vmatprep.mubr.msk.bf16.mxu0 %vm114_vm0, %v6270_v19  ;;  %v6636_v19 = vpack.c.bf16 %v6628_v15, %v6626_v26 }
 0x366   :  { %5590 = vmatmul.mubr.msk.bf16.gmra.mxu0 %vm114_vm0, %v6272_v17  ;;  %v2588_v17 = vmul.f32 %v6622_v55, %v6622_v55 }
 0x367   :  { %5593 = vmatprep.mubr.msk.bf16.mxu0 %vm114_vm0, %v6278_v24  ;;  %v2589_v24 = vmul.f32 %v6624_v28, %v6624_v28 }
 0x369   :  { %v6650_v52 = vpack.c.bf16 %v2589_v24, %v2588_v17 }
 0x36e   :  { %5594 = vmatmul.mubr.msk.bf16.gmra.mxu0 %vm114_vm0, %v6632_v5 }
 0x36f   :  { %5597 = vmatprep.mubr.msk.bf16.mxu0 %vm114_vm0, %v6636_v19 }
 0x376   :  { %5598 = vmatmul.mubr.msk.bf16.gmra.mxu0 %vm114_vm0, %v6650_v52 }
 0x377   :  { %5601 = vmatprep.mubr.msk.bf16.mxu0 %vm114_vm0, %v6652_v23 }
 0x37e   :  { %5602 = vmatmul.mubr.msk.bf16.gmra.mxu0 %vm114_vm0, %v6662_v53 }
 0x37f   :  { %5605 = vmatprep.mubr.msk.bf16.mxu0 %vm114_vm0, %v6292_v31  ;;  %v6686_v31 = vpack.c.bf16 %v6678_v50, %v6676_v56 }
 0x386   :  { %5606 = vmatmul.mubr.msk.bf16.gmra.mxu0 %vm114_vm0, %v6294_v34  ;;  %v6690_v34 = vpack.c.bf16 %v6682_v62, %v6680_v61 }
 0x387   :  { %5609 = vmatprep.mubr.msk.bf16.mxu0 %vm114_vm0, %v6300_v35  ;;  %v2600_v35 = vmul.f32 %v6676_v56, %v6676_v56 }
 0x38e   :  { %5610 = vmatmul.mubr.msk.bf16.gmra.mxu0 %vm114_vm0, %v6302_v32  ;;  %v2601_v32 = vmul.f32 %v6678_v50, %v6678_v50 }
 0x38f   :  { %5613 = vmatprep.mubr.msk.bf16.mxu0 %vm114_vm0, %v6308_v38  ;;  %v2602_v38 = vmul.f32 %v6680_v61, %v6680_v61 }
 0x390   :  { %v6704_v39 = vpack.c.bf16 %v2601_v32, %v2600_v35 }
 0x391   :  { %v6706_v29 = vpack.c.bf16 %v2603_v22, %v2602_v38 }
 0x396   :  { %5614 = vmatmul.mubr.msk.bf16.gmra.mxu0 %vm114_vm0, %v6686_v31 }
 0x397   :  { %5617 = vmatprep.mubr.msk.bf16.mxu0 %vm114_vm0, %v6690_v34 }
 0x39e   :  { %5618 = vmatmul.mubr.msk.bf16.gmra.mxu0 %vm114_vm0, %v6704_v39 }
 0x39f   :  { %5621 = vmatprep.mubr.msk.bf16.mxu0 %vm114_vm0, %v6706_v29 }
 0x3a6   :  { %5622 = vmatmul.mubr.msk.bf16.gmra.mxu0 %vm114_vm0, %v6716_v59 }
 0x3a7   :  { %5687 = vmatprep.mubr.msk.bf16.mxu0 %vm6089_vm1, %v6088_v33 }
 0x3e6   :  { %v2146_v30 = vpop.f32.mrf.mxu0 }
 0x3e7   :  { %v2317_v36 = vmul.f32 %v2146_v30, %v2146_v30 }
 0x3e8   :  { %v5527_v49 = vpop.f32.mrf.mxu0 }
 0x3ea   :  { %v2149_v12 = vpop.f32.mrf.mxu0 }
 0x3eb   :  { %v2318_v37 = vmul.f32 %v2149_v12, %v2149_v12 }
 0x3ec   :  { %v5528_v27 = vpop.f32.mrf.mxu0 }
 0x3ee   :  { %v2187_v11 = vpop.f32.mrf.mxu0 }
 0x3ef   :  { %v2321_v57 = vmul.f32 %v2187_v11, %v2146_v30  ;;  %v2319_v51 = vmul.f32 %v2187_v11, %v2187_v11 }
 0x3f0   :  { %v5533_v21 = vpop.f32.mrf.mxu0 }
 0x3f2   :  { %v2190_v58 = vpop.f32.mrf.mxu0 }
 0x3f3   :  { %v2322_v25 = vmul.f32 %v2190_v58, %v2149_v12  ;;  %v2320_v30 = vmul.f32 %v2190_v58, %v2190_v58 }
 0x3f4   :  { %v5534_v41 = vpop.f32.mrf.mxu0  ;;  %v2381_v45 = vpop.f32.mrf.mxu1 }
 0x3f5   :  { %v2552_v48 = vmul.f32 %v2381_v45, %v2381_v45 }
 0x3f6   :  { %v2228_v60 = vpop.f32.mrf.mxu0  ;;  %v5557_v7 = vpop.f32.mrf.mxu1 }
 0x3f7   :  { %v2329_v18 = vsub.f32 %v2228_v60, %v2317_v36 }
 0x3f8   :  { %v5539_v20 = vpop.f32.mrf.mxu0  ;;  %v2384_v63 = vpop.f32.mrf.mxu1 }
 0x3f9   :  { %v2553_v14 = vmul.f32 %v2384_v63, %v2384_v63 }
 0x3fa   :  { %v2231_v43 = vpop.f32.mrf.mxu0  ;;  %v5558_v54 = vpop.f32.mrf.mxu1 }
 0x3fb   :  { %v2330_v13 = vsub.f32 %v2231_v43, %v2318_v37 }
 0x3fc   :  { %v5540_v10 = vpop.f32.mrf.mxu0  ;;  %v2463_v17 = vpop.f32.mrf.mxu1 }
 0x3fd   :  { %v2564_v46 = vsub.f32 %v2463_v17, %v2552_v48 }
 0x3fe   :  { %v2269_v24 = vpop.f32.mrf.mxu0  ;;  %v5569_v35 = vpop.f32.mrf.mxu1 }
 0x3ff   :  { %v2331_v0 = vadd.f32 %v2329_v18, %v2269_v24 }
 0x400   :  { %v5545_v32 = vpop.f32.mrf.mxu0  ;;  %v2466_v22 = vpop.f32.mrf.mxu1 }
 0x401   :  { %v2333_v38 = vsub.f32 %v2331_v0, %v2319_v51  ;;  %v2565_v8 = vsub.f32 %v2466_v22, %v2553_v14 }
 0x402   :  { %v2272_v47 = vpop.f32.mrf.mxu0  ;;  %v5570_v27 = vpop.f32.mrf.mxu1 }
 0x403   :  { %v2335_v49 = vadd.f32 0.0009, %v2333_v38  ;;  %v2332_v12 = vadd.f32 %v2330_v13, %v2272_v47 }
 0x404   :  { %v5546_v21 = vpop.f32.mrf.mxu0  ;;  %v2545_v36 = vpop.f32.mrf.mxu1 }
 0x405   :  { %5920 = vrcp.f32 %v2335_v49  ;;  %v2334_v41 = vsub.f32 %v2332_v12, %v2320_v30 }
 0x406   :  { %v2310_v60 = vpop.f32.mrf.mxu0  ;;  %v5581_v37 = vpop.f32.mrf.mxu1 }
 0x407   :  { %v2336_v7 = vadd.f32 0.0009, %v2334_v41  ;;  %v2323_v20 = vsub.f32 %v2310_v60, %v2321_v57 }
 0x408   :  { %v5551_v11 = vpop.f32.mrf.mxu0  ;;  %v2548_v18 = vpop.f32.mrf.mxu1 }
 0x409   :  { %5922 = vrcp.f32 %v2336_v7  ;;  %v2325_v17 = vmul.f32 2.0, %v2323_v20  ;;  %v6733_v11 = vand.u32 2147483647, %v3808_v9 }
 0x40a   :  { %v2313_v43 = vpop.f32.mrf.mxu0  ;;  %v5582_v54 = vpop.f32.mrf.mxu1 }
 0x40b   :  { %v2324_v48 = vsub.f32 %v2313_v43, %v2322_v25  ;;  %v2327_v14 = vadd.f32 0.0009, %v2325_v17 }
 0x40c   :  { %v5552_v10 = vpop.f32.mrf.mxu0 }
 0x40d   :  { %v2326_v51 = vmul.f32 2.0, %v2324_v48 }
 0x40e   :  { %v2422_v58 = vpop.f32.mrf.mxu0 }
 0x40f   :  { %v2556_v24 = vmul.f32 %v2422_v58, %v2381_v45  ;;  %v2328_v30 = vadd.f32 0.0009, %v2326_v51  ;;  %v2554_v41 = vmul.f32 %v2422_v58, %v2422_v58 }
 0x410   :  { %v5563_v13 = vpop.f32.mrf.mxu0 }
 0x411   :  { %v2558_v0 = vsub.f32 %v2545_v36, %v2556_v24  ;;  %v6740_v13 = vld [vmem:[#allocation7 + $0x18] sm:$0xff]  }
 0x412   :  { %v5921_v35 = vpop.eup %5920  ;;  %v2425_v32 = vpop.f32.mrf.mxu0 }
 0x413   :  { %v2338_v38 = vmul.f32 %v5921_v35, %v2327_v14  ;;  %v2557_v22 = vmul.f32 %v2425_v32, %v2384_v63  ;;  %v6728_v63 = vand.u32 2147483647, %v3807_v6  ;;  %v2555_v43 = vmul.f32 %v2425_v32, %v2425_v32 }
 0x414   :  { %v5564_v57 = vpop.f32.mrf.mxu0  ;;  %v2560_v58 = vmul.f32 2.0, %v2558_v0 }
 0x415   :  { %v2341_v47 = vmul.f32 %v2338_v38, %v2338_v38  ;;  %v2559_v49 = vsub.f32 %v2548_v18, %v2557_v22 }
 0x416   :  { %v5923_v12 = vpop.eup %5922  ;;  %v2504_v27 = vpop.f32.mrf.mxu0 }
 0x417   :  { %v2343_v25 = vmul.f32 %v2341_v47, %v2338_v38  ;;  %v2340_v21 = vmul.f32 %v5923_v12, %v2328_v30  ;;  %v2566_v60 = vadd.f32 %v2564_v46, %v2504_v27  ;;  %v2561_v14 = vmul.f32 2.0, %v2559_v49 }
 0x418   :  { %v5575_v7 = vpop.f32.mrf.mxu0 }
 0x419   :  { %v2342_v45 = vmul.f32 %v2340_v21, %v2340_v21  ;;  %v2568_v20 = vsub.f32 %v2566_v60, %v2554_v41  ;;  %v6723_v37 = vmul.f32 %v2343_v25, %v6513_v16  ;;  %v3831_v16 = vpack.c.bf16 %v6733_v11, %v6728_v63  ;;  %v5971_v63 = vld [vmem:[#allocation5 + $0x48] sm:$0xff] }
 0x41a   :  { %v2507_v36 = vpop.f32.mrf.mxu0  ;;  %v2563_v22 = vadd.f32 0.0009, %v2561_v14 }
 0x41b   :  { %v2344_v18 = vmul.f32 %v2342_v45, %v2340_v21  ;;  %v2570_v46 = vadd.f32 0.0009, %v2568_v20  ;;  %v2567_v48 = vadd.f32 %v2565_v8, %v2507_v36 }
 0x41c   :  { %v5576_v54 = vpop.f32.mrf.mxu0 }
 0x41d   :  { %5924 = vrcp.f32 %v2570_v46  ;;  %v2569_v10 = vsub.f32 %v2567_v48, %v2555_v43  ;;  %v6738_v17 = vmul.f32 %v2344_v18, %v6526_v40  ;;  %v2562_v40 = vadd.f32 0.0009, %v2560_v58 }
 0x41e   :  { %v5587_v1 = vpop.f32.mrf.mxu0 }
 0x41f   :  { %v2571_v3 = vadd.f32 0.0009, %v2569_v10 }
 0x420   :  { %v2689_v6 = vpop.f32.mrf.mxu0 }
 0x421   :  { %5926 = vrcp.f32 %v2571_v3 }
 0x422   :  { %v5588_v2 = vpop.f32.mrf.mxu0 }
 0x423   :  { %v2849_v51 = vpack.c.bf16 %v5588_v2, %v5587_v1 }
 0x424   :  { %v2692_v4 = vpop.f32.mrf.mxu0 }
 0x425   :  { %v2848_v9 = vpack.c.bf16 %v2692_v4, %v2689_v6 }
 0x426   :  { %v5591_v24 = vpop.f32.mrf.mxu0 }
 0x427   :  { %5626 = vmatpush3.bf16.msra.mxu1 %v2848_v9 }
 0x428   :  { %v2705_v8 = vpop.f32.mrf.mxu0  ;;  %5631 = vmatprep.subr.bf16.mxu1 %v6088_v33 }
 0x42a   :  { %v5925_v35 = vpop.eup %5924  ;;  %v5592_v32 = vpop.f32.mrf.mxu0  ;;  %5628 = vmatmul.mubr.msk.bf16.vlgmr.msra.gmra.mxu1 %vm114_vm0, %v6740_v13 }
 0x42b   :  { %5632 = vmatpush3.bf16.msra.mxu1 %v2849_v51  ;;  %5633 = vmatprep.mubr.msk.bf16.mxu1 %vm6089_vm1, %v6088_v33  ;;  %v2573_v38 = vmul.f32 %v5925_v35, %v2562_v40  ;;  %v2851_v43 = vpack.c.bf16 %v5592_v32, %v5591_v24 }
 0x42c   :  { %v2708_v0 = vpop.f32.mrf.mxu0  ;;  %5637 = vmatprep.subr.bf16.mxu1 %v6088_v33 }
 0x42d   :  { %v2576_v30 = vmul.f32 %v2573_v38, %v2573_v38  ;;  %v2850_v25 = vpack.c.bf16 %v2708_v0, %v2705_v8 }
 0x42e   :  { %v5927_v57 = vpop.eup %5926  ;;  %v5595_v47 = vpop.f32.mrf.mxu0 }
 0x42f   :  { %v2575_v49 = vmul.f32 %v5927_v57, %v2563_v22  ;;  %v2578_v27 = vmul.f32 %v2576_v30, %v2573_v38 }
 0x430   :  { %v2721_v12 = vpop.f32.mrf.mxu0 }
 0x431   :  { %v2577_v21 = vmul.f32 %v2575_v49, %v2575_v49  ;;  %v6751_v60 = vmul.f32 %v2578_v27, %v6601_v42 }
 0x432   :  { %v5596_v41 = vpop.f32.mrf.mxu0  ;;  %5634 = vmatmul.mubr.msk.bf16.vlgmr.msra.gmra.mxu1 %vm114_vm0, %v6740_v13 }
 0x433   :  { %5638 = vmatpush3.bf16.msra.mxu1 %v2850_v25  ;;  %5639 = vmatprep.mubr.msk.bf16.mxu1 %vm6089_vm1, %v6088_v33  ;;  %v2579_v7 = vmul.f32 %v2577_v21, %v2575_v49  ;;  %v2853_v2 = vpack.c.bf16 %v5596_v41, %v5595_v47 }
 0x434   :  { %v2724_v45 = vpop.f32.mrf.mxu0  ;;  %5643 = vmatprep.subr.bf16.mxu1 %v6088_v33 }
 0x435   :  { %v6757_v20 = vmul.f32 %v2579_v7, %v6605_v44  ;;  %v2852_v10 = vpack.c.bf16 %v2724_v45, %v2721_v12 }
 0x436   :  { %v5599_v36 = vpop.f32.mrf.mxu0 }
 0x438   :  { %v2737_v18 = vpop.f32.mrf.mxu0 }
 0x43a   :  { %v5600_v46 = vpop.f32.mrf.mxu0  ;;  %5640 = vmatmul.mubr.msk.bf16.vlgmr.msra.gmra.mxu1 %vm114_vm0, %v6740_v13 }
 0x43b   :  { %5644 = vmatpush3.bf16.msra.mxu1 %v2851_v43  ;;  %5645 = vmatprep.mubr.msk.bf16.mxu1 %vm6089_vm1, %v6088_v33  ;;  %v2855_v38 = vpack.c.bf16 %v5600_v46, %v5599_v36  ;;  %v5894_v43 = vld [vmem:[#allocation8 + $0x20] sm:$0xff]  }
 0x43c   :  { %v2740_v42 = vpop.f32.mrf.mxu0  ;;  %5649 = vmatprep.subr.bf16.mxu1 %v6088_v33 }
 0x43d   :  { %v2854_v14 = vpack.c.bf16 %v2740_v42, %v2737_v18 }
 0x43e   :  { %v6764_v48 = vpop.f32.mrf.mxu0 }
 0x440   :  { %v2753_v54 = vpop.f32.mrf.mxu0 }
 0x442   :  { %v6766_v44 = vpop.f32.mrf.mxu0  ;;  %5646 = vmatmul.mubr.msk.bf16.vlgmr.msra.gmra.mxu1 %vm114_vm0, %v6740_v13 }
 0x443   :  { %5650 = vmatpush3.bf16.msra.mxu1 %v2852_v10  ;;  %5651 = vmatprep.mubr.msk.bf16.mxu1 %vm6089_vm1, %v6088_v33  ;;  %v2857_v45 = vpack.c.bf16 %v6766_v44, %v6764_v48  ;;  %v3815_v44 = vsub.f32 %v6622_v55, %v6626_v26  ;;  %v5965_v26 = vld [vmem:[#allocation5 + $0x30] sm:$0xff] }
 0x444   :  { %v2756_v1 = vpop.f32.mrf.mxu0  ;;  %5655 = vmatprep.subr.bf16.mxu1 %v6088_v33 }
 0x445   :  { %v2856_v12 = vpack.c.bf16 %v2756_v1, %v2753_v54  ;;  %v5963_v54 = vld [vmem:[#allocation5 + $0x18] sm:$0xff] }
 0x446   :  { %v6773_v3 = vpop.f32.mrf.mxu0 }
 0x448   :  { %v2769_v6 = vpop.f32.mrf.mxu0 }
 0x44a   :  { %v6775_v4 = vpop.f32.mrf.mxu0  ;;  %5652 = vmatmul.mubr.msk.bf16.vlgmr.msra.gmra.mxu1 %vm114_vm0, %v6740_v13 }
 0x44b   :  { %5656 = vmatpush3.bf16.msra.mxu1 %v2853_v2  ;;  %5657 = vmatprep.mubr.msk.bf16.mxu1 %vm6089_vm1, %v6088_v33  ;;  %v2859_v42 = vpack.c.bf16 %v6775_v4, %v6773_v3  ;;  %v3817_v3 = vand.u32 2147483647, %v3815_v44  ;;  %v5967_v2 = vld [vmem:[#allocation5 + $0x38] sm:$0xff] }
 0x44c   :  { %v2772_v9 = vpop.f32.mrf.mxu0  ;;  %5661 = vmatprep.subr.bf16.mxu1 %v6088_v33 }
 0x44d   :  { %v2858_v58 = vpack.c.bf16 %v2772_v9, %v2769_v6  ;;  %v5968_v9 = vld [vmem:[#allocation2 + $0x40] sm:$0xff] }
 0x44e   :  { %v6782_v24 = vpop.f32.mrf.mxu0 }
 0x44f   :  { %5686 = vmatpush3.bf16.msra.mxu0 %v2858_v58  ;;  %v5969_v58 = vld [vmem:[#allocation5 + $0x40] sm:$0xff] }
 0x450   :  { %v2785_v8 = vpop.f32.mrf.mxu0  ;;  %5697 = vmatprep.subr.bf16.mxu0 %v6088_v33 }
 0x452   :  { %v6785_v51 = vpop.f32.mrf.mxu0  ;;  %5658 = vmatmul.mubr.msk.bf16.vlgmr.msra.gmra.mxu1 %vm114_vm0, %v6740_v13  ;;  %5688 = vmatmul.mubr.msk.bf16.vlgmr.msra.gmra.mxu0 %vm114_vm0, %v6740_v13 }
 0x453   :  { %5662 = vmatpush3.bf16.msra.mxu1 %v2854_v14  ;;  %5663 = vmatprep.mubr.msk.bf16.mxu1 %vm6089_vm1, %v6088_v33  ;;  %v2861_v48 = vpack.c.bf16 %v6785_v51, %v6782_v24  ;;  %v3823_v24 = vsub.f32 %v5968_v9, %v5969_v58 }
 0x454   :  { %v2788_v35 = vpop.f32.mrf.mxu0  ;;  %5667 = vmatprep.subr.bf16.mxu1 %v6088_v33  ;;  %5699 = vmatprep.mubr.msk.bf16.mxu0 %vm6089_vm1, %v6088_v33 }
 0x455   :  { %v2860_v40 = vpack.c.bf16 %v2788_v35, %v2785_v8  ;;  %v5970_v8 = vld [vmem:[#allocation2 + $0x48] sm:$0xff]  ;;  %v3825_v51 = vand.u32 2147483647, %v3823_v24 }
 0x456   :  { %v6796_v32 = vpop.f32.mrf.mxu0  ;;  %v3824_v11 = vsub.f32 %v5970_v8, %v5971_v63 }
 0x457   :  { %5698 = vmatpush3.bf16.msra.mxu0 %v2860_v40 }
 0x458   :  { %v2801_v0 = vpop.f32.mrf.mxu0  ;;  %5709 = vmatprep.subr.bf16.mxu0 %v6088_v33  ;;  %v3826_v35 = vand.u32 2147483647, %v3824_v11 }
 0x45a   :  { %v5616_v22 = vpop.f32.mrf.mxu0  ;;  %5664 = vmatmul.mubr.msk.bf16.vlgmr.msra.gmra.mxu1 %vm114_vm0, %v6740_v13  ;;  %5700 = vmatmul.mubr.msk.bf16.vlgmr.msra.gmra.mxu0 %vm114_vm0, %v6740_v13 }
 0x45b   :  { %5668 = vmatpush3.bf16.msra.mxu1 %v2855_v38  ;;  %5669 = vmatprep.mubr.msk.bf16.mxu1 %vm6089_vm1, %v6088_v33  ;;  %v3835_v38 = vpack.c.bf16 %v3826_v35, %v3825_v51 }
 0x45c   :  { %v2804_v57 = vpop.f32.mrf.mxu0  ;;  %5673 = vmatprep.subr.bf16.mxu1 %v6088_v33  ;;  %5711 = vmatprep.mubr.msk.bf16.mxu0 %vm6089_vm1, %v6088_v33 }
 0x45d   :  { %v2862_v47 = vpack.c.bf16 %v2804_v57, %v2801_v0  ;;  %v3828_v0 = vsub.f32 %v6678_v50, %v6682_v62 }
 0x45e   :  { %v5619_v30 = vpop.f32.mrf.mxu0 }
 0x45f   :  { %5710 = vmatpush3.bf16.msra.mxu0 %v2862_v47  ;;  %v3830_v57 = vand.u32 2147483647, %v3828_v0 }
 0x460   :  { %v2817_v49 = vpop.f32.mrf.mxu0  ;;  %5721 = vmatprep.subr.bf16.mxu0 %v6088_v33 }
 0x462   :  { %v5620_v27 = vpop.f32.mrf.mxu0  ;;  %5670 = vmatmul.mubr.msk.bf16.vlgmr.msra.gmra.mxu1 %vm114_vm0, %v6740_v13  ;;  %5712 = vmatmul.mubr.msk.bf16.vlgmr.msra.gmra.mxu0 %vm114_vm0, %v6740_v13 }
 0x463   :  { %5674 = vmatpush3.bf16.msra.mxu1 %v2856_v12  ;;  %5675 = vmatprep.mubr.msk.bf16.mxu1 %vm6089_vm1, %v6088_v33 }
 0x464   :  { %v2820_v25 = vpop.f32.mrf.mxu0  ;;  %5679 = vmatprep.subr.bf16.mxu1 %v6088_v33  ;;  %5723 = vmatprep.mubr.msk.bf16.mxu0 %vm6089_vm1, %v6088_v33 }
 0x465   :  { %v2864_v21 = vpack.c.bf16 %v2820_v25, %v2817_v49 }
 0x466   :  { %v5623_v41 = vpop.f32.mrf.mxu0 }
 0x467   :  { %5722 = vmatpush3.bf16.msra.mxu0 %v2864_v21 }
 0x468   :  { %v2833_v7 = vpop.f32.mrf.mxu0  ;;  %5733 = vmatprep.subr.bf16.mxu0 %v6088_v33 }
 0x46a   :  { %v5624_v36 = vpop.f32.mrf.mxu0  ;;  %5676 = vmatmul.mubr.msk.bf16.vlgmr.msra.gmra.mxu1 %vm114_vm0, %v6740_v13  ;;  %5724 = vmatmul.mubr.msk.bf16.vlgmr.msra.gmra.mxu0 %vm114_vm0, %v6740_v13 }
 0x46b   :  { %5680 = vmatpush3.bf16.msra.mxu1 %v2857_v45  ;;  %5681 = vmatprep.mubr.msk.bf16.mxu1 %vm6089_vm1, %v6088_v33 }
 0x46c   :  { %v2836_v18 = vpop.f32.mrf.mxu0  ;;  %5691 = vmatprep.subr.bf16.mxu1 %v6088_v33  ;;  %5735 = vmatprep.mubr.msk.bf16.mxu0 %vm6089_vm1, %v6088_v33 }
 0x46d   :  { %v2866_v46 = vpack.c.bf16 %v2836_v18, %v2833_v7 }
 0x46f   :  { %5734 = vmatpush3.bf16.msra.mxu0 %v2866_v46 }
 0x470   :  { %5745 = vmatprep.subr.bf16.mxu0 %v5894_v43 }
 0x472   :  { %5682 = vmatmul.mubr.msk.bf16.vlgmr.msra.gmra.mxu1 %vm114_vm0, %v6740_v13  ;;  %5736 = vmatmul.mubr.msk.bf16.vlgmr.msra.gmra.mxu0 %vm114_vm0, %v6740_v13 }
 0x473   :  { %5692 = vmatpush3.bf16.msra.mxu1 %v2859_v42  ;;  %5746 = vmatpush3.bf16.msra.mxu0 %v5894_v43 }
 0x474   :  { %5693 = vmatprep.mubr.msk.bf16.mxu1 %vm6089_vm1, %v6088_v33  ;;  %5747 = vmatprep.mubr.msk.bf16.mxu0 %vm114_vm0, %v6632_v5  ;;  %v2863_v5 = vpack.c.bf16 %v5616_v22, %v6796_v32  ;;  %v3827_v32 = vsub.f32 %v6676_v56, %v6680_v61 }
 0x475   :  { %5703 = vmatprep.subr.bf16.mxu1 %v6088_v33  ;;  %5827 = vmatprep.subr.bf16.mxu0 %v6088_v33 }
 0x476   :  { %v3829_v22 = vand.u32 2147483647, %v3827_v32 }
 0x478   :  { %v3836_v47 = vpack.c.bf16 %v3830_v57, %v3829_v22 }
 0x47a   :  { %5694 = vmatmul.mubr.msk.bf16.vlgmr.msra.gmra.mxu1 %vm114_vm0, %v6740_v13  ;;  %5748 = vmatmul.mubr.msk.bf16.vlgmr.msra.gmra.mxu0 %vm114_vm0, %v6636_v19  ;;  %v2865_v19 = vpack.c.bf16 %v5620_v27, %v5619_v30 }
 0x47b   :  { %5704 = vmatpush3.bf16.msra.mxu1 %v2861_v48  ;;  %5705 = vmatprep.mubr.msk.bf16.mxu1 %vm6089_vm1, %v6088_v33 }
 0x47c   :  { %5715 = vmatprep.subr.bf16.mxu1 %v6088_v33  ;;  %5751 = vmatprep.mubr.msk.bf16.mxu0 %vm114_vm0, %v6650_v52  ;;  %v2867_v52 = vpack.c.bf16 %v5624_v36, %v5623_v41 }
 0x482   :  { %5706 = vmatmul.mubr.msk.bf16.vlgmr.msra.gmra.mxu1 %vm114_vm0, %v6740_v13  ;;  %5752 = vmatmul.mubr.msk.bf16.gmra.mxu0 %vm114_vm0, %v6652_v23  ;;  %v5960_v23 = vld [vmem:[#allocation2 + $0x10] sm:$0xff] }
 0x483   :  { %5716 = vmatpush3.bf16.msra.mxu1 %v2863_v5  ;;  %5717 = vmatprep.mubr.msk.bf16.mxu1 %vm6089_vm1, %v6088_v33 }
 0x484   :  { %5727 = vmatprep.subr.bf16.mxu1 %v6088_v33  ;;  %5755 = vmatprep.mubr.msk.bf16.mxu0 %vm114_vm0, %v6662_v53  ;;  %v5961_v53 = vld [vmem:[#allocation5 + $0x10] sm:$0xff] }
 0x48a   :  { %5718 = vmatmul.mubr.msk.bf16.vlgmr.msra.gmra.mxu1 %vm114_vm0, %v6740_v13  ;;  %5756 = vmatmul.mubr.msk.bf16.gmra.mxu0 %vm114_vm0, %v6686_v31  ;;  %v3811_v31 = vsub.f32 %v5960_v23, %v5961_v53 }
 0x48b   :  { %5728 = vmatpush3.bf16.msra.mxu1 %v2865_v19  ;;  %5729 = vmatprep.mubr.msk.bf16.mxu1 %vm6089_vm1, %v6088_v33 }
 0x48c   :  { %5739 = vmatprep.subr.bf16.mxu1 %v6088_v33  ;;  %5759 = vmatprep.mubr.msk.bf16.mxu0 %vm114_vm0, %v6690_v34  ;;  %v5962_v34 = vld [vmem:[#allocation2 + $0x18] sm:$0xff] }
 0x48d   :  { %v3812_v10 = vsub.f32 %v5962_v34, %v5963_v54 }
 0x48f   :  { %v3814_v1 = vand.u32 2147483647, %v3812_v10 }
 0x492   :  { %5730 = vmatmul.mubr.msk.bf16.vlgmr.msra.gmra.mxu1 %vm114_vm0, %v6740_v13  ;;  %5760 = vmatmul.mubr.msk.bf16.gmra.mxu0 %vm114_vm0, %v6704_v39  ;;  %v3816_v39 = vsub.f32 %v6624_v28, %v6628_v15  ;;  %v5964_v28 = vld [vmem:[#allocation2 + $0x30] sm:$0xff] }
 0x493   :  { %5740 = vmatpush3.bf16.msra.mxu1 %v2867_v52  ;;  %5741 = vmatprep.mubr.msk.bf16.mxu1 %vm6089_vm1, %v6088_v33  ;;  %v3819_v15 = vsub.f32 %v5964_v28, %v5965_v26 }
 0x494   :  { %5763 = vmatprep.mubr.msk.bf16.mxu0 %vm114_vm0, %v6706_v29  ;;  %5779 = vmatprep.subr.bf16.mxu1 %v6088_v33  ;;  %v3813_v29 = vand.u32 2147483647, %v3811_v31  ;;  %v3818_v6 = vand.u32 2147483647, %v3816_v39 }
 0x496   :  { %v3832_v55 = vpack.c.bf16 %v3814_v1, %v3813_v29 }
 0x49a   :  { %5742 = vmatmul.mubr.msk.bf16.vlgmr.msra.gmra.mxu1 %vm114_vm0, %v6740_v13  ;;  %5764 = vmatmul.mubr.msk.bf16.gmra.mxu0 %vm114_vm0, %v6716_v59  ;;  %v5966_v13 = vld [vmem:[#allocation2 + $0x38] sm:$0xff]  ;;  %v3833_v59 = vpack.c.bf16 %v3818_v6, %v3817_v3 }
 0x49b   :  { %5767 = vmatprep.mubr.msk.bf16.mxu0 %vm114_vm0, %v3831_v16  ;;  %5781 = vmatprep.mubr.msk.bf16.mxu1 %vm6089_vm1, %v6088_v33  ;;  %v3820_v4 = vsub.f32 %v5966_v13, %v5967_v2  ;;  %v3821_v16 = vand.u32 2147483647, %v3819_v15 }
 0x49d   :  { %v3822_v14 = vand.u32 2147483647, %v3820_v4 }
 0x49f   :  { %v3834_v40 = vpack.c.bf16 %v3822_v14, %v3821_v16 }
 0x4a2   :  { %5768 = vmatmul.mubr.msk.bf16.gmra.mxu0 %vm114_vm0, %v3832_v55 }
 0x4a3   :  { %5771 = vmatprep.mubr.msk.bf16.mxu0 %vm114_vm0, %v3833_v59 }
 0x4aa   :  { %5772 = vmatmul.mubr.msk.bf16.gmra.mxu0 %vm114_vm0, %v3834_v40 }
 0x4ab   :  { %5775 = vmatprep.mubr.msk.bf16.mxu0 %vm114_vm0, %v3835_v38 }
 0x4b2   :  { %5776 = vmatmul.mubr.msk.bf16.gmra.mxu0 %vm114_vm0, %v3836_v47 }
 0x4b3   :  { %5829 = vmatprep.mubr.msk.bf16.mxu0 %vm6089_vm1, %v6088_v33 }
 0x4ea   :  { %v2913_v30 = vpop.f32.mrf.mxu1 }
 0x4eb   :  { %v3084_v25 = vmul.f32 %v2913_v30, %v2913_v30 }
 0x4ec   :  { %v5629_v49 = vpop.f32.mrf.mxu1 }
 0x4ee   :  { %v2916_v12 = vpop.f32.mrf.mxu1 }
 0x4ef   :  { %v3085_v45 = vmul.f32 %v2916_v12, %v2916_v12 }
 0x4f0   :  { %v5630_v56 = vpop.f32.mrf.mxu1 }
 0x4f2   :  { %v2954_v61 = vpop.f32.mrf.mxu1 }
 0x4f3   :  { %v3088_v27 = vmul.f32 %v2954_v61, %v2913_v30  ;;  %v3086_v48 = vmul.f32 %v2954_v61, %v2954_v61 }
 0x4f4   :  { %v5635_v50 = vpop.f32.mrf.mxu1 }
 0x4f6   :  { %v2957_v62 = vpop.f32.mrf.mxu1 }
 0x4f7   :  { %v3089_v21 = vmul.f32 %v2957_v62, %v2916_v12  ;;  %v3087_v23 = vmul.f32 %v2957_v62, %v2957_v62 }
 0x4f8   :  { %v5636_v41 = vpop.f32.mrf.mxu1 }
 0x4fa   :  { %v2995_v7 = vpop.f32.mrf.mxu1 }
 0x4fb   :  { %v3096_v36 = vsub.f32 %v2995_v7, %v3084_v25 }
 0x4fc   :  { %v5641_v18 = vpop.f32.mrf.mxu1 }
 0x4fe   :  { %v2998_v43 = vpop.f32.mrf.mxu1 }
 0x4ff   :  { %v3097_v46 = vsub.f32 %v2998_v43, %v3085_v45 }
 0x500   :  { %v5642_v42 = vpop.f32.mrf.mxu1 }
 0x502   :  { %v3036_v5 = vpop.f32.mrf.mxu1 }
 0x503   :  { %v3098_v19 = vadd.f32 %v3096_v36, %v3036_v5 }
 0x504   :  { %v5647_v52 = vpop.f32.mrf.mxu1 }
 0x505   :  { %v3100_v53 = vsub.f32 %v3098_v19, %v3086_v48 }
 0x506   :  { %v3039_v31 = vpop.f32.mrf.mxu1 }
 0x507   :  { %v3102_v34 = vadd.f32 0.0009, %v3100_v53  ;;  %v3099_v54 = vadd.f32 %v3097_v46, %v3039_v31 }
 0x508   :  { %v5648_v10 = vpop.f32.mrf.mxu1 }
 0x509   :  { %5928 = vrcp.f32 %v3102_v34  ;;  %v3101_v44 = vsub.f32 %v3099_v54, %v3087_v23 }
 0x50a   :  { %v3077_v39 = vpop.f32.mrf.mxu1 }
 0x50b   :  { %v3103_v29 = vadd.f32 0.0009, %v3101_v44  ;;  %v3090_v1 = vsub.f32 %v3077_v39, %v3088_v27 }
 0x50c   :  { %v5653_v3 = vpop.f32.mrf.mxu1 }
 0x50d   :  { %5930 = vrcp.f32 %v3103_v29  ;;  %v3092_v55 = vmul.f32 2.0, %v3090_v1 }
 0x50e   :  { %v3080_v6 = vpop.f32.mrf.mxu1 }
 0x50f   :  { %v3091_v28 = vsub.f32 %v3080_v6, %v3089_v21  ;;  %v3094_v2 = vadd.f32 0.0009, %v3092_v55 }
 0x510   :  { %v5654_v26 = vpop.f32.mrf.mxu1 }
 0x511   :  { %v3093_v4 = vmul.f32 2.0, %v3091_v28 }
 0x512   :  { %v3144_v15 = vpop.f32.mrf.mxu1  ;;  %v6906_v13 = vpop.f32.mrf.mxu0 }
 0x513   :  { %v3095_v11 = vadd.f32 0.0009, %v3093_v4  ;;  %v6915_v35 = vmul.f32 %v6906_v13, %v6906_v13  ;;  %v3315_v61 = vmul.f32 %v3144_v15, %v3144_v15 }
 0x514   :  { %v5659_v59 = vpop.f32.mrf.mxu1  ;;  %v5689_v9 = vpop.f32.mrf.mxu0 }
 0x516   :  { %v5929_v58 = vpop.eup %5928  ;;  %v3147_v24 = vpop.f32.mrf.mxu1 }
 0x517   :  { %v6908_v8 = vpop.f32.mrf.mxu0  ;;  %v3105_v63 = vmul.f32 %v5929_v58, %v3094_v2  ;;  %v3316_v7 = vmul.f32 %v3147_v24, %v3147_v24 }
 0x518   :  { %v5660_v16 = vpop.f32.mrf.mxu1 }
 0x519   :  { %v5690_v14 = vpop.f32.mrf.mxu0  ;;  %v6911_v51 = vmul.f32 %v3105_v63, %v6723_v37  ;;  %v6926_v37 = vmul.f32 %v6908_v8, %v6908_v8 }
 0x51a   :  { %v5931_v40 = vpop.eup %5930  ;;  %v3185_v32 = vpop.f32.mrf.mxu1 }
 0x51b   :  { %v6917_v0 = vpop.f32.mrf.mxu0  ;;  %v3107_v38 = vmul.f32 %v5931_v40, %v3095_v11  ;;  %v3319_v22 = vmul.f32 %v3185_v32, %v3144_v15  ;;  %v3317_v5 = vmul.f32 %v3185_v32, %v3185_v32 }
 0x51c   :  { %v3560_v57 = vsub.f32 %v6917_v0, %v6915_v35  ;;  %v5665_v47 = vpop.f32.mrf.mxu1 }
 0x51d   :  { %v5701_v30 = vpop.f32.mrf.mxu0  ;;  %v6922_v49 = vmul.f32 %v3107_v38, %v6738_v17 }
 0x51e   :  { %v3188_v12 = vpop.f32.mrf.mxu1 }
 0x51f   :  { %v6928_v56 = vpop.f32.mrf.mxu0  ;;  %v3320_v27 = vmul.f32 %v3188_v12, %v3147_v24  ;;  %v3318_v34 = vmul.f32 %v3188_v12, %v3188_v12 }
 0x520   :  { %v3561_v50 = vsub.f32 %v6928_v56, %v6926_v37  ;;  %v5666_v62 = vpop.f32.mrf.mxu1 }
 0x521   :  { %v5702_v25 = vpop.f32.mrf.mxu0 }
 0x522   :  { %v3226_v21 = vpop.f32.mrf.mxu1 }
 0x523   :  { %v6932_v41 = vpop.f32.mrf.mxu0  ;;  %v3327_v17 = vsub.f32 %v3226_v21, %v3315_v61 }
 0x524   :  { %v5671_v45 = vpop.f32.mrf.mxu1 }
 0x525   :  { %v5713_v36 = vpop.f32.mrf.mxu0 }
 0x526   :  { %v3229_v18 = vpop.f32.mrf.mxu1 }
 0x527   :  { %v6934_v43 = vpop.f32.mrf.mxu0  ;;  %v3328_v46 = vsub.f32 %v3229_v18, %v3316_v7 }
 0x528   :  { %v5672_v42 = vpop.f32.mrf.mxu1 }
 0x529   :  { %v5714_v48 = vpop.f32.mrf.mxu0 }
 0x52a   :  { %v3267_v19 = vpop.f32.mrf.mxu1  ;;  %v6948_v48 = vld [vmem:[#allocation7 + $0x20] sm:$0xff]  }
 0x52b   :  { %v6936_v52 = vpop.f32.mrf.mxu0  ;;  %v3329_v23 = vadd.f32 %v3327_v17, %v3267_v19 }
 0x52c   :  { %v5677_v53 = vpop.f32.mrf.mxu1 }
 0x52d   :  { %v5725_v31 = vpop.f32.mrf.mxu0  ;;  %v3331_v54 = vsub.f32 %v3329_v23, %v3317_v5 }
 0x52e   :  { %v3270_v10 = vpop.f32.mrf.mxu1 }
 0x52f   :  { %v6938_v44 = vpop.f32.mrf.mxu0  ;;  %v3333_v39 = vadd.f32 0.0009, %v3331_v54  ;;  %v3330_v29 = vadd.f32 %v3328_v46, %v3270_v10 }
 0x530   :  { %v5678_v1 = vpop.f32.mrf.mxu1 }
 0x531   :  { %v5726_v3 = vpop.f32.mrf.mxu0  ;;  %5932 = vrcp.f32 %v3333_v39  ;;  %v3332_v6 = vsub.f32 %v3330_v29, %v3318_v34 }
 0x532   :  { %v3308_v55 = vpop.f32.mrf.mxu1 }
 0x533   :  { %v6940_v28 = vpop.f32.mrf.mxu0  ;;  %v3334_v26 = vadd.f32 0.0009, %v3332_v6  ;;  %v3321_v15 = vsub.f32 %v3308_v55, %v3319_v22 }
 0x534   :  { %v5683_v2 = vpop.f32.mrf.mxu1 }
 0x535   :  { %v5737_v4 = vpop.f32.mrf.mxu0  ;;  %5934 = vrcp.f32 %v3334_v26  ;;  %v3323_v58 = vmul.f32 2.0, %v3321_v15 }
 0x536   :  { %v3311_v59 = vpop.f32.mrf.mxu1 }
 0x537   :  { %v6942_v9 = vpop.f32.mrf.mxu0  ;;  %v3322_v24 = vsub.f32 %v3311_v59, %v3320_v27  ;;  %v3325_v40 = vadd.f32 0.0009, %v3323_v58 }
 0x538   :  { %v5684_v63 = vpop.f32.mrf.mxu1 }
 0x539   :  { %v5738_v11 = vpop.f32.mrf.mxu0  ;;  %v3324_v32 = vmul.f32 2.0, %v3322_v24 }
 0x53a   :  { %v3418_v16 = vpop.f32.mrf.mxu1 }
 0x53b   :  { %v5749_v14 = vpop.f32.mrf.mxu0  ;;  %v3552_v38 = vmul.f32 %v3418_v16, %v6906_v13  ;;  %v3326_v21 = vadd.f32 0.0009, %v3324_v32  ;;  %v3550_v36 = vmul.f32 %v3418_v16, %v3418_v16 }
 0x53c   :  { %v5695_v47 = vpop.f32.mrf.mxu1 }
 0x53d   :  { %v3898_v30 = vpop.f32.mrf.mxu0  ;;  %v3554_v22 = vsub.f32 %v6932_v41, %v3552_v38 }
 0x53e   :  { %v5933_v12 = vpop.eup %5932  ;;  %v3421_v61 = vpop.f32.mrf.mxu1 }
 0x53f   :  { %v5750_v62 = vpop.f32.mrf.mxu0  ;;  %v3336_v25 = vmul.f32 %v5933_v12, %v3325_v40  ;;  %v3553_v7 = vmul.f32 %v3421_v61, %v6908_v8  ;;  %v3551_v31 = vmul.f32 %v3421_v61, %v3421_v61  ;;  %v3556_v24 = vmul.f32 2.0, %v3554_v22 }
 0x540   :  { %v5696_v27 = vpop.f32.mrf.mxu1  ;;  %v4026_v34 = vpack.c.bf16 %v5750_v62, %v5749_v14  ;;  %v3781_v40 = vmul.f32 %v6936_v52, %v6936_v52 }
 0x541   :  { %v3901_v17 = vpop.f32.mrf.mxu0  ;;  %v3339_v45 = vmul.f32 %v3336_v25, %v3336_v25  ;;  %v3555_v18 = vsub.f32 %v6934_v43, %v3553_v7  ;;  %v3558_v47 = vadd.f32 0.0009, %v3556_v24 }
 0x542   :  { %v4025_v46 = vpack.c.bf16 %v3901_v17, %v3898_v30  ;;  %v5935_v42 = vpop.eup %5934  ;;  %v3500_v13 = vpop.f32.mrf.mxu1 }
 0x543   :  { %v5753_v5 = vpop.f32.mrf.mxu0  ;;  %v6951_v41 = vmul.f32 %v3339_v45, %v6911_v51  ;;  %v3338_v19 = vmul.f32 %v5935_v42, %v3326_v21  ;;  %v3562_v8 = vadd.f32 %v3560_v57, %v3500_v13  ;;  %v3557_v30 = vmul.f32 2.0, %v3555_v18 }
 0x544   :  { %5780 = vmatpush3.bf16.msra.mxu1 %v4025_v46  ;;  %v5707_v23 = vpop.f32.mrf.mxu1 }
 0x545   :  { %5785 = vmatprep.subr.bf16.mxu1 %v6088_v33  ;;  %v3914_v53 = vpop.f32.mrf.mxu0  ;;  %v3340_v43 = vmul.f32 %v3338_v19, %v3338_v19  ;;  %v3564_v54 = vsub.f32 %v3562_v8, %v3550_v36  ;;  %v3559_v45 = vadd.f32 0.0009, %v3557_v30 }
 0x546   :  { %v3503_v10 = vpop.f32.mrf.mxu1 }
 0x547   :  { %5782 = vmatmul.mubr.msk.bf16.vlgmr.msra.gmra.mxu1 %vm114_vm0, %v6948_v48  ;;  %v5754_v51 = vpop.f32.mrf.mxu0  ;;  %v6960_v39 = vmul.f32 %v3340_v43, %v6922_v49  ;;  %v3566_v29 = vadd.f32 0.0009, %v3564_v54  ;;  %v3563_v35 = vadd.f32 %v3561_v50, %v3503_v10 }
 0x548   :  { %5786 = vmatpush3.bf16.msra.mxu1 %v4026_v34  ;;  %5787 = vmatprep.mubr.msk.bf16.mxu1 %vm6089_vm1, %v6088_v33  ;;  %v5708_v0 = vpop.f32.mrf.mxu1  ;;  %v4028_v12 = vpack.c.bf16 %v5754_v51, %v5753_v5 }
 0x549   :  { %v3917_v57 = vpop.f32.mrf.mxu0  ;;  %5791 = vmatprep.subr.bf16.mxu1 %v6088_v33  ;;  %5936 = vrcp.f32 %v3566_v29  ;;  %v3565_v1 = vsub.f32 %v3563_v35, %v3551_v31 }
 0x54a   :  { %v3608_v3 = vpop.f32.mrf.mxu1  ;;  %v4027_v26 = vpack.c.bf16 %v3917_v57, %v3914_v53 }
 0x54b   :  { %v6968_v6 = vpop.f32.mrf.mxu0  ;;  %v3567_v49 = vadd.f32 0.0009, %v3565_v1  ;;  %v6971_v55 = vmul.f32 %v6936_v52, %v3608_v3  ;;  %v3779_v2 = vmul.f32 %v3608_v3, %v3608_v3  ;;  %v3782_v52 = vmul.f32 %v6938_v44, %v6938_v44 }
 0x54c   :  { %v5719_v37 = vpop.f32.mrf.mxu1 }
 0x54d   :  { %v3930_v56 = vpop.f32.mrf.mxu0  ;;  %5938 = vrcp.f32 %v3567_v49 }
 0x54e   :  { %v3611_v50 = vpop.f32.mrf.mxu1 }
 0x54f   :  { %5788 = vmatmul.mubr.msk.bf16.vlgmr.msra.gmra.mxu1 %vm114_vm0, %v6948_v48  ;;  %v6975_v15 = vpop.f32.mrf.mxu0  ;;  %v6978_v4 = vmul.f32 %v6938_v44, %v3611_v50  ;;  %v3780_v16 = vmul.f32 %v3611_v50, %v3611_v50 }
 0x550   :  { %5792 = vmatpush3.bf16.msra.mxu1 %v4027_v26  ;;  %5793 = vmatprep.mubr.msk.bf16.mxu1 %vm6089_vm1, %v6088_v33  ;;  %v5720_v59 = vpop.f32.mrf.mxu1  ;;  %v4030_v57 = vpack.c.bf16 %v6975_v15, %v6968_v6 }
 0x551   :  { %5797 = vmatprep.subr.bf16.mxu1 %v6088_v33  ;;  %v3933_v58 = vpop.f32.mrf.mxu0 }
 0x552   :  { %v3690_v63 = vpop.f32.mrf.mxu1  ;;  %v4029_v5 = vpack.c.bf16 %v3933_v58, %v3930_v56 }
 0x553   :  { %v6983_v11 = vpop.f32.mrf.mxu0  ;;  %v3791_v14 = vsub.f32 %v3690_v63, %v3779_v2 }
 0x554   :  { %v5731_v32 = vpop.f32.mrf.mxu1 }
 0x555   :  { %v6987_v38 = vpop.f32.mrf.mxu0  ;;  %v3793_v61 = vadd.f32 %v3791_v14, %v6940_v28 }
 0x556   :  { %v5937_v62 = vpop.eup %5936  ;;  %v3693_v25 = vpop.f32.mrf.mxu1 }
 0x557   :  { %5794 = vmatmul.mubr.msk.bf16.vlgmr.msra.gmra.mxu1 %vm114_vm0, %v6948_v48  ;;  %v6992_v22 = vpop.f32.mrf.mxu0  ;;  %v3795_v21 = vsub.f32 %v3793_v61, %v3781_v40  ;;  %v3792_v7 = vsub.f32 %v3693_v25, %v3780_v16  ;;  %v3569_v27 = vmul.f32 %v5937_v62, %v3558_v47 }
 0x558   :  { %5798 = vmatpush3.bf16.msra.mxu1 %v4028_v12  ;;  %5799 = vmatprep.mubr.msk.bf16.mxu1 %vm6089_vm1, %v6088_v33  ;;  %v5732_v17 = vpop.f32.mrf.mxu1  ;;  %v4032_v47 = vpack.c.bf16 %v6992_v22, %v6983_v11 }
 0x559   :  { %5803 = vmatprep.subr.bf16.mxu1 %v6088_v33  ;;  %v3949_v28 = vpop.f32.mrf.mxu0  ;;  %v3797_v36 = vadd.f32 0.0009, %v3795_v21  ;;  %v3794_v18 = vadd.f32 %v3792_v7, %v6942_v9  ;;  %v3572_v46 = vmul.f32 %v3569_v27, %v6751_v60 }
 0x55a   :  { %v5939_v42 = vpop.eup %5938  ;;  %v3772_v13 = vpop.f32.mrf.mxu1  ;;  %v4031_v2 = vpack.c.bf16 %v3949_v28, %v6987_v38 }
 0x55b   :  { %v7001_v19 = vpop.f32.mrf.mxu0  ;;  %5940 = vrcp.f32 %v3797_v36  ;;  %v3796_v8 = vsub.f32 %v3794_v18, %v3782_v52  ;;  %v3785_v23 = vsub.f32 %v3772_v13, %v6971_v55  ;;  %v3571_v44 = vmul.f32 %v5939_v42, %v3559_v45 }
 0x55c   :  { %v5743_v53 = vpop.f32.mrf.mxu1 }
 0x55d   :  { %v3962_v43 = vpop.f32.mrf.mxu0  ;;  %v3798_v31 = vadd.f32 0.0009, %v3796_v8  ;;  %v3573_v34 = vmul.f32 %v3571_v44, %v6757_v20  ;;  %v3787_v20 = vmul.f32 2.0, %v3785_v23 }
 0x55e   :  { %v3775_v54 = vpop.f32.mrf.mxu1 }
 0x55f   :  { %5800 = vmatmul.mubr.msk.bf16.vlgmr.msra.gmra.mxu1 %vm114_vm0, %v6948_v48  ;;  %v7007_v60 = vpop.f32.mrf.mxu0  ;;  %5942 = vrcp.f32 %v3798_v31  ;;  %v3786_v9 = vsub.f32 %v3775_v54, %v6978_v4  ;;  %v3789_v3 = vadd.f32 0.0009, %v3787_v20 }
 0x560   :  { %5804 = vmatpush3.bf16.msra.mxu1 %v4029_v5  ;;  %5805 = vmatprep.mubr.msk.bf16.mxu1 %vm6089_vm1, %v6088_v33  ;;  %v5744_v51 = vpop.f32.mrf.mxu1  ;;  %v4034_v11 = vpack.c.bf16 %v7007_v60, %v7001_v19 }
 0x561   :  { %5809 = vmatprep.subr.bf16.mxu1 %v6088_v33  ;;  %v3965_v10 = vpop.f32.mrf.mxu0  ;;  %v3788_v49 = vmul.f32 2.0, %v3786_v9 }
 0x562   :  { %v4033_v29 = vpack.c.bf16 %v3965_v10, %v3962_v43 }
 0x563   :  { %v5769_v35 = vpop.f32.mrf.mxu0  ;;  %v3790_v15 = vadd.f32 0.0009, %v3788_v49 }
 0x564   :  { %5828 = vmatpush3.bf16.msra.mxu0 %v4033_v29 }
 0x565   :  { %v3978_v0 = vpop.f32.mrf.mxu0  ;;  %5839 = vmatprep.subr.bf16.mxu0 %v6088_v33 }
 0x567   :  { %5806 = vmatmul.mubr.msk.bf16.vlgmr.msra.gmra.mxu1 %vm114_vm0, %v6948_v48  ;;  %v5770_v1 = vpop.f32.mrf.mxu0  ;;  %5830 = vmatmul.mubr.msk.bf16.vlgmr.msra.gmra.mxu0 %vm114_vm0, %v6948_v48 }
 0x568   :  { %5810 = vmatpush3.bf16.msra.mxu1 %v4030_v57  ;;  %5811 = vmatprep.mubr.msk.bf16.mxu1 %vm6089_vm1, %v6088_v33  ;;  %v4036_v55 = vpack.c.bf16 %v5770_v1, %v5769_v35  ;;  %v5941_v26 = vpop.eup %5940 }
 0x569   :  { %5815 = vmatprep.subr.bf16.mxu1 %v6088_v33  ;;  %v3981_v37 = vpop.f32.mrf.mxu0  ;;  %5841 = vmatprep.mubr.msk.bf16.mxu0 %vm6089_vm1, %v6088_v33  ;;  %v3800_v6 = vmul.f32 %v5941_v26, %v3789_v3 }
 0x56a   :  { %5840 = vmatpush3.bf16.msra.mxu0 %v4036_v55  ;;  %v4035_v62 = vpack.c.bf16 %v3981_v37, %v3978_v0 }
 0x56b   :  { %v5773_v56 = vpop.f32.mrf.mxu0  ;;  %5851 = vmatprep.subr.bf16.mxu0 %v6088_v33  ;;  %v3803_v50 = vmul.f32 %v3800_v6, %v3800_v6 }
 0x56c   :  { %v5943_v4 = vpop.eup %5942 }
 0x56d   :  { %v3994_v59 = vpop.f32.mrf.mxu0  ;;  %v7027_v58 = vmul.f32 %v3803_v50, %v3572_v46  ;;  %v3802_v24 = vmul.f32 %v5943_v4, %v3790_v15 }
 0x56f   :  { %5812 = vmatmul.mubr.msk.bf16.vlgmr.msra.gmra.mxu1 %vm114_vm0, %v6948_v48  ;;  %v5774_v63 = vpop.f32.mrf.mxu0  ;;  %5842 = vmatmul.mubr.msk.bf16.vlgmr.msra.gmra.mxu0 %vm114_vm0, %v6948_v48  ;;  %v3804_v16 = vmul.f32 %v3802_v24, %v3802_v24 }
 0x570   :  { %5816 = vmatpush3.bf16.msra.mxu1 %v4031_v2  ;;  %5817 = vmatprep.mubr.msk.bf16.mxu1 %vm6089_vm1, %v6088_v33  ;;  %v4038_v38 = vpack.c.bf16 %v5774_v63, %v5773_v56 }
 0x571   :  { %5821 = vmatprep.subr.bf16.mxu1 %v6088_v33  ;;  %v3997_v14 = vpop.f32.mrf.mxu0  ;;  %5853 = vmatprep.mubr.msk.bf16.mxu0 %vm6089_vm1, %v6088_v33  ;;  %v7038_v40 = vmul.f32 %v3804_v16, %v3573_v34 }
 0x572   :  { %v4037_v32 = vpack.c.bf16 %v3997_v14, %v3994_v59 }
 0x573   :  { %v5777_v30 = vpop.f32.mrf.mxu0 }
 0x574   :  { %5852 = vmatpush3.bf16.msra.mxu0 %v4037_v32 }
 0x575   :  { %5863 = vmatprep.subr.bf16.mxu0 %v6088_v33  ;;  %v4010_v12 = vpop.f32.mrf.mxu0 }
 0x577   :  { %5818 = vmatmul.mubr.msk.bf16.vlgmr.msra.gmra.mxu1 %vm114_vm0, %v6948_v48  ;;  %5854 = vmatmul.mubr.msk.bf16.vlgmr.msra.gmra.mxu0 %vm114_vm0, %v6948_v48  ;;  %v5778_v61 = vpop.f32.mrf.mxu0 }
 0x578   :  { %5822 = vmatpush3.bf16.msra.mxu1 %v4032_v47  ;;  %5823 = vmatprep.mubr.msk.bf16.mxu1 %vm6089_vm1, %v6088_v33  ;;  %v4040_v21 = vpack.c.bf16 %v5778_v61, %v5777_v30 }
 0x579   :  { %5833 = vmatprep.subr.bf16.mxu1 %v6088_v33  ;;  %5864 = vmatpush3.bf16.msra.mxu0 %v4038_v38  ;;  %v4013_v25 = vpop.f32.mrf.mxu0 }
 0x57a   :  { %5865 = vmatprep.mubr.msk.bf16.mxu0 %vm6089_vm1, %v6088_v33  ;;  %v4039_v22 = vpack.c.bf16 %v4013_v25, %v4010_v12 }
 0x57f   :  { %5824 = vmatmul.mubr.msk.bf16.vlgmr.msra.gmra.mxu1 %vm114_vm0, %v6948_v48  ;;  %5866 = vmatmul.mubr.msk.bf16.vlgmr.msra.gmra.mxu0 %vm114_vm0, %v6948_v48 }
 0x580   :  { %5834 = vmatpush3.bf16.msra.mxu1 %v4034_v11  ;;  %5835 = vmatprep.mubr.msk.bf16.mxu1 %vm6089_vm1, %v6088_v33 }
 0x581   :  { %5845 = vmatprep.subr.bf16.mxu1 %v6088_v33 }
 0x587   :  { %5836 = vmatmul.mubr.msk.bf16.vlgmr.msra.gmra.mxu1 %vm114_vm0, %v6948_v48 }
 0x588   :  { %5846 = vmatpush3.bf16.msra.mxu1 %v4035_v62  ;;  %5847 = vmatprep.mubr.msk.bf16.mxu1 %vm6089_vm1, %v6088_v33 }
 0x589   :  { %5857 = vmatprep.subr.bf16.mxu1 %v6088_v33 }
 0x58f   :  { %5848 = vmatmul.mubr.msk.bf16.vlgmr.msra.gmra.mxu1 %vm114_vm0, %v6948_v48 }
 0x590   :  { %5858 = vmatpush3.bf16.msra.mxu1 %v4039_v22  ;;  %5859 = vmatprep.mubr.msk.bf16.mxu1 %vm6089_vm1, %v6088_v33 }
 0x591   :  { %5869 = vmatprep.subr.bf16.mxu1 %v6088_v33 }
 0x597   :  { %5860 = vmatmul.mubr.msk.bf16.vlgmr.msra.gmra.mxu1 %vm114_vm0, %v6948_v48 }
 0x598   :  { %5870 = vmatpush3.bf16.msra.mxu1 %v4040_v21  ;;  %5871 = vmatprep.mubr.msk.bf16.mxu1 %vm6089_vm1, %v6088_v33 }
 0x59f   :  { %5872 = vmatmul.mubr.msk.bf16.vlgmr.msra.gmra.mxu1 %vm114_vm0, %v6948_v48 }
 0x607   :  { %v4086_v7 = vpop.f32.mrf.mxu1 }
 0x608   :  { %v4257_v19 = vmul.f32 %v4086_v7, %v4086_v7 }
 0x609   :  { %v5783_v27 = vpop.f32.mrf.mxu1 }
 0x60b   :  { %v4089_v52 = vpop.f32.mrf.mxu1 }
 0x60c   :  { %v4258_v44 = vmul.f32 %v4089_v52, %v4089_v52 }
 0x60d   :  { %v5784_v17 = vpop.f32.mrf.mxu1 }
 0x60f   :  { %v4127_v28 = vpop.f32.mrf.mxu1 }
 0x610   :  { %v4261_v45 = vmul.f32 %v4127_v28, %v4086_v7  ;;  %v4259_v13 = vmul.f32 %v4127_v28, %v4127_v28 }
 0x611   :  { %v5789_v36 = vpop.f32.mrf.mxu1 }
 0x612   :  { %v4291_v33 = vadd.f32 %v4259_v13, %v4257_v19  ;;  %v4287_v15 = vmul.f32 2.0, %v4261_v45 }
 0x613   :  { %v4130_v18 = vpop.f32.mrf.mxu1 }
 0x614   :  { %v4262_v46 = vmul.f32 %v4130_v18, %v4089_v52  ;;  %v4260_v8 = vmul.f32 %v4130_v18, %v4130_v18  ;;  %v4293_v34 = vadd.f32 0.0001, %v4291_v33  ;;  %v4289_v38 = vadd.f32 0.0001, %v4287_v15 }
 0x615   :  { %v5790_v42 = vpop.f32.mrf.mxu1 }
 0x616   :  { %v4292_v43 = vadd.f32 %v4260_v8, %v4258_v44  ;;  %5944 = vrcp.f32 %v4293_v34  ;;  %v4288_v32 = vmul.f32 2.0, %v4262_v46 }
 0x617   :  { %v4168_v5 = vpop.f32.mrf.mxu1 }
 0x618   :  { %v4269_v31 = vsub.f32 %v4168_v5, %v4257_v19  ;;  %v4294_v9 = vadd.f32 0.0001, %v4292_v43  ;;  %v4290_v7 = vadd.f32 0.0001, %v4288_v32 }
 0x619   :  { %v5795_v23 = vpop.f32.mrf.mxu1 }
 0x61a   :  { %5946 = vrcp.f32 %v4294_v9 }
 0x61b   :  { %v4171_v53 = vpop.f32.mrf.mxu1 }
 0x61c   :  { %v4270_v51 = vsub.f32 %v4171_v53, %v4258_v44 }
 0x61d   :  { %v5796_v48 = vpop.f32.mrf.mxu1 }
 0x61f   :  { %v4209_v54 = vpop.f32.mrf.mxu1 }
 0x620   :  { %v4271_v60 = vadd.f32 %v4269_v31, %v4209_v54 }
 0x621   :  { %v5801_v10 = vpop.f32.mrf.mxu1 }
 0x622   :  { %v4273_v29 = vsub.f32 %v4271_v60, %v4259_v13 }
 0x623   :  { %v4212_v35 = vpop.f32.mrf.mxu1  ;;  %v5945_v14 = vpop.eup %5944 }
 0x624   :  { %v4275_v20 = vadd.f32 0.0009, %v4273_v29  ;;  %v4272_v0 = vadd.f32 %v4270_v51, %v4212_v35  ;;  %v4296_v25 = vmul.f32 %v5945_v14, %v4289_v38 }
 0x625   :  { %v5802_v57 = vpop.f32.mrf.mxu1 }
 0x626   :  { %5948 = vrcp.f32 %v4275_v20  ;;  %v4274_v1 = vsub.f32 %v4272_v0, %v4260_v8 }
 0x627   :  { %v4250_v3 = vpop.f32.mrf.mxu1  ;;  %v7077_v49 = vpop.f32.mrf.mxu0 }
 0x628   :  { %v4276_v55 = vadd.f32 0.0009, %v4274_v1  ;;  %v4263_v6 = vsub.f32 %v4250_v3, %v4261_v45  ;;  %v5947_v11 = vpop.eup %5946 }
 0x629   :  { %v5807_v26 = vpop.f32.mrf.mxu1  ;;  %v5831_v37 = vpop.f32.mrf.mxu0  ;;  %v4298_v28 = vmul.f32 %v5947_v11, %v4290_v7 }
 0x62a   :  { %5950 = vrcp.f32 %v4276_v55  ;;  %v4265_v59 = vmul.f32 2.0, %v4263_v6 }
 0x62b   :  { %v4253_v56 = vpop.f32.mrf.mxu1  ;;  %v7079_v50 = vpop.f32.mrf.mxu0  ;;  %v4300_v33 = vmul.f32 %v4298_v28, %v4298_v28 }
 0x62c   :  { %v4264_v24 = vsub.f32 %v4253_v56, %v4262_v46  ;;  %v4267_v12 = vadd.f32 0.0009, %v4265_v59  ;;  %v4299_v46 = vmul.f32 %v4296_v25, %v4296_v25 }
 0x62d   :  { %v5808_v2 = vpop.f32.mrf.mxu1  ;;  %v5832_v4 = vpop.f32.mrf.mxu0  ;;  %v4302_v0 = vmul.f32 %v4300_v33, %v4298_v28 }
 0x62e   :  { %v4266_v61 = vmul.f32 2.0, %v4264_v24  ;;  %v4301_v31 = vmul.f32 %v4299_v46, %v4296_v25 }
 0x62f   :  { %v7081_v63 = vpop.f32.mrf.mxu1  ;;  %v7083_v16 = vpop.f32.mrf.mxu0 }
 0x630   :  { %v4268_v36 = vadd.f32 0.0009, %v4266_v61  ;;  %v4508_v48 = vmul.f32 %v7081_v63, %v7081_v63 }
 0x631   :  { %v5813_v47 = vpop.f32.mrf.mxu1  ;;  %v5843_v30 = vpop.f32.mrf.mxu0 }
 0x633   :  { %v5949_v62 = vpop.eup %5948  ;;  %v7085_v22 = vpop.f32.mrf.mxu1 }
 0x634   :  { %v7087_v21 = vpop.f32.mrf.mxu0  ;;  %v4278_v27 = vmul.f32 %v5949_v62, %v4267_v12  ;;  %v4509_v51 = vmul.f32 %v7085_v22, %v7085_v22 }
 0x635   :  { %v5814_v52 = vpop.f32.mrf.mxu1 }
 0x636   :  { %v5844_v17 = vpop.f32.mrf.mxu0  ;;  %v4281_v45 = vmul.f32 %v4278_v27, %v4278_v27 }
 0x637   :  { %v5951_v18 = vpop.eup %5950  ;;  %v4378_v42 = vpop.f32.mrf.mxu1 }
 0x638   :  { %v7089_v13 = vpop.f32.mrf.mxu0  ;;  %v4283_v5 = vmul.f32 %v4281_v45, %v4278_v27  ;;  %v4280_v19 = vmul.f32 %v5951_v18, %v4268_v36  ;;  %v4510_v8 = vmul.f32 %v4378_v42, %v4378_v42  ;;  %v4512_v61 = vmul.f32 %v4378_v42, %v7081_v63 }
 0x639   :  { %v5819_v23 = vpop.f32.mrf.mxu1 }
 0x63a   :  { %v5855_v44 = vpop.f32.mrf.mxu0  ;;  %v4285_v53 = vmul.f32 %v4283_v5, %v6951_v41  ;;  %v4282_v43 = vmul.f32 %v4280_v19, %v4280_v19  ;;  %v4542_v9 = vadd.f32 %v4510_v8, %v4508_v48  ;;  %v4538_v27 = vmul.f32 2.0, %v4512_v61 }
 0x63b   :  { %v4381_v34 = vpop.f32.mrf.mxu1 }
 0x63c   :  { %v7094_v54 = vpop.f32.mrf.mxu0  ;;  %v4284_v60 = vmul.f32 %v4282_v43, %v4280_v19  ;;  %v4511_v10 = vmul.f32 %v4381_v34, %v4381_v34  ;;  %v7098_v35 = vmul.f32 %v4301_v31, %v4285_v53  ;;  %v4544_v55 = vadd.f32 0.0001, %v4542_v9 }
 0x63d   :  { %v5820_v29 = vpop.f32.mrf.mxu1  ;;  %v4513_v52 = vmul.f32 %v4381_v34, %v7085_v22  ;;  %v4540_v18 = vadd.f32 0.0001, %v4538_v27 }
 0x63e   :  { %v5856_v20 = vpop.f32.mrf.mxu0  ;;  %v4286_v41 = vmul.f32 %v4284_v60, %v6960_v39  ;;  %v4543_v57 = vadd.f32 %v4511_v10, %v4509_v51  ;;  %5952 = vrcp.f32 %v4544_v55 }
 0x63f   :  { %v4419_v1 = vpop.f32.mrf.mxu1  ;;  %v4539_v46 = vmul.f32 2.0, %v4513_v52 }
 0x640   :  { %v7101_v3 = vpop.f32.mrf.mxu0  ;;  %v4520_v26 = vsub.f32 %v4419_v1, %v4508_v48  ;;  %v7103_v37 = vmul.f32 %v4302_v0, %v4286_v41  ;;  %v4545_v2 = vadd.f32 0.0001, %v4543_v57 }
 0x641   :  { %v5825_v6 = vpop.f32.mrf.mxu1  ;;  %v4541_v53 = vadd.f32 0.0001, %v4539_v46 }
 0x642   :  { %v5867_v56 = vpop.f32.mrf.mxu0  ;;  %v4522_v15 = vadd.f32 %v4520_v26, %v7077_v49  ;;  %5954 = vrcp.f32 %v4545_v2 }
 0x643   :  { %v4422_v4 = vpop.f32.mrf.mxu1 }
 0x644   :  { %v7106_v59 = vpop.f32.mrf.mxu0  ;;  %v4524_v24 = vsub.f32 %v4522_v15, %v4510_v8  ;;  %v4521_v14 = vsub.f32 %v4422_v4, %v4509_v51 }
 0x645   :  { %v5826_v39 = vpop.f32.mrf.mxu1 }
 0x646   :  { %v5868_v32 = vpop.f32.mrf.mxu0  ;;  %v4526_v38 = vadd.f32 0.0009, %v4524_v24  ;;  %v4523_v47 = vadd.f32 %v4521_v14, %v7079_v50 }
 0x647   :  { %v4501_v30 = vpop.f32.mrf.mxu1 }
 0x648   :  { %5956 = vrcp.f32 %v4526_v38  ;;  %v4525_v11 = vsub.f32 %v4523_v47, %v4511_v10  ;;  %v4514_v25 = vsub.f32 %v4501_v30, %v4512_v61 }
 0x649   :  { %v5837_v12 = vpop.f32.mrf.mxu1 }
 0x64a   :  { %v4527_v49 = vadd.f32 0.0009, %v4525_v11  ;;  %v4516_v28 = vmul.f32 2.0, %v4514_v25 }
 0x64b   :  { %v4504_v62 = vpop.f32.mrf.mxu1  ;;  %v5953_v36 = vpop.eup %5952 }
 0x64c   :  { %5958 = vrcp.f32 %v4527_v49  ;;  %v4515_v45 = vsub.f32 %v4504_v62, %v4513_v52  ;;  %v4547_v8 = vmul.f32 %v5953_v36, %v4540_v18  ;;  %v4518_v23 = vadd.f32 0.0009, %v4516_v28 }
 0x64d   :  { %v5838_v7 = vpop.f32.mrf.mxu1 }
 0x64e   :  { %v4517_v63 = vmul.f32 2.0, %v4515_v45  ;;  %v4550_v22 = vmul.f32 %v4547_v8, %v4547_v8 }
 0x64f   :  { %v4629_v17 = vpop.f32.mrf.mxu1  ;;  %v5955_v19 = vpop.eup %5954 }
 0x650   :  { %v4630_v44 = vadd.f32 %v4629_v17, %v7083_v16  ;;  %v4549_v31 = vmul.f32 %v5955_v19, %v4541_v53  ;;  %v4519_v60 = vadd.f32 0.0009, %v4517_v63  ;;  %v4552_v57 = vmul.f32 %v4550_v22, %v4547_v8 }
 0x651   :  { %v5849_v50 = vpop.f32.mrf.mxu1 }
 0x652   :  { %v4677_v10 = vadd.f32 %v7089_v13, %v4630_v44  ;;  %v4551_v1 = vmul.f32 %v4549_v31, %v4549_v31  ;;  %v4810_v13 = vsub.f32 1.0, %v7098_v35 }
 0x653   :  { %v4632_v5 = vpop.f32.mrf.mxu1 }
 0x654   :  { %v4633_v0 = vadd.f32 %v4632_v5, %v7087_v21  ;;  %v4679_v26 = vmul.f32 0.33333334, %v4677_v10  ;;  %v4553_v14 = vmul.f32 %v4551_v1, %v4549_v31  ;;  %v4812_v61 = vmul.f32 0.025, %v4810_v13 }
 0x655   :  { %v5957_v42 = vpop.eup %5956  ;;  %v5850_v33 = vpop.f32.mrf.mxu1 }
 0x656   :  { %v4529_v43 = vmul.f32 %v5957_v42, %v4518_v23  ;;  %v4678_v15 = vadd.f32 %v7094_v54, %v4633_v0  ;;  %v4814_v38 = vmul.f32 0.975, %v4679_v26  ;;  %v4811_v54 = vsub.f32 1.0, %v7103_v37 }
 0x657   :  { %v4715_v48 = vpop.f32.mrf.mxu1 }
 0x658   :  { %v4532_v34 = vmul.f32 %v4529_v43, %v4529_v43  ;;  %v4757_v2 = vadd.f32 %v7101_v3, %v4715_v48  ;;  %v4816_v27 = vadd.f32 %v4814_v38, %v4812_v61  ;;  %v4813_v28 = vmul.f32 0.025, %v4811_v54 }
 0x659   :  { %v5959_v9 = vpop.eup %5958  ;;  %v5861_v51 = vpop.f32.mrf.mxu1 }
 0x65a   :  { %v4534_v29 = vmul.f32 %v4532_v34, %v4529_v43  ;;  %v4531_v20 = vmul.f32 %v5959_v9, %v4519_v60 }
 0x65b   :  { %v4718_v41 = vpop.f32.mrf.mxu1 }
 0x65c   :  { %v4536_v16 = vmul.f32 %v4534_v29, %v7027_v58  ;;  %v4533_v55 = vmul.f32 %v4531_v20, %v4531_v20  ;;  %v4680_v58 = vmul.f32 0.33333334, %v4678_v15  ;;  %v4760_v11 = vadd.f32 %v7106_v59, %v4718_v41 }
 0x65d   :  { %v5862_v6 = vpop.f32.mrf.mxu1 }
 0x65e   :  { %v4535_v56 = vmul.f32 %v4533_v55, %v4531_v20  ;;  %v4818_v4 = vmul.f32 %v4552_v57, %v4536_v16 }
 0x65f   :  { %v4797_v24 = vpop.f32.mrf.mxu1 }
 0x660   :  { %v4537_v21 = vmul.f32 %v4535_v56, %v7038_v40  ;;  %v4804_v39 = vadd.f32 %v4797_v24, %v4757_v2  ;;  %v4820_v32 = vsub.f32 1.0, %v4818_v4  ;;  %v4815_v40 = vmul.f32 0.975, %v4680_v58 }
 0x661   :  { %v5873_v47 = vpop.f32.mrf.mxu1 }
 0x662   :  { %v4806_v30 = vmul.f32 0.33333334, %v4804_v39  ;;  %v4819_v12 = vmul.f32 %v4553_v14, %v4537_v21  ;;  %v4822_v49 = vmul.f32 0.025, %v4820_v32  ;;  %v4817_v18 = vadd.f32 %v4815_v40, %v4813_v28 }
 0x663   :  { %v4800_v3 = vpop.f32.mrf.mxu1 }
 0x664   :  { %v4824_v62 = vmul.f32 0.975, %v4806_v30  ;;  %v4805_v35 = vadd.f32 %v4800_v3, %v4760_v11  ;;  %v4821_v25 = vsub.f32 1.0, %v4819_v12 }
 0x665   :  { %v5874_v7 = vpop.f32.mrf.mxu1 }
 0x666   :  { %v4826_v52 = vadd.f32 %v4824_v62, %v4822_v49  ;;  %v4807_v17 = vmul.f32 0.33333334, %v4805_v35  ;;  %v4823_v45 = vmul.f32 0.025, %v4821_v25 }
 0x668   :  { %v4825_v36 = vmul.f32 0.975, %v4807_v17  ;;  %v4828_v50 = vadd.f32 %v4826_v52, %v4816_v27 }
 0x66a   :  { %v4827_v59 = vadd.f32 %v4825_v36, %v4823_v45  ;;  %v4830_v46 = vsel %vm114_vm0, %v4828_v50, 0.0 }
 0x66b   :  { %4831 = vadd.xlane.f32.xlu0 %v4830_v46 }
 0x66c   :  { %v4829_v37 = vadd.f32 %v4827_v59, %v4817_v18 }
 0x66e   :  { %v4833_v5 = vsel %vm114_vm0, %v4829_v37, 0.0 }
 0x66f   :  { %4834 = vadd.xlane.f32.xlu0 %v4833_v5 }
 0x6f4   :  { %v4832_v19 = vpop.xlane.xlu0 %4831 }
 0x6f8   :  { %v4835_v8 = vpop.xlane.xlu0 %4834 }
 0x6f9   :  { %v4836_v23 = vadd.f32 %v4835_v8, %v4832_v19 }
 0x6fb   :  { %v4837_v63 = vrot.slane %v4836_v23, 4 }
 0x6fd   :  { %v4838_v42 = vadd.f32 %v4837_v63, %v4836_v23 }
 0x6ff   :  { %v4839_v44 = vrot.slane %v4838_v42, 2 }
 0x701   :  { %v4840_v33 = vadd.f32 %v4839_v44, %v4838_v42 }
 0x703   :  { %v4841_v53 = vrot.slane %v4840_v33, 1 }
 0x705   :  { %v4842_v43 = vadd.f32 %v4841_v53, %v4840_v33 }
 0x707   :  { %4844 = vst.msk [vmem:[#allocation10] sm:$0x1] %vm4843_vm2, %v4842_v43 }
 0x708   :  { %6063 = shalt.err (!%p6060_p10)
}
 0x709   :  { %4854 = dma.vmem_to_hbm [thread:$0]  %s4852_s3, 16, %s7130_s4, [#allocation4]  }
 0x70a   :  { %6078 = dma.done.wait [#allocation4], 16  }
 0x70b   :  { %6079 = vsyncadd [#allocation4], 4294967280 }
 0x70c   :  { %4858 = vsyncpa [#allocation3], 1 }
 0x70d   :  { %4859 = vsyncpa [#allocation6], 1 }
 0x70e   :  { %4860 = vsyncpa [#allocation9], 1 }
 0x70f   :  { %4861 = vsyncpa [#allocation4], 1 }

</bundles_post_ra>
